<compile_context>
chip_gen: v7x
topology: tpu7x:2x2x1
jax: 0.10.0
libtpu: 0.0.40
codegen_flags: <defaults>
</compile_context>

<pallas_src>
import functools

import jax
import jax.numpy as jnp
from jax.experimental import pallas as pl
from jax.experimental.pallas import tpu as pltpu


def _sigmoid_1eup(x):
    # sigmoid(x) == 0.5 * tanh(0.5 * x) + 0.5 : one EUP transcendental.
    return 0.5 * jnp.tanh(0.5 * x) + 0.5


def _convlstm_kernel(x_ref, h_ref, c_ref, w_ref, bias_ref, h_out_ref, c_out_ref,
                     spad_ref, patch_ref, acc_ref,
                     *, k, H, W, hid, cin, cpad, halo, bpg):
    # x_ref     : (bpg, cin, HW)              input, channel-major, spatial flattened
    # h_ref     : (bpg, hid, HW)              previous hidden state
    # c_ref     : (bpg, hid, HW)              previous cell state
    # w_ref     : (4*hid, k*k*cpad) bf16      fused conv weights (tap-major, chan-minor)
    # bias_ref  : (4*hid, 1) f32              conv bias
    # spad_ref  : (cpad, bpg*(HW+2*halo)) bf16   zero-haloed stacked [h ; x] buffer
    # patch_ref : (k*k*cpad, bpg*HW) bf16        im2col patch matrix
    # acc_ref   : (4*hid, bpg*HW) f32            gate pre-activations
    HW = H * W
    C = hid + cin
    p = k // 2
    stride = HW + 2 * halo

    # ---- zero only what the data writes below do NOT cover: the halo bands
    #      of each batch element and the channel-pad rows. Re-done every grid
    #      step (never gated on program_id -> safe under megacore). ----------
    zero_halo = jnp.zeros((cpad, halo), jnp.bfloat16)
    for b in range(bpg):
        base = b * stride
        spad_ref[:, base:base + halo] = zero_halo
        spad_ref[:, base + halo + HW:base + stride] = zero_halo
    if cpad > C:
        zero_rows = jnp.zeros((cpad - C, HW), jnp.bfloat16)
        for b in range(bpg):
            base = b * stride + halo
            spad_ref[C:cpad, base:base + HW] = zero_rows

    # ---- stack [prev_hidden ; input] channel-major, cast to bf16 once. -----
    for b in range(bpg):
        base = b * stride + halo
        spad_ref[0:hid, base:base + HW] = h_ref[b].astype(jnp.bfloat16)
        spad_ref[hid:C, base:base + HW] = x_ref[b].astype(jnp.bfloat16)

    # ---- lane-wrap masks: only ox != 0 taps need masking; rows that fall
    #      outside [0, H) already read zeros from the halo bands. ------------
    xx = jax.lax.broadcasted_iota(jnp.int32, (1, HW), 1) % W
    xmask = {}
    for ox in range(-p, p + 1):
        if ox == 0:
            continue
        xmask[ox] = (xx < (W - ox)) if ox > 0 else (xx >= -ox)
    zero_bf16 = jnp.zeros((), jnp.bfloat16)

    # ---- im2col: one lane-shifted (cpad, HW) bf16 block per tap/element, all
    #      static slices, stored straight into the 16-aligned tap blocks. ----
    t = 0
    for dy in range(k):
        for dx in range(k):
            oy, ox = dy - p, dx - p
            off = oy * W + ox
            for b in range(bpg):
                src = b * stride + halo + off
                blk = spad_ref[:, src:src + HW]                  # (cpad, HW) bf16
                if ox != 0:
                    blk = jnp.where(xmask[ox], blk, zero_bf16)
                patch_ref[t * cpad:(t + 1) * cpad, b * HW:(b + 1) * HW] = blk
            t += 1

    # ---- one fused MXU matmul (bf16 operands, f32 accumulation) + bias. ----
    acc_ref[...] = (
        jnp.dot(w_ref[...], patch_ref[...], preferred_element_type=jnp.float32)
        + bias_ref[...])                                         # (4*hid, bpg*HW)

    # ---- gate nonlinearities + state update in 128-lane aligned chunks. ----
    chunk = 128 if HW % 128 == 0 else HW
    for b in range(bpg):
        for ci in range(HW // chunk):
            lo = ci * chunk
            a0 = b * HW + lo
            i_g = _sigmoid_1eup(acc_ref[0 * hid:1 * hid, a0:a0 + chunk])
            r_g = _sigmoid_1eup(acc_ref[1 * hid:2 * hid, a0:a0 + chunk])
            o_g = _sigmoid_1eup(acc_ref[2 * hid:3 * hid, a0:a0 + chunk])
            g_g = jnp.tanh(acc_ref[3 * hid:4 * hid, a0:a0 + chunk])
            cell = r_g * c_ref[b, :, lo:lo + chunk] + i_g * g_g
            hidden = o_g * jnp.tanh(cell)
            c_out_ref[b, :, lo:lo + chunk] = cell.astype(c_out_ref.dtype)
            h_out_ref[b, :, lo:lo + chunk] = hidden.astype(h_out_ref.dtype)


def _pick_batch_per_step(B):
    """Fold the batch into the matmul N on single-TC chips; keep >= 2 grid
    steps on dual-TensorCore chips (v7x) so both cores get work."""
    try:
        kind = jax.devices()[0].device_kind.lower()
    except Exception:
        kind = ""
    if "v7" in kind:
        return B // 2 if (B >= 2 and B % 2 == 0) else 1
    return B


def conv_lstm_forward(x, w_oihw, bias, prev_state=None, batch_per_step=None):
    """Matches ConvLSTM.forward: x is NCHW; returns (hidden, cell), both NCHW."""
    B, Cin, H, W = x.shape
    out_ch, in_ch, k, _ = w_oihw.shape
    hid = out_ch // 4
    assert in_ch == Cin + hid
    HW = H * W
    p = k // 2

    if prev_state is None:
        prev_h = jnp.zeros((B, hid, H, W), x.dtype)
        prev_c = jnp.zeros((B, hid, H, W), x.dtype)
    else:
        prev_h, prev_c = prev_state

    # Channel-major, spatially flattened views (free reshapes, no transposes).
    x_r = x.reshape(B, Cin, HW)
    h_r = prev_h.reshape(B, hid, HW)
    c_r = prev_c.reshape(B, hid, HW)

    # Weights -> one (4*hid, k*k*cpad) bf16 matrix.  Per-tap channel blocks
    # are ordered [hidden-channels, input-channels, zero-pad] to match the
    # kernel's stacked buffer; cpad is 16-aligned so bf16 tap blocks land on
    # packed-sublane boundaries.  Tap order is (dy, dx) row-major.
    C = Cin + hid
    cpad = ((C + 15) // 16) * 16
    parts = [w_oihw[:, Cin:, :, :], w_oihw[:, :Cin, :, :]]
    if cpad > C:
        parts.append(jnp.zeros((out_ch, cpad - C, k, k), w_oihw.dtype))
    w_cat = jnp.concatenate(parts, axis=1)                       # (4*hid, cpad, k, k)
    w_flat = (jnp.transpose(w_cat, (0, 2, 3, 1))
              .reshape(out_ch, k * k * cpad)
              .astype(jnp.bfloat16))
    b2d = bias.reshape(out_ch, 1).astype(jnp.float32)

    halo = ((p * W + p + 7) // 8) * 8                            # minimal zero halo
    if batch_per_step is None:
        batch_per_step = _pick_batch_per_step(B)
    bpg = max(1, min(int(batch_per_step), B))
    while B % bpg:                                               # keep the grid exact
        bpg -= 1
    stride = HW + 2 * halo
    K = k * k * cpad

    kernel = functools.partial(
        _convlstm_kernel, k=k, H=H, W=W, hid=hid, cin=Cin,
        cpad=cpad, halo=halo, bpg=bpg)

    h_new, c_new = pl.pallas_call(
        kernel,
        out_shape=(
            jax.ShapeDtypeStruct((B, hid, HW), x.dtype),
            jax.ShapeDtypeStruct((B, hid, HW), x.dtype),
        ),
        grid=(B // bpg,),
        in_specs=[
            pl.BlockSpec((bpg, Cin, HW), lambda g: (g, 0, 0)),
            pl.BlockSpec((bpg, hid, HW), lambda g: (g, 0, 0)),
            pl.BlockSpec((bpg, hid, HW), lambda g: (g, 0, 0)),
            pl.BlockSpec((out_ch, K), lambda g: (0, 0)),
            pl.BlockSpec((out_ch, 1), lambda g: (0, 0)),
        ],
        out_specs=(
            pl.BlockSpec((bpg, hid, HW), lambda g: (g, 0, 0)),
            pl.BlockSpec((bpg, hid, HW), lambda g: (g, 0, 0)),
        ),
        scratch_shapes=[
            pltpu.VMEM((cpad, bpg * stride), jnp.bfloat16),      # haloed [h;x] stack
            pltpu.VMEM((K, bpg * HW), jnp.bfloat16),             # im2col patches
            pltpu.VMEM((out_ch, bpg * HW), jnp.float32),         # gate pre-activations
        ],
        compiler_params=pltpu.CompilerParams(
            dimension_semantics=("parallel",)),                  # v7x: steps over 2 TCs
    )(x_r, h_r, c_r, w_flat, b2d)

    # (B, hid, H*W) is already channel-major == NCHW after a free reshape.
    return h_new.reshape(B, hid, H, W), c_new.reshape(B, hid, H, W)


def _reference_forward(x, w_oihw, bias, prev_state=None, mxu_bf16=False):
    """Pure-JAX mirror of the PyTorch forward (optionally bf16 conv operands)."""
    B, Cin, H, W = x.shape
    hid = w_oihw.shape[0] // 4
    if prev_state is None:
        prev_h = jnp.zeros((B, hid, H, W), x.dtype)
        prev_c = jnp.zeros((B, hid, H, W), x.dtype)
    else:
        prev_h, prev_c = prev_state
    stacked = jnp.concatenate([x, prev_h], axis=1)
    lhs, rhs = stacked, w_oihw
    if mxu_bf16:
        lhs = lhs.astype(jnp.bfloat16)
        rhs = rhs.astype(jnp.bfloat16)
    gates = jax.lax.conv_general_dilated(
        lhs, rhs, window_strides=(1, 1), padding="SAME",
        dimension_numbers=("NCHW", "OIHW", "NCHW"),
        preferred_element_type=jnp.float32,
    ) + bias.reshape(1, -1, 1, 1)
    i, r, o, g = jnp.split(gates, 4, axis=1)
    i, r, o = jax.nn.sigmoid(i), jax.nn.sigmoid(r), jax.nn.sigmoid(o)
    g = jnp.tanh(g)
    cell = r * prev_c + i * g
    hidden = o * jnp.tanh(cell)
    return hidden, cell


if __name__ == "__main__":
    # Module config: input_size=4, hidden_size=32, kernel_size=3.
    B, Cin, H, W = 2, 4, 16, 16
    hid, k = 32, 3
    C_total = Cin + hid

    key = jax.random.PRNGKey(0)
    kx, kw, kb = jax.random.split(key, 3)
    x = jax.random.normal(kx, (B, Cin, H, W), dtype=jnp.float32)
    w = 0.1 * jax.random.normal(kw, (4 * hid, C_total, k, k), dtype=jnp.float32)
    b = 0.1 * jax.random.normal(kb, (4 * hid,), dtype=jnp.float32)

    fwd = jax.jit(conv_lstm_forward)
    hidden, cell = fwd(x, w, b)
    jax.block_until_ready((hidden, cell))

    # Tight check: reference conv also uses bf16 operands / f32 accumulation,
    # i.e. the same math as the kernel's MXU path.
    h_bf, c_bf = _reference_forward(x, w, b, mxu_bf16=True)
    assert jnp.allclose(hidden, h_bf, atol=1e-3, rtol=1e-3)
    assert jnp.allclose(cell, c_bf, atol=1e-3, rtol=1e-3)

    # Semantic check against the full-f32 PyTorch-equivalent forward; the loose
    # tolerance only accounts for the bf16 MXU operands.
    h_32, c_32 = _reference_forward(x, w, b, mxu_bf16=False)
    assert jnp.allclose(hidden, h_32, atol=5e-2, rtol=5e-2)
    assert jnp.allclose(cell, c_32, atol=5e-2, rtol=5e-2)

    print("KERNEL_OK")
</pallas_src>

<mosaic_0001>
module attributes {stable_mosaic.version = 11 : i64} {
  func.func @_convlstm_kernel(%arg0: i32, %arg1: memref<2x4x256xf32, #tpu.memory_space<vmem>>, %arg2: memref<2x32x256xf32, #tpu.memory_space<vmem>>, %arg3: memref<2x32x256xf32, #tpu.memory_space<vmem>>, %arg4: memref<128x432xbf16, #tpu.memory_space<vmem>>, %arg5: memref<128x1xf32, #tpu.memory_space<vmem>>, %arg6: memref<2x32x256xf32, #tpu.memory_space<vmem>>, %arg7: memref<2x32x256xf32, #tpu.memory_space<vmem>>, %arg8: memref<48x608xbf16, #tpu.memory_space<vmem>>, %arg9: memref<432x512xbf16, #tpu.memory_space<vmem>>, %arg10: memref<128x512xf32, #tpu.memory_space<vmem>>) attributes {dimension_semantics = [#tpu.dimension_semantics<parallel>], iteration_bounds = array<i64: 1>, scalar_prefetch = 0 : i64, scratch_operands = 3 : i64, tpu.core_type = #tpu.core_type<tc>, window_params = [{transform_indices = @transform_0, window_bounds = array<i64: 2, 4, 256>}, {transform_indices = @transform_1, window_bounds = array<i64: 2, 32, 256>}, {transform_indices = @transform_2, window_bounds = array<i64: 2, 32, 256>}, {pipeline_mode = #tpu.pipeline_mode<synchronous>, transform_indices = @transform_3, window_bounds = array<i64: 128, 432>}, {pipeline_mode = #tpu.pipeline_mode<synchronous>, transform_indices = @transform_4, window_bounds = array<i64: 128, 1>}, {transform_indices = @transform_5, window_bounds = array<i64: 2, 32, 256>}, {transform_indices = @transform_6, window_bounds = array<i64: 2, 32, 256>}]} {
    %cst = arith.constant 0.000000e+00 : bf16
    %0 = vector.broadcast %cst : bf16 to vector<48x24xbf16>
    %c0 = arith.constant 0 : index
    %c0_0 = arith.constant 0 : index
    %1 = vector.load %arg8[%c0, %c0_0] : memref<48x608xbf16, #tpu.memory_space<vmem>>, vector<48x24xbf16>
    tpu.vector_store %arg8[%c0, %c0_0], %0 {strides = array<i32>} : memref<48x608xbf16, #tpu.memory_space<vmem>>, vector<48x24xbf16>,
    %c0_1 = arith.constant 0 : index
    %c280 = arith.constant 280 : index
    %2 = vector.load %arg8[%c0_1, %c280] : memref<48x608xbf16, #tpu.memory_space<vmem>>, vector<48x24xbf16>
    tpu.vector_store %arg8[%c0_1, %c280], %0 {strides = array<i32>} : memref<48x608xbf16, #tpu.memory_space<vmem>>, vector<48x24xbf16>,
    %c0_2 = arith.constant 0 : index
    %c304 = arith.constant 304 : index
    %3 = vector.load %arg8[%c0_2, %c304] : memref<48x608xbf16, #tpu.memory_space<vmem>>, vector<48x24xbf16>
    tpu.vector_store %arg8[%c0_2, %c304], %0 {strides = array<i32>} : memref<48x608xbf16, #tpu.memory_space<vmem>>, vector<48x24xbf16>,
    %c0_3 = arith.constant 0 : index
    %c584 = arith.constant 584 : index
    %4 = vector.load %arg8[%c0_3, %c584] : memref<48x608xbf16, #tpu.memory_space<vmem>>, vector<48x24xbf16>
    tpu.vector_store %arg8[%c0_3, %c584], %0 {strides = array<i32>} : memref<48x608xbf16, #tpu.memory_space<vmem>>, vector<48x24xbf16>,
    %cst_4 = arith.constant 0.000000e+00 : bf16
    %5 = vector.broadcast %cst_4 : bf16 to vector<12x256xbf16>
    %c36 = arith.constant 36 : index
    %c24 = arith.constant 24 : index
    %6 = vector.load %arg8[%c36, %c24] : memref<48x608xbf16, #tpu.memory_space<vmem>>, vector<12x256xbf16>
    tpu.vector_store %arg8[%c36, %c24], %5 {strides = array<i32>} : memref<48x608xbf16, #tpu.memory_space<vmem>>, vector<12x256xbf16>,
    %c36_5 = arith.constant 36 : index
    %c328 = arith.constant 328 : index
    %7 = vector.load %arg8[%c36_5, %c328] : memref<48x608xbf16, #tpu.memory_space<vmem>>, vector<12x256xbf16>
    tpu.vector_store %arg8[%c36_5, %c328], %5 {strides = array<i32>} : memref<48x608xbf16, #tpu.memory_space<vmem>>, vector<12x256xbf16>,
    %c0_6 = arith.constant 0 : index
    %c0_7 = arith.constant 0 : index
    %c0_8 = arith.constant 0 : index
    %8 = vector.load %arg2[%c0_6, %c0_7, %c0_8] : memref<2x32x256xf32, #tpu.memory_space<vmem>>, vector<1x32x256xf32>
    %9 = vector.shape_cast %8 : vector<1x32x256xf32> to vector<32x256xf32>
    %10 = arith.truncf %9 : vector<32x256xf32> to vector<32x256xbf16>
    %c0_9 = arith.constant 0 : index
    %c24_10 = arith.constant 24 : index
    %11 = vector.load %arg8[%c0_9, %c24_10] : memref<48x608xbf16, #tpu.memory_space<vmem>>, vector<32x256xbf16>
    tpu.vector_store %arg8[%c0_9, %c24_10], %10 {strides = array<i32>} : memref<48x608xbf16, #tpu.memory_space<vmem>>, vector<32x256xbf16>,
    %c0_11 = arith.constant 0 : index
    %c0_12 = arith.constant 0 : index
    %c0_13 = arith.constant 0 : index
    %12 = vector.load %arg1[%c0_11, %c0_12, %c0_13] : memref<2x4x256xf32, #tpu.memory_space<vmem>>, vector<1x4x256xf32>
    %13 = vector.shape_cast %12 : vector<1x4x256xf32> to vector<4x256xf32>
    %14 = arith.truncf %13 : vector<4x256xf32> to vector<4x256xbf16>
    %c32 = arith.constant 32 : index
    %c24_14 = arith.constant 24 : index
    %15 = vector.load %arg8[%c32, %c24_14] : memref<48x608xbf16, #tpu.memory_space<vmem>>, vector<4x256xbf16>
    tpu.vector_store %arg8[%c32, %c24_14], %14 {strides = array<i32>} : memref<48x608xbf16, #tpu.memory_space<vmem>>, vector<4x256xbf16>,
    %c1 = arith.constant 1 : index
    %c0_15 = arith.constant 0 : index
    %c0_16 = arith.constant 0 : index
    %16 = vector.load %arg2[%c1, %c0_15, %c0_16] : memref<2x32x256xf32, #tpu.memory_space<vmem>>, vector<1x32x256xf32>
    %17 = vector.shape_cast %16 : vector<1x32x256xf32> to vector<32x256xf32>
    %18 = arith.truncf %17 : vector<32x256xf32> to vector<32x256xbf16>
    %c0_17 = arith.constant 0 : index
    %c328_18 = arith.constant 328 : index
    %19 = vector.load %arg8[%c0_17, %c328_18] : memref<48x608xbf16, #tpu.memory_space<vmem>>, vector<32x256xbf16>
    tpu.vector_store %arg8[%c0_17, %c328_18], %18 {strides = array<i32>} : memref<48x608xbf16, #tpu.memory_space<vmem>>, vector<32x256xbf16>,
    %c1_19 = arith.constant 1 : index
    %c0_20 = arith.constant 0 : index
    %c0_21 = arith.constant 0 : index
    %20 = vector.load %arg1[%c1_19, %c0_20, %c0_21] : memref<2x4x256xf32, #tpu.memory_space<vmem>>, vector<1x4x256xf32>
    %21 = vector.shape_cast %20 : vector<1x4x256xf32> to vector<4x256xf32>
    %22 = arith.truncf %21 : vector<4x256xf32> to vector<4x256xbf16>
    %c32_22 = arith.constant 32 : index
    %c328_23 = arith.constant 328 : index
    %23 = vector.load %arg8[%c32_22, %c328_23] : memref<48x608xbf16, #tpu.memory_space<vmem>>, vector<4x256xbf16>
    tpu.vector_store %arg8[%c32_22, %c328_23], %22 {strides = array<i32>} : memref<48x608xbf16, #tpu.memory_space<vmem>>, vector<4x256xbf16>,
    %24 = tpu.iota {dimensions = array<i32: 1>} : vector<1x256xi32>
    %c16_i32 = arith.constant 16 : i32
    %c0_i32 = arith.constant 0 : i32
    %25 = arith.cmpi eq, %c16_i32, %c0_i32 : i32
    %c1_i32 = arith.constant 1 : i32
    %26 = arith.select %25, %c1_i32, %c16_i32 : i32
    %27 = vector.broadcast %26 : i32 to vector<1x256xi32>
    %28 = arith.remsi %24, %27 : vector<1x256xi32>
    %c0_i32_24 = arith.constant 0 : i32
    %29 = vector.broadcast %c0_i32_24 : i32 to vector<1x256xi32>
    %30 = arith.cmpi ne, %28, %29 : vector<1x256xi32>
    %c0_i32_25 = arith.constant 0 : i32
    %31 = vector.broadcast %c0_i32_25 : i32 to vector<1x256xi32>
    %32 = arith.cmpi slt, %28, %31 : vector<1x256xi32>
    %c0_i32_26 = arith.constant 0 : i32
    %33 = arith.cmpi slt, %26, %c0_i32_26 : i32
    %34 = vector.broadcast %33 : i1 to vector<1x256xi1>
    %35 = vector.broadcast %34 : vector<1x256xi1> to vector<1x256xi1>
    %36 = arith.xori %32, %35 : vector<1x256xi1>
    %37 = arith.andi %36, %30 : vector<1x256xi1>
    %38 = vector.broadcast %26 : i32 to vector<1x256xi32>
    %39 = arith.addi %28, %38 : vector<1x256xi32>
    %40 = arith.select %37, %39, %28 : vector<1x256xi1>, vector<1x256xi32>
    %c1_i32_27 = arith.constant 1 : i32
    %41 = vector.broadcast %c1_i32_27 : i32 to vector<1x256xi32>
    %42 = arith.cmpi sge, %40, %41 : vector<1x256xi32>
    %c15_i32 = arith.constant 15 : i32
    %43 = vector.broadcast %c15_i32 : i32 to vector<1x256xi32>
    %44 = arith.cmpi slt, %40, %43 : vector<1x256xi32>
    %c0_28 = arith.constant 0 : index
    %c7 = arith.constant 7 : index
    %45 = vector.load %arg8[%c0_28, %c7] : memref<48x608xbf16, #tpu.memory_space<vmem>>, vector<48x256xbf16>
    %cst_29 = arith.constant 0.000000e+00 : bf16
    %46 = vector.shape_cast %42 : vector<1x256xi1> to vector<1x256xi1>
    %47 = vector.broadcast %46 : vector<1x256xi1> to vector<48x256xi1>
    %48 = vector.broadcast %cst_29 : bf16 to vector<48x256xbf16>
    %49 = arith.select %47, %45, %48 : vector<48x256xi1>, vector<48x256xbf16>
    %c0_30 = arith.constant 0 : index
    %c0_31 = arith.constant 0 : index
    %50 = vector.load %arg9[%c0_30, %c0_31] : memref<432x512xbf16, #tpu.memory_space<vmem>>, vector<48x256xbf16>
    tpu.vector_store %arg9[%c0_30, %c0_31], %49 {strides = array<i32>} : memref<432x512xbf16, #tpu.memory_space<vmem>>, vector<48x256xbf16>,
    %c0_32 = arith.constant 0 : index
    %c311 = arith.constant 311 : index
    %51 = vector.load %arg8[%c0_32, %c311] : memref<48x608xbf16, #tpu.memory_space<vmem>>, vector<48x256xbf16>
    %cst_33 = arith.constant 0.000000e+00 : bf16
    %52 = vector.shape_cast %42 : vector<1x256xi1> to vector<1x256xi1>
    %53 = vector.broadcast %52 : vector<1x256xi1> to vector<48x256xi1>
    %54 = vector.broadcast %cst_33 : bf16 to vector<48x256xbf16>
    %55 = arith.select %53, %51, %54 : vector<48x256xi1>, vector<48x256xbf16>
    %c0_34 = arith.constant 0 : index
    %c256 = arith.constant 256 : index
    %56 = vector.load %arg9[%c0_34, %c256] : memref<432x512xbf16, #tpu.memory_space<vmem>>, vector<48x256xbf16>
    tpu.vector_store %arg9[%c0_34, %c256], %55 {strides = array<i32>} : memref<432x512xbf16, #tpu.memory_space<vmem>>, vector<48x256xbf16>,
    %c0_35 = arith.constant 0 : index
    %c8 = arith.constant 8 : index
    %57 = vector.load %arg8[%c0_35, %c8] : memref<48x608xbf16, #tpu.memory_space<vmem>>, vector<48x256xbf16>
    %c48 = arith.constant 48 : index
    %c0_36 = arith.constant 0 : index
    %58 = vector.load %arg9[%c48, %c0_36] : memref<432x512xbf16, #tpu.memory_space<vmem>>, vector<48x256xbf16>
    tpu.vector_store %arg9[%c48, %c0_36], %57 {strides = array<i32>} : memref<432x512xbf16, #tpu.memory_space<vmem>>, vector<48x256xbf16>,
    %c0_37 = arith.constant 0 : index
    %c312 = arith.constant 312 : index
    %59 = vector.load %arg8[%c0_37, %c312] : memref<48x608xbf16, #tpu.memory_space<vmem>>, vector<48x256xbf16>
    %c48_38 = arith.constant 48 : index
    %c256_39 = arith.constant 256 : index
    %60 = vector.load %arg9[%c48_38, %c256_39] : memref<432x512xbf16, #tpu.memory_space<vmem>>, vector<48x256xbf16>
    tpu.vector_store %arg9[%c48_38, %c256_39], %59 {strides = array<i32>} : memref<432x512xbf16, #tpu.memory_space<vmem>>, vector<48x256xbf16>,
    %c0_40 = arith.constant 0 : index
    %c9 = arith.constant 9 : index
    %61 = vector.load %arg8[%c0_40, %c9] : memref<48x608xbf16, #tpu.memory_space<vmem>>, vector<48x256xbf16>
    %cst_41 = arith.constant 0.000000e+00 : bf16
    %62 = vector.shape_cast %44 : vector<1x256xi1> to vector<1x256xi1>
    %63 = vector.broadcast %62 : vector<1x256xi1> to vector<48x256xi1>
    %64 = vector.broadcast %cst_41 : bf16 to vector<48x256xbf16>
    %65 = arith.select %63, %61, %64 : vector<48x256xi1>, vector<48x256xbf16>
    %c96 = arith.constant 96 : index
    %c0_42 = arith.constant 0 : index
    %66 = vector.load %arg9[%c96, %c0_42] : memref<432x512xbf16, #tpu.memory_space<vmem>>, vector<48x256xbf16>
    tpu.vector_store %arg9[%c96, %c0_42], %65 {strides = array<i32>} : memref<432x512xbf16, #tpu.memory_space<vmem>>, vector<48x256xbf16>,
    %c0_43 = arith.constant 0 : index
    %c313 = arith.constant 313 : index
    %67 = vector.load %arg8[%c0_43, %c313] : memref<48x608xbf16, #tpu.memory_space<vmem>>, vector<48x256xbf16>
    %cst_44 = arith.constant 0.000000e+00 : bf16
    %68 = vector.shape_cast %44 : vector<1x256xi1> to vector<1x256xi1>
    %69 = vector.broadcast %68 : vector<1x256xi1> to vector<48x256xi1>
    %70 = vector.broadcast %cst_44 : bf16 to vector<48x256xbf16>
    %71 = arith.select %69, %67, %70 : vector<48x256xi1>, vector<48x256xbf16>
    %c96_45 = arith.constant 96 : index
    %c256_46 = arith.constant 256 : index
    %72 = vector.load %arg9[%c96_45, %c256_46] : memref<432x512xbf16, #tpu.memory_space<vmem>>, vector<48x256xbf16>
    tpu.vector_store %arg9[%c96_45, %c256_46], %71 {strides = array<i32>} : memref<432x512xbf16, #tpu.memory_space<vmem>>, vector<48x256xbf16>,
    %c0_47 = arith.constant 0 : index
    %c23 = arith.constant 23 : index
    %73 = vector.load %arg8[%c0_47, %c23] : memref<48x608xbf16, #tpu.memory_space<vmem>>, vector<48x256xbf16>
    %cst_48 = arith.constant 0.000000e+00 : bf16
    %74 = vector.shape_cast %42 : vector<1x256xi1> to vector<1x256xi1>
    %75 = vector.broadcast %74 : vector<1x256xi1> to vector<48x256xi1>
    %76 = vector.broadcast %cst_48 : bf16 to vector<48x256xbf16>
    %77 = arith.select %75, %73, %76 : vector<48x256xi1>, vector<48x256xbf16>
    %c144 = arith.constant 144 : index
    %c0_49 = arith.constant 0 : index
    %78 = vector.load %arg9[%c144, %c0_49] : memref<432x512xbf16, #tpu.memory_space<vmem>>, vector<48x256xbf16>
    tpu.vector_store %arg9[%c144, %c0_49], %77 {strides = array<i32>} : memref<432x512xbf16, #tpu.memory_space<vmem>>, vector<48x256xbf16>,
    %c0_50 = arith.constant 0 : index
    %c327 = arith.constant 327 : index
    %79 = vector.load %arg8[%c0_50, %c327] : memref<48x608xbf16, #tpu.memory_space<vmem>>, vector<48x256xbf16>
    %cst_51 = arith.constant 0.000000e+00 : bf16
    %80 = vector.shape_cast %42 : vector<1x256xi1> to vector<1x256xi1>
    %81 = vector.broadcast %80 : vector<1x256xi1> to vector<48x256xi1>
    %82 = vector.broadcast %cst_51 : bf16 to vector<48x256xbf16>
    %83 = arith.select %81, %79, %82 : vector<48x256xi1>, vector<48x256xbf16>
    %c144_52 = arith.constant 144 : index
    %c256_53 = arith.constant 256 : index
    %84 = vector.load %arg9[%c144_52, %c256_53] : memref<432x512xbf16, #tpu.memory_space<vmem>>, vector<48x256xbf16>
    tpu.vector_store %arg9[%c144_52, %c256_53], %83 {strides = array<i32>} : memref<432x512xbf16, #tpu.memory_space<vmem>>, vector<48x256xbf16>,
    %c0_54 = arith.constant 0 : index
    %c24_55 = arith.constant 24 : index
    %85 = vector.load %arg8[%c0_54, %c24_55] : memref<48x608xbf16, #tpu.memory_space<vmem>>, vector<48x256xbf16>
    %c192 = arith.constant 192 : index
    %c0_56 = arith.constant 0 : index
    %86 = vector.load %arg9[%c192, %c0_56] : memref<432x512xbf16, #tpu.memory_space<vmem>>, vector<48x256xbf16>
    tpu.vector_store %arg9[%c192, %c0_56], %85 {strides = array<i32>} : memref<432x512xbf16, #tpu.memory_space<vmem>>, vector<48x256xbf16>,
    %c0_57 = arith.constant 0 : index
    %c328_58 = arith.constant 328 : index
    %87 = vector.load %arg8[%c0_57, %c328_58] : memref<48x608xbf16, #tpu.memory_space<vmem>>, vector<48x256xbf16>
    %c192_59 = arith.constant 192 : index
    %c256_60 = arith.constant 256 : index
    %88 = vector.load %arg9[%c192_59, %c256_60] : memref<432x512xbf16, #tpu.memory_space<vmem>>, vector<48x256xbf16>
    tpu.vector_store %arg9[%c192_59, %c256_60], %87 {strides = array<i32>} : memref<432x512xbf16, #tpu.memory_space<vmem>>, vector<48x256xbf16>,
    %c0_61 = arith.constant 0 : index
    %c25 = arith.constant 25 : index
    %89 = vector.load %arg8[%c0_61, %c25] : memref<48x608xbf16, #tpu.memory_space<vmem>>, vector<48x256xbf16>
    %cst_62 = arith.constant 0.000000e+00 : bf16
    %90 = vector.shape_cast %44 : vector<1x256xi1> to vector<1x256xi1>
    %91 = vector.broadcast %90 : vector<1x256xi1> to vector<48x256xi1>
    %92 = vector.broadcast %cst_62 : bf16 to vector<48x256xbf16>
    %93 = arith.select %91, %89, %92 : vector<48x256xi1>, vector<48x256xbf16>
    %c240 = arith.constant 240 : index
    %c0_63 = arith.constant 0 : index
    %94 = vector.load %arg9[%c240, %c0_63] : memref<432x512xbf16, #tpu.memory_space<vmem>>, vector<48x256xbf16>
    tpu.vector_store %arg9[%c240, %c0_63], %93 {strides = array<i32>} : memref<432x512xbf16, #tpu.memory_space<vmem>>, vector<48x256xbf16>,
    %c0_64 = arith.constant 0 : index
    %c329 = arith.constant 329 : index
    %95 = vector.load %arg8[%c0_64, %c329] : memref<48x608xbf16, #tpu.memory_space<vmem>>, vector<48x256xbf16>
    %cst_65 = arith.constant 0.000000e+00 : bf16
    %96 = vector.shape_cast %44 : vector<1x256xi1> to vector<1x256xi1>
    %97 = vector.broadcast %96 : vector<1x256xi1> to vector<48x256xi1>
    %98 = vector.broadcast %cst_65 : bf16 to vector<48x256xbf16>
    %99 = arith.select %97, %95, %98 : vector<48x256xi1>, vector<48x256xbf16>
    %c240_66 = arith.constant 240 : index
    %c256_67 = arith.constant 256 : index
    %100 = vector.load %arg9[%c240_66, %c256_67] : memref<432x512xbf16, #tpu.memory_space<vmem>>, vector<48x256xbf16>
    tpu.vector_store %arg9[%c240_66, %c256_67], %99 {strides = array<i32>} : memref<432x512xbf16, #tpu.memory_space<vmem>>, vector<48x256xbf16>,
    %c0_68 = arith.constant 0 : index
    %c39 = arith.constant 39 : index
    %101 = vector.load %arg8[%c0_68, %c39] : memref<48x608xbf16, #tpu.memory_space<vmem>>, vector<48x256xbf16>
    %cst_69 = arith.constant 0.000000e+00 : bf16
    %102 = vector.shape_cast %42 : vector<1x256xi1> to vector<1x256xi1>
    %103 = vector.broadcast %102 : vector<1x256xi1> to vector<48x256xi1>
    %104 = vector.broadcast %cst_69 : bf16 to vector<48x256xbf16>
    %105 = arith.select %103, %101, %104 : vector<48x256xi1>, vector<48x256xbf16>
    %c288 = arith.constant 288 : index
    %c0_70 = arith.constant 0 : index
    %106 = vector.load %arg9[%c288, %c0_70] : memref<432x512xbf16, #tpu.memory_space<vmem>>, vector<48x256xbf16>
    tpu.vector_store %arg9[%c288, %c0_70], %105 {strides = array<i32>} : memref<432x512xbf16, #tpu.memory_space<vmem>>, vector<48x256xbf16>,
    %c0_71 = arith.constant 0 : index
    %c343 = arith.constant 343 : index
    %107 = vector.load %arg8[%c0_71, %c343] : memref<48x608xbf16, #tpu.memory_space<vmem>>, vector<48x256xbf16>
    %cst_72 = arith.constant 0.000000e+00 : bf16
    %108 = vector.shape_cast %42 : vector<1x256xi1> to vector<1x256xi1>
    %109 = vector.broadcast %108 : vector<1x256xi1> to vector<48x256xi1>
    %110 = vector.broadcast %cst_72 : bf16 to vector<48x256xbf16>
    %111 = arith.select %109, %107, %110 : vector<48x256xi1>, vector<48x256xbf16>
    %c288_73 = arith.constant 288 : index
    %c256_74 = arith.constant 256 : index
    %112 = vector.load %arg9[%c288_73, %c256_74] : memref<432x512xbf16, #tpu.memory_space<vmem>>, vector<48x256xbf16>
    tpu.vector_store %arg9[%c288_73, %c256_74], %111 {strides = array<i32>} : memref<432x512xbf16, #tpu.memory_space<vmem>>, vector<48x256xbf16>,
    %c0_75 = arith.constant 0 : index
    %c40 = arith.constant 40 : index
    %113 = vector.load %arg8[%c0_75, %c40] : memref<48x608xbf16, #tpu.memory_space<vmem>>, vector<48x256xbf16>
    %c336 = arith.constant 336 : index
    %c0_76 = arith.constant 0 : index
    %114 = vector.load %arg9[%c336, %c0_76] : memref<432x512xbf16, #tpu.memory_space<vmem>>, vector<48x256xbf16>
    tpu.vector_store %arg9[%c336, %c0_76], %113 {strides = array<i32>} : memref<432x512xbf16, #tpu.memory_space<vmem>>, vector<48x256xbf16>,
    %c0_77 = arith.constant 0 : index
    %c344 = arith.constant 344 : index
    %115 = vector.load %arg8[%c0_77, %c344] : memref<48x608xbf16, #tpu.memory_space<vmem>>, vector<48x256xbf16>
    %c336_78 = arith.constant 336 : index
    %c256_79 = arith.constant 256 : index
    %116 = vector.load %arg9[%c336_78, %c256_79] : memref<432x512xbf16, #tpu.memory_space<vmem>>, vector<48x256xbf16>
    tpu.vector_store %arg9[%c336_78, %c256_79], %115 {strides = array<i32>} : memref<432x512xbf16, #tpu.memory_space<vmem>>, vector<48x256xbf16>,
    %c0_80 = arith.constant 0 : index
    %c41 = arith.constant 41 : index
    %117 = vector.load %arg8[%c0_80, %c41] : memref<48x608xbf16, #tpu.memory_space<vmem>>, vector<48x256xbf16>
    %cst_81 = arith.constant 0.000000e+00 : bf16
    %118 = vector.shape_cast %44 : vector<1x256xi1> to vector<1x256xi1>
    %119 = vector.broadcast %118 : vector<1x256xi1> to vector<48x256xi1>
    %120 = vector.broadcast %cst_81 : bf16 to vector<48x256xbf16>
    %121 = arith.select %119, %117, %120 : vector<48x256xi1>, vector<48x256xbf16>
    %c384 = arith.constant 384 : index
    %c0_82 = arith.constant 0 : index
    %122 = vector.load %arg9[%c384, %c0_82] : memref<432x512xbf16, #tpu.memory_space<vmem>>, vector<48x256xbf16>
    tpu.vector_store %arg9[%c384, %c0_82], %121 {strides = array<i32>} : memref<432x512xbf16, #tpu.memory_space<vmem>>, vector<48x256xbf16>,
    %c0_83 = arith.constant 0 : index
    %c345 = arith.constant 345 : index
    %123 = vector.load %arg8[%c0_83, %c345] : memref<48x608xbf16, #tpu.memory_space<vmem>>, vector<48x256xbf16>
    %cst_84 = arith.constant 0.000000e+00 : bf16
    %124 = vector.shape_cast %44 : vector<1x256xi1> to vector<1x256xi1>
    %125 = vector.broadcast %124 : vector<1x256xi1> to vector<48x256xi1>
    %126 = vector.broadcast %cst_84 : bf16 to vector<48x256xbf16>
    %127 = arith.select %125, %123, %126 : vector<48x256xi1>, vector<48x256xbf16>
    %c384_85 = arith.constant 384 : index
    %c256_86 = arith.constant 256 : index
    %128 = vector.load %arg9[%c384_85, %c256_86] : memref<432x512xbf16, #tpu.memory_space<vmem>>, vector<48x256xbf16>
    tpu.vector_store %arg9[%c384_85, %c256_86], %127 {strides = array<i32>} : memref<432x512xbf16, #tpu.memory_space<vmem>>, vector<48x256xbf16>,
    %c0_87 = arith.constant 0 : index
    %c0_88 = arith.constant 0 : index
    %129 = vector.load %arg4[%c0_87, %c0_88] : memref<128x432xbf16, #tpu.memory_space<vmem>>, vector<128x432xbf16>
    %c0_89 = arith.constant 0 : index
    %c0_90 = arith.constant 0 : index
    %130 = vector.load %arg9[%c0_89, %c0_90] : memref<432x512xbf16, #tpu.memory_space<vmem>>, vector<432x512xbf16>
    %cst_91 = arith.constant dense<0.000000e+00> : vector<128x512xf32>
    %131 = tpu.matmul %129, %130, %cst_91 {dimension_numbers = #tpu.dot_dimension_numbers<[1], [0], [0], [1], [0, 0, 1, 1], [], []>} : vector<128x432xbf16>, vector<432x512xbf16>, vector<128x512xf32> -> vector<128x512xf32>
    %c0_92 = arith.constant 0 : index
    %c0_93 = arith.constant 0 : index
    %132 = vector.load %arg5[%c0_92, %c0_93] : memref<128x1xf32, #tpu.memory_space<vmem>>, vector<128x1xf32>
    %133 = vector.broadcast %132 : vector<128x1xf32> to vector<128x512xf32>
    %134 = arith.addf %131, %133 : vector<128x512xf32>
    %c0_94 = arith.constant 0 : index
    %c0_95 = arith.constant 0 : index
    %135 = vector.load %arg10[%c0_94, %c0_95] : memref<128x512xf32, #tpu.memory_space<vmem>>, vector<128x512xf32>
    tpu.vector_store %arg10[%c0_94, %c0_95], %134 {strides = array<i32>} : memref<128x512xf32, #tpu.memory_space<vmem>>, vector<128x512xf32>,
    %c0_96 = arith.constant 0 : index
    %c0_97 = arith.constant 0 : index
    %136 = vector.load %arg10[%c0_96, %c0_97] : memref<128x512xf32, #tpu.memory_space<vmem>>, vector<32x128xf32>
    %cst_98 = arith.constant 5.000000e-01 : f32
    %137 = vector.broadcast %cst_98 : f32 to vector<32x128xf32>
    %138 = arith.mulf %137, %136 : vector<32x128xf32>
    %139 = math.tanh %138 : vector<32x128xf32>
    %cst_99 = arith.constant 5.000000e-01 : f32
    %140 = vector.broadcast %cst_99 : f32 to vector<32x128xf32>
    %141 = arith.mulf %140, %139 : vector<32x128xf32>
    %cst_100 = arith.constant 5.000000e-01 : f32
    %142 = vector.broadcast %cst_100 : f32 to vector<32x128xf32>
    %143 = arith.addf %141, %142 : vector<32x128xf32>
    %c32_101 = arith.constant 32 : index
    %c0_102 = arith.constant 0 : index
    %144 = vector.load %arg10[%c32_101, %c0_102] : memref<128x512xf32, #tpu.memory_space<vmem>>, vector<32x128xf32>
    %cst_103 = arith.constant 5.000000e-01 : f32
    %145 = vector.broadcast %cst_103 : f32 to vector<32x128xf32>
    %146 = arith.mulf %145, %144 : vector<32x128xf32>
    %147 = math.tanh %146 : vector<32x128xf32>
    %cst_104 = arith.constant 5.000000e-01 : f32
    %148 = vector.broadcast %cst_104 : f32 to vector<32x128xf32>
    %149 = arith.mulf %148, %147 : vector<32x128xf32>
    %cst_105 = arith.constant 5.000000e-01 : f32
    %150 = vector.broadcast %cst_105 : f32 to vector<32x128xf32>
    %151 = arith.addf %149, %150 : vector<32x128xf32>
    %c64 = arith.constant 64 : index
    %c0_106 = arith.constant 0 : index
    %152 = vector.load %arg10[%c64, %c0_106] : memref<128x512xf32, #tpu.memory_space<vmem>>, vector<32x128xf32>
    %cst_107 = arith.constant 5.000000e-01 : f32
    %153 = vector.broadcast %cst_107 : f32 to vector<32x128xf32>
    %154 = arith.mulf %153, %152 : vector<32x128xf32>
    %155 = math.tanh %154 : vector<32x128xf32>
    %cst_108 = arith.constant 5.000000e-01 : f32
    %156 = vector.broadcast %cst_108 : f32 to vector<32x128xf32>
    %157 = arith.mulf %156, %155 : vector<32x128xf32>
    %cst_109 = arith.constant 5.000000e-01 : f32
    %158 = vector.broadcast %cst_109 : f32 to vector<32x128xf32>
    %159 = arith.addf %157, %158 : vector<32x128xf32>
    %c96_110 = arith.constant 96 : index
    %c0_111 = arith.constant 0 : index
    %160 = vector.load %arg10[%c96_110, %c0_111] : memref<128x512xf32, #tpu.memory_space<vmem>>, vector<32x128xf32>
    %161 = math.tanh %160 : vector<32x128xf32>
    %c0_112 = arith.constant 0 : index
    %c0_113 = arith.constant 0 : index
    %c0_114 = arith.constant 0 : index
    %162 = vector.load %arg3[%c0_112, %c0_113, %c0_114] : memref<2x32x256xf32, #tpu.memory_space<vmem>>, vector<1x32x128xf32>
    %163 = vector.shape_cast %162 : vector<1x32x128xf32> to vector<32x128xf32>
    %164 = arith.mulf %151, %163 : vector<32x128xf32>
    %165 = arith.mulf %143, %161 : vector<32x128xf32>
    %166 = arith.addf %164, %165 : vector<32x128xf32>
    %167 = math.tanh %166 : vector<32x128xf32>
    %168 = arith.mulf %159, %167 : vector<32x128xf32>
    %c0_115 = arith.constant 0 : index
    %c0_116 = arith.constant 0 : index
    %c0_117 = arith.constant 0 : index
    %169 = vector.load %arg7[%c0_115, %c0_116, %c0_117] : memref<2x32x256xf32, #tpu.memory_space<vmem>>, vector<1x32x128xf32>
    %170 = vector.shape_cast %169 : vector<1x32x128xf32> to vector<32x128xf32>
    %171 = vector.shape_cast %166 : vector<32x128xf32> to vector<1x32x128xf32>
    tpu.vector_store %arg7[%c0_115, %c0_116, %c0_117], %171 {strides = array<i32>} : memref<2x32x256xf32, #tpu.memory_space<vmem>>, vector<1x32x128xf32>,
    %c0_118 = arith.constant 0 : index
    %c0_119 = arith.constant 0 : index
    %c0_120 = arith.constant 0 : index
    %172 = vector.load %arg6[%c0_118, %c0_119, %c0_120] : memref<2x32x256xf32, #tpu.memory_space<vmem>>, vector<1x32x128xf32>
    %173 = vector.shape_cast %172 : vector<1x32x128xf32> to vector<32x128xf32>
    %174 = vector.shape_cast %168 : vector<32x128xf32> to vector<1x32x128xf32>
    tpu.vector_store %arg6[%c0_118, %c0_119, %c0_120], %174 {strides = array<i32>} : memref<2x32x256xf32, #tpu.memory_space<vmem>>, vector<1x32x128xf32>,
    %c0_121 = arith.constant 0 : index
    %c128 = arith.constant 128 : index
    %175 = vector.load %arg10[%c0_121, %c128] : memref<128x512xf32, #tpu.memory_space<vmem>>, vector<32x128xf32>
    %cst_122 = arith.constant 5.000000e-01 : f32
    %176 = vector.broadcast %cst_122 : f32 to vector<32x128xf32>
    %177 = arith.mulf %176, %175 : vector<32x128xf32>
    %178 = math.tanh %177 : vector<32x128xf32>
    %cst_123 = arith.constant 5.000000e-01 : f32
    %179 = vector.broadcast %cst_123 : f32 to vector<32x128xf32>
    %180 = arith.mulf %179, %178 : vector<32x128xf32>
    %cst_124 = arith.constant 5.000000e-01 : f32
    %181 = vector.broadcast %cst_124 : f32 to vector<32x128xf32>
    %182 = arith.addf %180, %181 : vector<32x128xf32>
    %c32_125 = arith.constant 32 : index
    %c128_126 = arith.constant 128 : index
    %183 = vector.load %arg10[%c32_125, %c128_126] : memref<128x512xf32, #tpu.memory_space<vmem>>, vector<32x128xf32>
    %cst_127 = arith.constant 5.000000e-01 : f32
    %184 = vector.broadcast %cst_127 : f32 to vector<32x128xf32>
    %185 = arith.mulf %184, %183 : vector<32x128xf32>
    %186 = math.tanh %185 : vector<32x128xf32>
    %cst_128 = arith.constant 5.000000e-01 : f32
    %187 = vector.broadcast %cst_128 : f32 to vector<32x128xf32>
    %188 = arith.mulf %187, %186 : vector<32x128xf32>
    %cst_129 = arith.constant 5.000000e-01 : f32
    %189 = vector.broadcast %cst_129 : f32 to vector<32x128xf32>
    %190 = arith.addf %188, %189 : vector<32x128xf32>
    %c64_130 = arith.constant 64 : index
    %c128_131 = arith.constant 128 : index
    %191 = vector.load %arg10[%c64_130, %c128_131] : memref<128x512xf32, #tpu.memory_space<vmem>>, vector<32x128xf32>
    %cst_132 = arith.constant 5.000000e-01 : f32
    %192 = vector.broadcast %cst_132 : f32 to vector<32x128xf32>
    %193 = arith.mulf %192, %191 : vector<32x128xf32>
    %194 = math.tanh %193 : vector<32x128xf32>
    %cst_133 = arith.constant 5.000000e-01 : f32
    %195 = vector.broadcast %cst_133 : f32 to vector<32x128xf32>
    %196 = arith.mulf %195, %194 : vector<32x128xf32>
    %cst_134 = arith.constant 5.000000e-01 : f32
    %197 = vector.broadcast %cst_134 : f32 to vector<32x128xf32>
    %198 = arith.addf %196, %197 : vector<32x128xf32>
    %c96_135 = arith.constant 96 : index
    %c128_136 = arith.constant 128 : index
    %199 = vector.load %arg10[%c96_135, %c128_136] : memref<128x512xf32, #tpu.memory_space<vmem>>, vector<32x128xf32>
    %200 = math.tanh %199 : vector<32x128xf32>
    %c0_137 = arith.constant 0 : index
    %c0_138 = arith.constant 0 : index
    %c128_139 = arith.constant 128 : index
    %201 = vector.load %arg3[%c0_137, %c0_138, %c128_139] : memref<2x32x256xf32, #tpu.memory_space<vmem>>, vector<1x32x128xf32>
    %202 = vector.shape_cast %201 : vector<1x32x128xf32> to vector<32x128xf32>
    %203 = arith.mulf %190, %202 : vector<32x128xf32>
    %204 = arith.mulf %182, %200 : vector<32x128xf32>
    %205 = arith.addf %203, %204 : vector<32x128xf32>
    %206 = math.tanh %205 : vector<32x128xf32>
    %207 = arith.mulf %198, %206 : vector<32x128xf32>
    %c0_140 = arith.constant 0 : index
    %c0_141 = arith.constant 0 : index
    %c128_142 = arith.constant 128 : index
    %208 = vector.load %arg7[%c0_140, %c0_141, %c128_142] : memref<2x32x256xf32, #tpu.memory_space<vmem>>, vector<1x32x128xf32>
    %209 = vector.shape_cast %208 : vector<1x32x128xf32> to vector<32x128xf32>
    %210 = vector.shape_cast %205 : vector<32x128xf32> to vector<1x32x128xf32>
    tpu.vector_store %arg7[%c0_140, %c0_141, %c128_142], %210 {strides = array<i32>} : memref<2x32x256xf32, #tpu.memory_space<vmem>>, vector<1x32x128xf32>,
    %c0_143 = arith.constant 0 : index
    %c0_144 = arith.constant 0 : index
    %c128_145 = arith.constant 128 : index
    %211 = vector.load %arg6[%c0_143, %c0_144, %c128_145] : memref<2x32x256xf32, #tpu.memory_space<vmem>>, vector<1x32x128xf32>
    %212 = vector.shape_cast %211 : vector<1x32x128xf32> to vector<32x128xf32>
    %213 = vector.shape_cast %207 : vector<32x128xf32> to vector<1x32x128xf32>
    tpu.vector_store %arg6[%c0_143, %c0_144, %c128_145], %213 {strides = array<i32>} : memref<2x32x256xf32, #tpu.memory_space<vmem>>, vector<1x32x128xf32>,
    %c0_146 = arith.constant 0 : index
    %c256_147 = arith.constant 256 : index
    %214 = vector.load %arg10[%c0_146, %c256_147] : memref<128x512xf32, #tpu.memory_space<vmem>>, vector<32x128xf32>
    %cst_148 = arith.constant 5.000000e-01 : f32
    %215 = vector.broadcast %cst_148 : f32 to vector<32x128xf32>
    %216 = arith.mulf %215, %214 : vector<32x128xf32>
    %217 = math.tanh %216 : vector<32x128xf32>
    %cst_149 = arith.constant 5.000000e-01 : f32
    %218 = vector.broadcast %cst_149 : f32 to vector<32x128xf32>
    %219 = arith.mulf %218, %217 : vector<32x128xf32>
    %cst_150 = arith.constant 5.000000e-01 : f32
    %220 = vector.broadcast %cst_150 : f32 to vector<32x128xf32>
    %221 = arith.addf %219, %220 : vector<32x128xf32>
    %c32_151 = arith.constant 32 : index
    %c256_152 = arith.constant 256 : index
    %222 = vector.load %arg10[%c32_151, %c256_152] : memref<128x512xf32, #tpu.memory_space<vmem>>, vector<32x128xf32>
    %cst_153 = arith.constant 5.000000e-01 : f32
    %223 = vector.broadcast %cst_153 : f32 to vector<32x128xf32>
    %224 = arith.mulf %223, %222 : vector<32x128xf32>
    %225 = math.tanh %224 : vector<32x128xf32>
    %cst_154 = arith.constant 5.000000e-01 : f32
    %226 = vector.broadcast %cst_154 : f32 to vector<32x128xf32>
    %227 = arith.mulf %226, %225 : vector<32x128xf32>
    %cst_155 = arith.constant 5.000000e-01 : f32
    %228 = vector.broadcast %cst_155 : f32 to vector<32x128xf32>
    %229 = arith.addf %227, %228 : vector<32x128xf32>
    %c64_156 = arith.constant 64 : index
    %c256_157 = arith.constant 256 : index
    %230 = vector.load %arg10[%c64_156, %c256_157] : memref<128x512xf32, #tpu.memory_space<vmem>>, vector<32x128xf32>
    %cst_158 = arith.constant 5.000000e-01 : f32
    %231 = vector.broadcast %cst_158 : f32 to vector<32x128xf32>
    %232 = arith.mulf %231, %230 : vector<32x128xf32>
    %233 = math.tanh %232 : vector<32x128xf32>
    %cst_159 = arith.constant 5.000000e-01 : f32
    %234 = vector.broadcast %cst_159 : f32 to vector<32x128xf32>
    %235 = arith.mulf %234, %233 : vector<32x128xf32>
    %cst_160 = arith.constant 5.000000e-01 : f32
    %236 = vector.broadcast %cst_160 : f32 to vector<32x128xf32>
    %237 = arith.addf %235, %236 : vector<32x128xf32>
    %c96_161 = arith.constant 96 : index
    %c256_162 = arith.constant 256 : index
    %238 = vector.load %arg10[%c96_161, %c256_162] : memref<128x512xf32, #tpu.memory_space<vmem>>, vector<32x128xf32>
    %239 = math.tanh %238 : vector<32x128xf32>
    %c1_163 = arith.constant 1 : index
    %c0_164 = arith.constant 0 : index
    %c0_165 = arith.constant 0 : index
    %240 = vector.load %arg3[%c1_163, %c0_164, %c0_165] : memref<2x32x256xf32, #tpu.memory_space<vmem>>, vector<1x32x128xf32>
    %241 = vector.shape_cast %240 : vector<1x32x128xf32> to vector<32x128xf32>
    %242 = arith.mulf %229, %241 : vector<32x128xf32>
    %243 = arith.mulf %221, %239 : vector<32x128xf32>
    %244 = arith.addf %242, %243 : vector<32x128xf32>
    %245 = math.tanh %244 : vector<32x128xf32>
    %246 = arith.mulf %237, %245 : vector<32x128xf32>
    %c1_166 = arith.constant 1 : index
    %c0_167 = arith.constant 0 : index
    %c0_168 = arith.constant 0 : index
    %247 = vector.load %arg7[%c1_166, %c0_167, %c0_168] : memref<2x32x256xf32, #tpu.memory_space<vmem>>, vector<1x32x128xf32>
    %248 = vector.shape_cast %247 : vector<1x32x128xf32> to vector<32x128xf32>
    %249 = vector.shape_cast %244 : vector<32x128xf32> to vector<1x32x128xf32>
    tpu.vector_store %arg7[%c1_166, %c0_167, %c0_168], %249 {strides = array<i32>} : memref<2x32x256xf32, #tpu.memory_space<vmem>>, vector<1x32x128xf32>,
    %c1_169 = arith.constant 1 : index
    %c0_170 = arith.constant 0 : index
    %c0_171 = arith.constant 0 : index
    %250 = vector.load %arg6[%c1_169, %c0_170, %c0_171] : memref<2x32x256xf32, #tpu.memory_space<vmem>>, vector<1x32x128xf32>
    %251 = vector.shape_cast %250 : vector<1x32x128xf32> to vector<32x128xf32>
    %252 = vector.shape_cast %246 : vector<32x128xf32> to vector<1x32x128xf32>
    tpu.vector_store %arg6[%c1_169, %c0_170, %c0_171], %252 {strides = array<i32>} : memref<2x32x256xf32, #tpu.memory_space<vmem>>, vector<1x32x128xf32>,
    %c0_172 = arith.constant 0 : index
    %c384_173 = arith.constant 384 : index
    %253 = vector.load %arg10[%c0_172, %c384_173] : memref<128x512xf32, #tpu.memory_space<vmem>>, vector<32x128xf32>
    %cst_174 = arith.constant 5.000000e-01 : f32
    %254 = vector.broadcast %cst_174 : f32 to vector<32x128xf32>
    %255 = arith.mulf %254, %253 : vector<32x128xf32>
    %256 = math.tanh %255 : vector<32x128xf32>
    %cst_175 = arith.constant 5.000000e-01 : f32
    %257 = vector.broadcast %cst_175 : f32 to vector<32x128xf32>
    %258 = arith.mulf %257, %256 : vector<32x128xf32>
    %cst_176 = arith.constant 5.000000e-01 : f32
    %259 = vector.broadcast %cst_176 : f32 to vector<32x128xf32>
    %260 = arith.addf %258, %259 : vector<32x128xf32>
    %c32_177 = arith.constant 32 : index
    %c384_178 = arith.constant 384 : index
    %261 = vector.load %arg10[%c32_177, %c384_178] : memref<128x512xf32, #tpu.memory_space<vmem>>, vector<32x128xf32>
    %cst_179 = arith.constant 5.000000e-01 : f32
    %262 = vector.broadcast %cst_179 : f32 to vector<32x128xf32>
    %263 = arith.mulf %262, %261 : vector<32x128xf32>
    %264 = math.tanh %263 : vector<32x128xf32>
    %cst_180 = arith.constant 5.000000e-01 : f32
    %265 = vector.broadcast %cst_180 : f32 to vector<32x128xf32>
    %266 = arith.mulf %265, %264 : vector<32x128xf32>
    %cst_181 = arith.constant 5.000000e-01 : f32
    %267 = vector.broadcast %cst_181 : f32 to vector<32x128xf32>
    %268 = arith.addf %266, %267 : vector<32x128xf32>
    %c64_182 = arith.constant 64 : index
    %c384_183 = arith.constant 384 : index
    %269 = vector.load %arg10[%c64_182, %c384_183] : memref<128x512xf32, #tpu.memory_space<vmem>>, vector<32x128xf32>
    %cst_184 = arith.constant 5.000000e-01 : f32
    %270 = vector.broadcast %cst_184 : f32 to vector<32x128xf32>
    %271 = arith.mulf %270, %269 : vector<32x128xf32>
    %272 = math.tanh %271 : vector<32x128xf32>
    %cst_185 = arith.constant 5.000000e-01 : f32
    %273 = vector.broadcast %cst_185 : f32 to vector<32x128xf32>
    %274 = arith.mulf %273, %272 : vector<32x128xf32>
    %cst_186 = arith.constant 5.000000e-01 : f32
    %275 = vector.broadcast %cst_186 : f32 to vector<32x128xf32>
    %276 = arith.addf %274, %275 : vector<32x128xf32>
    %c96_187 = arith.constant 96 : index
    %c384_188 = arith.constant 384 : index
    %277 = vector.load %arg10[%c96_187, %c384_188] : memref<128x512xf32, #tpu.memory_space<vmem>>, vector<32x128xf32>
    %278 = math.tanh %277 : vector<32x128xf32>
    %c1_189 = arith.constant 1 : index
    %c0_190 = arith.constant 0 : index
    %c128_191 = arith.constant 128 : index
    %279 = vector.load %arg3[%c1_189, %c0_190, %c128_191] : memref<2x32x256xf32, #tpu.memory_space<vmem>>, vector<1x32x128xf32>
    %280 = vector.shape_cast %279 : vector<1x32x128xf32> to vector<32x128xf32>
    %281 = arith.mulf %268, %280 : vector<32x128xf32>
    %282 = arith.mulf %260, %278 : vector<32x128xf32>
    %283 = arith.addf %281, %282 : vector<32x128xf32>
    %284 = math.tanh %283 : vector<32x128xf32>
    %285 = arith.mulf %276, %284 : vector<32x128xf32>
    %c1_192 = arith.constant 1 : index
    %c0_193 = arith.constant 0 : index
    %c128_194 = arith.constant 128 : index
    %286 = vector.load %arg7[%c1_192, %c0_193, %c128_194] : memref<2x32x256xf32, #tpu.memory_space<vmem>>, vector<1x32x128xf32>
    %287 = vector.shape_cast %286 : vector<1x32x128xf32> to vector<32x128xf32>
    %288 = vector.shape_cast %283 : vector<32x128xf32> to vector<1x32x128xf32>
    tpu.vector_store %arg7[%c1_192, %c0_193, %c128_194], %288 {strides = array<i32>} : memref<2x32x256xf32, #tpu.memory_space<vmem>>, vector<1x32x128xf32>,
    %c1_195 = arith.constant 1 : index
    %c0_196 = arith.constant 0 : index
    %c128_197 = arith.constant 128 : index
    %289 = vector.load %arg6[%c1_195, %c0_196, %c128_197] : memref<2x32x256xf32, #tpu.memory_space<vmem>>, vector<1x32x128xf32>
    %290 = vector.shape_cast %289 : vector<1x32x128xf32> to vector<32x128xf32>
    %291 = vector.shape_cast %285 : vector<32x128xf32> to vector<1x32x128xf32>
    tpu.vector_store %arg6[%c1_195, %c0_196, %c128_197], %291 {strides = array<i32>} : memref<2x32x256xf32, #tpu.memory_space<vmem>>, vector<1x32x128xf32>,
    return
  }
  func.func @transform_0(%arg0: i32) -> (i32, i32, i32) {
    %c0_i32 = arith.constant 0 : i32
    %c0_i32_0 = arith.constant 0 : i32
    %c0_i32_1 = arith.constant 0 : i32
    return %arg0, %c0_i32, %c0_i32_0 : i32, i32, i32
  }
  func.func @transform_1(%arg0: i32) -> (i32, i32, i32) {
    %c0_i32 = arith.constant 0 : i32
    %c0_i32_0 = arith.constant 0 : i32
    %c0_i32_1 = arith.constant 0 : i32
    return %arg0, %c0_i32, %c0_i32_0 : i32, i32, i32
  }
  func.func @transform_2(%arg0: i32) -> (i32, i32, i32) {
    %c0_i32 = arith.constant 0 : i32
    %c0_i32_0 = arith.constant 0 : i32
    %c0_i32_1 = arith.constant 0 : i32
    return %arg0, %c0_i32, %c0_i32_0 : i32, i32, i32
  }
  func.func @transform_3(%arg0: i32) -> (i32, i32) {
    %c0_i32 = arith.constant 0 : i32
    %c0_i32_0 = arith.constant 0 : i32
    %c0_i32_1 = arith.constant 0 : i32
    return %c0_i32, %c0_i32_0 : i32, i32
  }
  func.func @transform_4(%arg0: i32) -> (i32, i32) {
    %c0_i32 = arith.constant 0 : i32
    %c0_i32_0 = arith.constant 0 : i32
    %c0_i32_1 = arith.constant 0 : i32
    return %c0_i32, %c0_i32_0 : i32, i32
  }
  func.func @transform_5(%arg0: i32) -> (i32, i32, i32) {
    %c0_i32 = arith.constant 0 : i32
    %c0_i32_0 = arith.constant 0 : i32
    %c0_i32_1 = arith.constant 0 : i32
    return %arg0, %c0_i32, %c0_i32_0 : i32, i32, i32
  }
  func.func @transform_6(%arg0: i32) -> (i32, i32, i32) {
    %c0_i32 = arith.constant 0 : i32
    %c0_i32_0 = arith.constant 0 : i32
    %c0_i32_1 = arith.constant 0 : i32
    return %arg0, %c0_i32, %c0_i32_0 : i32, i32, i32
  }
}

</mosaic_0001>

<bundles_post_ra>
// kernel: conv_lstm_forward.1
= control target key start
LH: loop header
LB: loop body
LE: loop exit
PB: predicated region body
PF: predicated region fallthrough
CT: control target
= control target key end

     0   :  { %v176_v0 = vlaneseq  ;;  %vm25_vm0 = vcmask 195584   ;;  %v3217_v4 = vmov 0   ;;  %vm37_vm1 = vcmask 785984   ;;  %s3218_s13 = smov 72   ;;  %s3219_s14 = smov 24   ;;  %s4965_s1 = inlined_call_operand.vmem [shape: f32[2,32,256], index: 1, kind: input, shape index: {}, may-alias: {1,2}]   ;;  %s4966_s0 = inlined_call_operand.vmem [shape: f32[2,4,256], index: 0, kind: input, shape index: {}]   ;;  %s4967_s3 = inlined_call_operand.vmem [shape: bf16[128,432], index: 3, kind: input, shape index: {}]   ;;  %s4968_s4 = inlined_call_operand.vmem [shape: f32[128,1], index: 4, kind: input, shape index: {}]   ;;  %s4969_s2 = inlined_call_operand.vmem [shape: f32[2,32,256], index: 2, kind: input, shape index: {}, may-alias: {1,2}]   ;;  %s4970_s6 = inlined_call_operand.vmem [shape: f32[2,32,256], index: 6, kind: output, shape index: {1}]   ;;  %s4971_s5 = inlined_call_operand.vmem [shape: f32[2,32,256], index: 5, kind: output, shape index: {0}]  }
   0x1   :  { %v2772_v1 = vld [vmem:[%s4965_s1 + $0x40] sm:$0xff]  ;;  %v2774_v2 = vld [vmem:[%s4965_s1 + $0x50] sm:$0xff]  ;;  %43 = vst [vmem:[#allocation2 + $0x58] sm:$0xfc] %v3217_v4  ;;  %48 = vst [vmem:[#allocation2 + $0x68] sm:$0xfc] %v3217_v4  ;;  %3005 = vset.pattern.permute.xlu0 %v3217_v4  ;;  %3006 = vset.pattern.permute.xlu1 %v3217_v4 }
   0x2   :  { %v51_v3 = vld [vmem:[%s4965_s1] sm:$0xff]  ;;  %26 = vst.msk [vmem:[#allocation2] sm:$0xff] %vm25_vm0, %v3217_v4  ;;  %27 = vst.msk [vmem:[#allocation2 + $0x28] sm:$0xff] %vm25_vm0, %v3217_v4  ;;  %v121_v5 = vpack.c.bf16 %v2774_v2, %v2772_v1  ;;  %v53_v6 = vld [vmem:[%s4965_s1 + $0x10] sm:$0xff]  ;;  %v3304_v9 = vand.u32 127, %v176_v0  ;;  %v223_v25 = vshrl.u32 %v176_v0, 7 }
   0x3   :  { %28 = vst.msk [vmem:[#allocation2 + $0x50] sm:$0xff] %vm25_vm0, %v3217_v4  ;;  %v2773_v7 = vld [vmem:[%s4965_s1 + $0x48] sm:$0xff]  ;;  %v2775_v8 = vld [vmem:[%s4965_s1 + $0x58] sm:$0xff]  ;;  %v59_v10 = vpack.c.bf16 %v53_v6, %v51_v3  ;;  %v55_v19 = vld [vmem:[%s4965_s1 + $0x20] sm:$0xff]  ;;  %vm29_vm4 = vcmask 392384   ;;  %vm33_vm5 = vcmask 589184  }
   0x4   :  { %38 = vst.msk [vmem:[#allocation2 + $0x20] sm:$0xff] %vm37_vm1, %v3217_v4  ;;  %39 = vst.msk [vmem:[#allocation2 + $0x48] sm:$0xff] %vm37_vm1, %v3217_v4  ;;  %v52_v11 = vld [vmem:[%s4965_s1 + $0x8] sm:$0xff]  ;;  %v54_v12 = vld [vmem:[%s4965_s1 + $0x18] sm:$0xff]  ;;  %129 = vrot.lane.b32.xlu1 %v121_v5, %s3218_s13  ;;  %v122_v13 = vpack.c.bf16 %v2775_v8, %v2773_v7  ;;  %v178_v14 = vadd.s32 128, %v3304_v9  ;;  %v183_v15 = vand.u32 15, %v3304_v9 }
   0x5   :  { %40 = vst.msk [vmem:[#allocation2 + $0x70] sm:$0xff] %vm37_vm1, %v3217_v4  ;;  %67 = vrot.lane.b32.xlu0 %v59_v10, %s3219_s14  ;;  %v60_v16 = vpack.c.bf16 %v54_v12, %v52_v11  ;;  %v56_v17 = vld [vmem:[%s4965_s1 + $0x28] sm:$0xff]  ;;  %v58_v18 = vld [vmem:[%s4965_s1 + $0x38] sm:$0xff]  ;;  %v57_v20 = vld [vmem:[%s4965_s1 + $0x30] sm:$0xff]  ;;  %v228_v32 = vsub.s32 4, %v223_v25  ;;  %v224_v35 = vsub.s32 0, %v223_v25 }
   0x6   :  { %v190_v21 = vand.u32 15, %v178_v14  ;;  %vm3331_vm2 = vcmp.ge.s32.totalorder %v183_v15, 1  ;;  %v62_v23 = vpack.c.bf16 %v58_v18, %v56_v17  ;;  %v61_v26 = vpack.c.bf16 %v57_v20, %v55_v19  ;;  %v2777_v27 = vld [vmem:[%s4965_s1 + $0x68] sm:$0xff]  ;;  %v2779_v28 = vld [vmem:[%s4965_s1 + $0x78] sm:$0xff]  ;;  %30 = vst.msk [vmem:[#allocation2 + $0x10] sm:$0xff] %vm29_vm4, %v3217_v4  ;;  %31 = vst.msk [vmem:[#allocation2 + $0x38] sm:$0xff] %vm29_vm4, %v3217_v4 }
   0x7   :  { %32 = vst.msk [vmem:[#allocation2 + $0x60] sm:$0xff] %vm29_vm4, %v3217_v4  ;;  %v2776_v29 = vld [vmem:[%s4965_s1 + $0x60] sm:$0xff]  ;;  %v2778_v30 = vld [vmem:[%s4965_s1 + $0x70] sm:$0xff]  ;;  %v124_v31 = vpack.c.bf16 %v2779_v28, %v2777_v27  ;;  %vm41_vm7 = vcmask 1047746   ;;  %vm44_vm8 = vcmask 195586   ;;  %vm46_vm9 = vcmask 1048130  }
   0x8   :  { %131 = vrot.lane.b32.xlu1 %v122_v13, %s3218_s13  ;;  %vm3336_vm3 = vcmp.ge.s32.totalorder %v190_v21, 1  ;;  %34 = vst.msk [vmem:[#allocation2 + $0x10] sm:$0xff] %vm33_vm5, %v3217_v4  ;;  %35 = vst.msk [vmem:[#allocation2 + $0x38] sm:$0xff] %vm33_vm5, %v3217_v4  ;;  %v123_v33 = vpack.c.bf16 %v2778_v30, %v2776_v29  ;;  %v91_v38 = vld [vmem:[%s4966_s0] sm:$0xff]  ;;  %vm49_vm10 = vcmask 588802   ;;  %s3220_s8 = smov 7  }
   0x9   :  { %69 = vrot.lane.b32.xlu0 %v60_v16, %s3219_s14  ;;  %vm220_vm6 = vmpackc.low %vm3336_vm3, %vm3331_vm2  ;;  %36 = vst.msk [vmem:[#allocation2 + $0x60] sm:$0xff] %vm33_vm5, %v3217_v4  ;;  %v93_v39 = vcombine.high %v91_v38, %v91_v38  ;;  %v2780_v40 = vld [vmem:[%s4966_s0 + $0x8] sm:$0xff]  ;;  %vm205_vm11 = vcmp.lt.s32.totalorder %v183_v15, 15  ;;  %vm206_vm12 = vcmp.lt.s32.totalorder %v190_v21, 15  ;;  %s3221_s11 = smov 55   ;;  %v95_v43 = vpack.c.bf16 %v91_v38, %v91_v38  ;;  %s3222_s0 = smov 9  }
   0xa   :  { %v221_v34 = vsel %vm220_vm6, 65537, %v3217_v4  ;;  %42 = vst.msk [vmem:[#allocation2 + $0x50] sm:$0xfc] %vm41_vm7, %v3217_v4  ;;  %v157_v42 = vcombine.high %v2780_v40, %v2780_v40  ;;  %vm489_vm13 = vmpackc.low %vm206_vm12, %vm205_vm11  ;;  %v159_v45 = vpack.c.bf16 %v2780_v40, %v2780_v40  ;;  %s3223_s12 = smov 57   ;;  %s3225_s15 = smov 71   ;;  %vm84_vm14 = vcmask 1047744  }
   0xb   :  { %v3368_v36 = vrot.slane %v221_v34, %v228_v32  ;;  %v3371_v37 = vrot.slane %v221_v34, %v224_v35  ;;  %45 = vst.msk [vmem:[#allocation2 + $0x60] sm:$0xfc] %vm44_vm8, %v3217_v4  ;;  %v96_v41 = vpack.c.bf16 %v93_v39, %v93_v39  ;;  %v490_v46 = vsel %vm489_vm13, 65537, %v3217_v4  ;;  %s3226_s16 = smov 25   ;;  %s3227_s17 = smov 73  }
   0xc   :  { %73 = vrot.lane.b32.xlu1 %v62_v23, %s3219_s14  ;;  %47 = vst.msk [vmem:[#allocation2 + $0x60] sm:$0xfc] %vm46_vm9, %v3217_v4  ;;  %v160_v44 = vpack.c.bf16 %v157_v42, %v157_v42  ;;  %v3392_v47 = vrot.slane %v490_v46, %v228_v32  ;;  %v3395_v48 = vrot.slane %v490_v46, %v224_v35  ;;  %vm137_vm15 = vcmask 588800   ;;  %s3228_s18 = smov 120   ;;  %s3229_s19 = smov 121  }
   0xd   :  { %71 = vrot.lane.b32.xlu0 %v61_v26, %s3219_s14  ;;  %50 = vst.msk [vmem:[#allocation2 + $0x70] sm:$0xfc] %vm49_vm10, %v3217_v4  ;;  %vm146_vm1 = vcmask 1048128   ;;  %vm110_vm2 = vcmask 189440   ;;  %vm107_vm3 = vcmask 1041600   ;;  %vm174_vm4 = vcmask 582656  }
   0xe   :  { %vm171_vm5 = vcmask 1041984   ;;  %vm234_vm9 = vcmask 56320   ;;  %vm307_vm10 = vcmask 449536   ;;  %s3230_s20 = smov 119   ;;  %s3232_s21 = smov 87  }
   0xf   :  { %s3233_s22 = smov 105   ;;  %s3234_s23 = smov 104  }
  0x10   :  { %135 = vrot.lane.b32.xlu1 %v124_v31, %s3218_s13  ;;  %s3235_s24 = smov 56   ;;  %s3236_s25 = smov 41  }
  0x11   :  { %133 = vrot.lane.b32.xlu0 %v123_v33, %s3218_s13  ;;  %s3237_s26 = smov 89   ;;  %s3238_s27 = smov 103  }
  0x12   :  { %s3239_s30 = smov 88   ;;  %s3240_s1 = smov 40  }
  0x14   :  { %232 = vrot.lane.b32.xlu1 %v3368_v36, %s3220_s8 }
  0x15   :  { %230 = vrot.lane.b32.xlu0 %v3371_v37, %s3220_s8 }
  0x18   :  { %305 = vrot.lane.b32.xlu1 %v3368_v36, %s3221_s11 }
  0x19   :  { %303 = vrot.lane.b32.xlu0 %v3371_v37, %s3221_s11 }
  0x1c   :  { %101 = vrot.lane.b32.xlu1 %v96_v41, %s3219_s14 }
  0x1d   :  { %99 = vrot.lane.b32.xlu0 %v95_v43, %s3219_s14  ;;  %s3224_s14 = smov 23  }
  0x20   :  { %165 = vrot.lane.b32.xlu1 %v160_v44, %s3218_s13 }
  0x21   :  { %163 = vrot.lane.b32.xlu0 %v159_v45, %s3218_s13 }
  0x24   :  { %501 = vrot.lane.b32.xlu1 %v3392_v47, %s3222_s0 }
  0x25   :  { %499 = vrot.lane.b32.xlu0 %v3395_v48, %s3222_s0 }
  0x28   :  { %574 = vrot.lane.b32.xlu1 %v3392_v47, %s3223_s12 }
  0x29   :  { %572 = vrot.lane.b32.xlu0 %v3395_v48, %s3223_s12 }
  0x2c   :  { %647 = vrot.lane.b32.xlu1 %v3368_v36, %s3224_s14 }
  0x2d   :  { %645 = vrot.lane.b32.xlu0 %v3371_v37, %s3224_s14 }
  0x30   :  { %720 = vrot.lane.b32.xlu1 %v3368_v36, %s3225_s15 }
  0x31   :  { %718 = vrot.lane.b32.xlu0 %v3371_v37, %s3225_s15 }
  0x34   :  { %901 = vrot.lane.b32.xlu1 %v3392_v47, %s3226_s16 }
  0x35   :  { %899 = vrot.lane.b32.xlu0 %v3395_v48, %s3226_s16 }
  0x38   :  { %974 = vrot.lane.b32.xlu1 %v3392_v47, %s3227_s17 }
  0x39   :  { %972 = vrot.lane.b32.xlu0 %v3395_v48, %s3227_s17 }
  0x76   :  { %v130_v49 = vpop.permute.xlu1 %129 }
  0x77   :  { %v68_v50 = vpop.permute.xlu0 %67 }
  0x78   :  { %85 = vst.msk [vmem:[#allocation2] sm:$0xff] %vm84_vm14, %v68_v50 }
  0x7a   :  { %v132_v51 = vpop.permute.xlu1 %131 }
  0x7b   :  { %v3417_v52 = vsel %vm137_vm15, %v130_v49, %v132_v51  ;;  %150 = vst.msk [vmem:[#allocation2 + $0x20] sm:$0xff] %vm137_vm15, %v132_v51  ;;  %v70_v53 = vpop.permute.xlu0 %69 }
  0x7c   :  { %148 = vst [vmem:[#allocation2 + $0x18] sm:$0xff] %v3417_v52  ;;  %v3422_v54 = vsel %vm25_vm0, %v68_v50, %v70_v53  ;;  %87 = vst.msk [vmem:[#allocation2 + $0x10] sm:$0xff] %vm25_vm0, %v70_v53 }
  0x7d   :  { %86 = vst [vmem:[#allocation2 + $0x8] sm:$0xff] %v3422_v54  ;;  %147 = vst.msk [vmem:[#allocation2 + $0x10] sm:$0xff] %vm146_vm1, %v130_v49 }
  0x7e   :  { %v74_v55 = vpop.permute.xlu1 %73 }
  0x7f   :  { %90 = vst.msk [vmem:[#allocation2 + $0x38] sm:$0xff] %vm25_vm0, %v74_v55  ;;  %v72_v56 = vpop.permute.xlu0 %71  ;;  %v3428_v57 = vld [vmem:[#allocation2] sm:$0xff] }
  0x80   :  { %v3431_v58 = vsel %vm25_vm0, %v72_v56, %v74_v55  ;;  %88 = vst.msk [vmem:[#allocation2 + $0x28] sm:$0xff] %vm84_vm14, %v72_v56  ;;  %385 = vrot.lane.b32.xlu0 %v3428_v57, %s3228_s18  ;;  %vm503_vm14 = vcmask 72704  }
  0x81   :  { %89 = vst [vmem:[#allocation2 + $0x30] sm:$0xff] %v3431_v58 }
  0x82   :  { %v136_v59 = vpop.permute.xlu1 %135  ;;  %v3437_v60 = vld [vmem:[#allocation2 + $0x20] sm:$0xff] }
  0x83   :  { %153 = vst.msk [vmem:[#allocation2 + $0x48] sm:$0xff] %vm137_vm15, %v136_v59  ;;  %v134_v61 = vpop.permute.xlu0 %133  ;;  %444 = vrot.lane.b32.xlu1 %v3437_v60, %s3218_s13 }
  0x84   :  { %v3443_v62 = vsel %vm137_vm15, %v134_v61, %v136_v59  ;;  %151 = vst.msk [vmem:[#allocation2 + $0x38] sm:$0xff] %vm146_vm1, %v134_v61  ;;  %v3463_v6 = vld [vmem:[#allocation2 + $0x10] sm:$0xff] }
  0x85   :  { %152 = vst [vmem:[#allocation2 + $0x40] sm:$0xff] %v3443_v62 }
  0x86   :  { %v3447_v63 = vpop.permute.xlu1 %232 }
  0x87   :  { %v3449_v0 = vpop.permute.xlu0 %230  ;;  %v3451_v1 = vld [vmem:[#allocation2 + $0x28] sm:$0xff] }
  0x88   :  { %391 = vrot.lane.b32.xlu0 %v3451_v1, %s3228_s18  ;;  %vm236_vm8 = vcmp.ne.s16.totalorder %v3449_v0, 0  ;;  %v235_v25 = vsel %vm234_vm9, %v3449_v0, %v3447_v63  ;;  %vm617_vm9 = vcmask 580608  }
  0x89   :  { %v239_v18 = vsel %vm236_vm8, %v3428_v57, 0  ;;  %v242_v20 = vsel %vm236_vm8, %v3451_v1, 0  ;;  %vm237_vm11 = vcmp.ne.s16.totalorder %v235_v25, 0 }
  0x8a   :  { %v3455_v2 = vpop.permute.xlu1 %305  ;;  %v3457_v3 = vld [vmem:[#allocation2 + $0x48] sm:$0xff]  ;;  %v240_v30 = vsel %vm237_vm11, %v3422_v54, 0  ;;  %v243_v34 = vsel %vm237_vm11, %v3431_v58, 0 }
  0x8b   :  { %v3459_v4 = vpop.permute.xlu0 %303  ;;  %450 = vrot.lane.b32.xlu1 %v3457_v3, %s3218_s13  ;;  %v3471_v12 = vld [vmem:[#allocation2 + $0x38] sm:$0xff]  ;;  %vm311_vm6 = vcmp.ne.s16.totalorder %v3455_v2, 0 }
  0x8c   :  { %v314_v16 = vsel %vm311_vm6, %v3437_v60, 0  ;;  %vm309_vm7 = vcmp.ne.s16.totalorder %v3459_v4, 0  ;;  %v317_v21 = vsel %vm311_vm6, %v3457_v3, 0  ;;  %v308_v28 = vsel %vm307_vm10, %v3459_v4, %v3455_v2 }
  0x8d   :  { %v312_v17 = vsel %vm309_vm7, %v3463_v6, 0  ;;  %v315_v23 = vsel %vm309_vm7, %v3471_v12, 0  ;;  %vm310_vm12 = vcmp.ne.s16.totalorder %v308_v28, 0 }
  0x8e   :  { %v102_v5 = vpop.permute.xlu1 %101  ;;  %v313_v32 = vsel %vm310_vm12, %v3417_v52, 0  ;;  %v316_v39 = vsel %vm310_vm12, %v3443_v62, 0 }
  0x8f   :  { %v100_v7 = vpop.permute.xlu0 %99  ;;  %111 = vst.msk [vmem:[#allocation2 + $0x60] sm:$0x3] %vm110_vm2, %v102_v5  ;;  %389 = vrot.lane.b32.xlu1 %v3463_v6, %s3228_s18  ;;  %vm576_vm2 = vcmask 465920  }
  0x90   :  { %108 = vst.msk [vmem:[#allocation2 + $0x50] sm:$0x3] %vm107_vm3, %v100_v7  ;;  %v103_v8 = vsel %vm25_vm0, %v100_v7, %v102_v5  ;;  %vm238_vm0 = vcmp.ne.s16.totalorder %v3447_v63, 0 }
  0x91   :  { %109 = vst [vmem:[#allocation2 + $0x58] sm:$0x3] %v103_v8  ;;  %v241_v15 = vsel %vm238_vm0, %v3463_v6, 0  ;;  %v244_v19 = vsel %vm238_vm0, %v3471_v12, 0 }
  0x92   :  { %v166_v9 = vpop.permute.xlu1 %165 }
  0x93   :  { %v164_v10 = vpop.permute.xlu0 %163  ;;  %175 = vst.msk [vmem:[#allocation2 + $0x70] sm:$0x3] %vm174_vm4, %v166_v9  ;;  %440 = vrot.lane.b32.xlu1 %v3463_v6, %s3218_s13 }
  0x94   :  { %172 = vst.msk [vmem:[#allocation2 + $0x60] sm:$0x3] %vm171_vm5, %v164_v10  ;;  %v167_v11 = vsel %vm137_vm15, %v164_v10, %v166_v9 }
  0x95   :  { %173 = vst [vmem:[#allocation2 + $0x68] sm:$0x3] %v167_v11 }
  0x96   :  { %v3550_v31 = vpop.permute.xlu1 %501 }
  0x97   :  { %v3473_v13 = vld [vmem:[#allocation2 + $0x50] sm:$0xff]  ;;  %395 = vrot.lane.b32.xlu1 %v3471_v12, %s3228_s18  ;;  %vm507_vm13 = vcmp.ne.s16.totalorder %v3550_v31, 0  ;;  %v3566_v35 = vpop.permute.xlu0 %499 }
  0x98   :  { %397 = vrot.lane.b32.xlu0 %v3473_v13, %s3228_s18  ;;  %v245_v22 = vsel %vm236_vm8, %v3473_v13, 0  ;;  %v3526_v24 = vld [vmem:[#allocation2 + $0x58] sm:$0xff]  ;;  %v510_v33 = vsel %vm507_vm13, %v3463_v6, 0  ;;  %v504_v44 = vsel %vm503_vm14, %v3566_v35, %v3550_v31  ;;  %v513_v53 = vsel %vm507_vm13, %v3471_v12, 0 }
  0x99   :  { %v246_v42 = vsel %vm237_vm11, %v3526_v24, 0  ;;  %vm506_vm4 = vcmp.ne.s16.totalorder %v504_v44, 0 }
  0x9a   :  { %v3483_v14 = vld [vmem:[#allocation2 + $0x70] sm:$0xff]  ;;  %v575_v40 = vpop.permute.xlu1 %574  ;;  %v509_v51 = vsel %vm506_vm4, %v3422_v54, 0  ;;  %v512_v0 = vsel %vm506_vm4, %v3431_v58, 0 }
  0x9b   :  { %446 = vrot.lane.b32.xlu1 %v3471_v12, %s3218_s13  ;;  %v320_v26 = vsel %vm311_vm6, %v3483_v14, 0  ;;  %v3544_v29 = vld [vmem:[#allocation2 + $0x60] sm:$0xff]  ;;  %vm580_vm1 = vcmp.ne.s16.totalorder %v575_v40, 0  ;;  %v573_v43 = vpop.permute.xlu0 %572 }
  0x9c   :  { %387 = vrot.lane.b32.xlu0 %v3422_v54, %s3228_s18  ;;  %v3537_v27 = vld [vmem:[#allocation2 + $0x68] sm:$0xff]  ;;  %v247_v38 = vsel %vm238_vm0, %v3544_v29, 0  ;;  %v318_v41 = vsel %vm309_vm7, %v3544_v29, 0  ;;  %v583_v45 = vsel %vm580_vm1, %v3437_v60, 0  ;;  %vm578_vm3 = vcmp.ne.s16.totalorder %v573_v43, 0 }
  0x9d   :  { %v319_v46 = vsel %vm310_vm12, %v3537_v27, 0  ;;  %v577_v49 = vsel %vm576_vm2, %v573_v43, %v575_v40  ;;  %v581_v50 = vsel %vm578_vm3, %v3463_v6, 0  ;;  %vm505_vm0 = vcmp.ne.s16.totalorder %v3566_v35, 0 }
  0x9e   :  { %vm579_vm5 = vcmp.ne.s16.totalorder %v577_v49, 0  ;;  %v586_v56 = vsel %vm580_vm1, %v3457_v3, 0  ;;  %v508_v59 = vsel %vm505_vm0, %v3428_v57, 0  ;;  %v3612_v61 = vpop.permute.xlu1 %647  ;;  %v584_v63 = vsel %vm578_vm3, %v3471_v12, 0 }
  0x9f   :  { %456 = vrot.lane.b32.xlu1 %v3483_v14, %s3218_s13  ;;  %v582_v55 = vsel %vm579_vm5, %v3417_v52, 0  ;;  %v585_v4 = vsel %vm579_vm5, %v3443_v62, 0  ;;  %v511_v5 = vsel %vm505_vm0, %v3451_v1, 0  ;;  %v3632_v7 = vpop.permute.xlu0 %645  ;;  %v516_v9 = vsel %vm507_vm13, %v3544_v29, 0 }
  0xa0   :  { %442 = vrot.lane.b32.xlu0 %v3417_v52, %s3218_s13  ;;  %v589_v10 = vsel %vm580_vm1, %v3483_v14, 0  ;;  %vm653_vm6 = vcmp.ne.s16.totalorder %v3612_v61, 0  ;;  %vm649_vm7 = vcmask 187392   ;;  %v514_v25 = vsel %vm505_vm0, %v3473_v13, 0 }
  0xa1   :  { %v659_v35 = vsel %vm653_vm6, %v3471_v12, 0  ;;  %vm651_vm14 = vcmp.ne.s16.totalorder %v3632_v7, 0  ;;  %vm275_vm1 = vcmask 990208   ;;  %vm903_vm0 = vcmask 203776  }
  0xa2   :  { %v3620_v2 = vpop.permute.xlu1 %720 }
  0xa3   :  { %261 = vrot.lane.b32.xlu1 %v241_v15, %s3229_s19  ;;  %v587_v15 = vsel %vm578_vm3, %v3544_v29, 0  ;;  %vm725_vm8 = vcmp.ne.s16.totalorder %v3620_v2, 0  ;;  %vm348_vm3 = vcmask 596992  }
  0xa4   :  { %393 = vrot.lane.b32.xlu0 %v3431_v58, %s3228_s18 }
  0xa6   :  { %v3635_v8 = vpop.permute.xlu1 %901 }
  0xa7   :  { %334 = vrot.lane.b32.xlu1 %v314_v16, %s3227_s17  ;;  %v515_v16 = vsel %vm506_vm4, %v3526_v24, 0  ;;  %vm403_vm4 = vcmask 982016  }
  0xa8   :  { %448 = vrot.lane.b32.xlu0 %v3443_v62, %s3218_s13 }
  0xaa   :  { %v3647_v11 = vpop.permute.xlu1 %974 }
  0xab   :  { %330 = vrot.lane.b32.xlu1 %v312_v17, %s3227_s17 }
  0xac   :  { %257 = vrot.lane.b32.xlu0 %v239_v18, %s3229_s19 }
  0xaf   :  { %267 = vrot.lane.b32.xlu1 %v244_v19, %s3229_s19  ;;  %v588_v19 = vsel %vm579_vm5, %v3537_v27, 0  ;;  %vm907_vm5 = vcmp.ne.s16.totalorder %v3635_v8, 0 }
  0xb0   :  { %263 = vrot.lane.b32.xlu0 %v242_v20, %s3229_s19  ;;  %v650_v20 = vsel %vm649_vm7, %v3632_v7, %v3612_v61  ;;  %v657_v61 = vsel %vm651_vm14, %v3451_v1, 0  ;;  %vm544_vm7 = vcmask 973824  }
  0xb1   :  { %vm652_vm12 = vcmp.ne.s16.totalorder %v650_v20, 0 }
  0xb3   :  { %340 = vrot.lane.b32.xlu1 %v317_v21, %s3227_s17 }
  0xb4   :  { %269 = vrot.lane.b32.xlu0 %v245_v22, %s3229_s19 }
  0xb7   :  { %336 = vrot.lane.b32.xlu1 %v315_v23, %s3227_s17  ;;  %v728_v23 = vsel %vm725_vm8, %v3437_v60, 0 }
  0xb8   :  { %399 = vrot.lane.b32.xlu0 %v3526_v24, %s3228_s18 }
  0xbb   :  { %346 = vrot.lane.b32.xlu1 %v320_v26, %s3227_s17 }
  0xbc   :  { %454 = vrot.lane.b32.xlu0 %v3537_v27, %s3218_s13 }
  0xbf   :  { %401 = vrot.lane.b32.xlu1 %v3544_v29, %s3228_s18 }
  0xc0   :  { %259 = vrot.lane.b32.xlu0 %v240_v30, %s3229_s19 }
  0xc3   :  { %452 = vrot.lane.b32.xlu1 %v3544_v29, %s3218_s13  ;;  %s3231_s13 = smov 39  }
  0xc4   :  { %332 = vrot.lane.b32.xlu0 %v313_v32, %s3227_s17  ;;  %v655_v32 = vsel %vm652_vm12, %v3422_v54, 0 }
  0xc7   :  { %530 = vrot.lane.b32.xlu1 %v510_v33, %s3230_s20 }
  0xc8   :  { %265 = vrot.lane.b32.xlu0 %v243_v34, %s3229_s19 }
  0xcb   :  { %273 = vrot.lane.b32.xlu1 %v247_v38, %s3229_s19 }
  0xcc   :  { %338 = vrot.lane.b32.xlu0 %v316_v39, %s3227_s17 }
  0xcf   :  { %342 = vrot.lane.b32.xlu1 %v318_v41, %s3227_s17  ;;  %v731_v41 = vsel %vm725_vm8, %v3457_v3, 0 }
  0xd0   :  { %271 = vrot.lane.b32.xlu0 %v246_v42, %s3229_s19  ;;  %v654_v42 = vsel %vm651_vm14, %v3428_v57, 0 }
  0xd3   :  { %603 = vrot.lane.b32.xlu1 %v583_v45, %s3225_s15 }
  0xd4   :  { %344 = vrot.lane.b32.xlu0 %v319_v46, %s3227_s17  ;;  %v658_v46 = vsel %vm652_vm12, %v3431_v58, 0 }
  0xd7   :  { %599 = vrot.lane.b32.xlu1 %v581_v50, %s3225_s15 }
  0xd8   :  { %528 = vrot.lane.b32.xlu0 %v509_v51, %s3230_s20  ;;  %v662_v51 = vsel %vm653_vm6, %v3544_v29, 0 }
  0xdb   :  { %536 = vrot.lane.b32.xlu1 %v513_v53, %s3230_s20 }
  0xdc   :  { %601 = vrot.lane.b32.xlu0 %v582_v55, %s3225_s15 }
  0xdf   :  { %609 = vrot.lane.b32.xlu1 %v586_v56, %s3225_s15 }
  0xe0   :  { %526 = vrot.lane.b32.xlu0 %v508_v59, %s3230_s20  ;;  %v734_v59 = vsel %vm725_vm8, %v3483_v14, 0 }
  0xe3   :  { %605 = vrot.lane.b32.xlu1 %v584_v63, %s3225_s15 }
  0xe4   :  { %534 = vrot.lane.b32.xlu0 %v512_v0, %s3230_s20 }
  0xe7   :  { %1045 = vrot.lane.b32.xlu1 %v3368_v36, %s3231_s13 }
  0xe8   :  { %607 = vrot.lane.b32.xlu0 %v585_v4, %s3225_s15 }
  0xeb   :  { %1118 = vrot.lane.b32.xlu1 %v3368_v36, %s3232_s21  ;;  %v3643_v36 = vpop.permute.xlu0 %718 }
  0xec   :  { %532 = vrot.lane.b32.xlu0 %v511_v5, %s3230_s20  ;;  %vm723_vm11 = vcmp.ne.s16.totalorder %v3643_v36, 0  ;;  %v722_v26 = vsel %vm617_vm9, %v3643_v36, %v3620_v2  ;;  %v661_v2 = vsel %vm652_vm12, %v3526_v24, 0 }
  0xed   :  { %v726_v31 = vsel %vm723_vm11, %v3463_v6, 0  ;;  %vm724_vm13 = vcmp.ne.s16.totalorder %v722_v26, 0  ;;  %v729_v45 = vsel %vm723_vm11, %v3471_v12, 0  ;;  %v732_v4 = vsel %vm723_vm11, %v3544_v29, 0 }
  0xee   :  { %v727_v38 = vsel %vm724_vm13, %v3417_v52, 0  ;;  %v730_v53 = vsel %vm724_vm13, %v3443_v62, 0 }
  0xef   :  { %542 = vrot.lane.b32.xlu1 %v516_v9, %s3230_s20  ;;  %v3660_v18 = vpop.permute.xlu0 %899 }
  0xf0   :  { %1043 = vrot.lane.b32.xlu0 %v3371_v37, %s3231_s13 }
  0xf3   :  { %615 = vrot.lane.b32.xlu1 %v589_v10, %s3225_s15  ;;  %v3675_v22 = vpop.permute.xlu0 %972  ;;  %v733_v10 = vsel %vm724_vm13, %v3537_v27, 0 }
  0xf4   :  { %1116 = vrot.lane.b32.xlu0 %v3371_v37, %s3232_s21  ;;  %v656_v37 = vsel %vm653_vm6, %v3463_v6, 0  ;;  %vm979_vm6 = vcmp.ne.s16.totalorder %v3647_v11, 0  ;;  %vm977_vm8 = vcmp.ne.s16.totalorder %v3675_v22, 0 }
  0xf5   :  { %v3658_v17 = vpop.permute.xlu1 %444 }
  0xf7   :  { %611 = vrot.lane.b32.xlu1 %v587_v15, %s3225_s15  ;;  %v3691_v30 = vpop.permute.xlu0 %385 }
  0xf8   :  { %540 = vrot.lane.b32.xlu0 %v515_v16, %s3230_s20  ;;  %v660_v16 = vsel %vm651_vm14, %v3473_v13, 0  ;;  %vm1047_vm14 = vcmask 318464  }
  0xfb   :  { %676 = vrot.lane.b32.xlu1 %v656_v37, %s3233_s22  ;;  %v3702_v34 = vpop.permute.xlu0 %391 }
  0xfc   :  { %613 = vrot.lane.b32.xlu0 %v588_v19, %s3225_s15 }
  0xfd   :  { %v3673_v21 = vpop.permute.xlu1 %450 }
  0xff   :  { %748 = vrot.lane.b32.xlu1 %v728_v23, %s3223_s12 }
 0x100   :  { %538 = vrot.lane.b32.xlu0 %v514_v25, %s3230_s20 }
 0x101   :  { %v3689_v28 = vpop.permute.xlu1 %389 }
 0x103   :  { %744 = vrot.lane.b32.xlu1 %v726_v31, %s3223_s12 }
 0x104   :  { %674 = vrot.lane.b32.xlu0 %v655_v32, %s3233_s22 }
 0x105   :  { %v3700_v33 = vpop.permute.xlu1 %440 }
 0x107   :  { %682 = vrot.lane.b32.xlu1 %v659_v35, %s3233_s22 }
 0x108   :  { %746 = vrot.lane.b32.xlu0 %v727_v38, %s3223_s12 }
 0x109   :  { %v3712_v39 = vpop.permute.xlu1 %395 }
 0x10a   :  { %v3714_v40 = vpop.permute.xlu0 %397 }
 0x10b   :  { %754 = vrot.lane.b32.xlu1 %v731_v41, %s3223_s12 }
 0x10c   :  { %672 = vrot.lane.b32.xlu0 %v654_v42, %s3233_s22 }
 0x10d   :  { %v3724_v43 = vpop.permute.xlu1 %446 }
 0x10e   :  { %v3726_v44 = vpop.permute.xlu0 %387 }
 0x10f   :  { %750 = vrot.lane.b32.xlu1 %v729_v45, %s3223_s12 }
 0x110   :  { %680 = vrot.lane.b32.xlu0 %v658_v46, %s3233_s22 }
 0x111   :  { %v3735_v49 = vpop.permute.xlu1 %456 }
 0x112   :  { %v3737_v50 = vpop.permute.xlu0 %442 }
 0x113   :  { %688 = vrot.lane.b32.xlu1 %v662_v51, %s3233_s22 }
 0x114   :  { %752 = vrot.lane.b32.xlu0 %v730_v53, %s3223_s12 }
 0x115   :  { %v262_v55 = vpop.permute.xlu1 %261 }
 0x116   :  { %v3746_v56 = vpop.permute.xlu0 %393 }
 0x117   :  { %760 = vrot.lane.b32.xlu1 %v734_v59, %s3223_s12 }
 0x118   :  { %678 = vrot.lane.b32.xlu0 %v657_v61, %s3233_s22 }
 0x119   :  { %v335_v63 = vpop.permute.xlu1 %334 }
 0x11a   :  { %v3756_v0 = vpop.permute.xlu0 %448 }
 0x11b   :  { %756 = vrot.lane.b32.xlu1 %v732_v4, %s3223_s12 }
 0x11c   :  { %686 = vrot.lane.b32.xlu0 %v661_v2, %s3233_s22 }
 0x11d   :  { %v331_v5 = vpop.permute.xlu1 %330 }
 0x11e   :  { %v258_v9 = vpop.permute.xlu0 %257 }
 0x11f   :  { %802 = vrot.lane.b32.xlu1 %v3463_v6, %s3234_s23 }
 0x120   :  { %758 = vrot.lane.b32.xlu0 %v733_v10, %s3223_s12  ;;  %v405_v10 = vsel %vm403_vm4, %v3726_v44, %v3689_v28  ;;  %v407_v28 = vsel %vm403_vm4, %v3746_v56, %v3712_v39  ;;  %v3862_v39 = vsel %vm903_vm0, %v3660_v18, %v3635_v8 }
 0x121   :  { %v268_v36 = vpop.permute.xlu1 %267  ;;  %vm906_vm11 = vcmp.ne.s16.totalorder %v3862_v39, 0  ;;  %v3991_v39 = vld [vmem:[#allocation2 + $0x20] sm:$0xff] }
 0x122   :  { %v264_v15 = vpop.permute.xlu0 %263 }
 0x123   :  { %857 = vrot.lane.b32.xlu1 %v3437_v60, %s3235_s24 }
 0x124   :  { %684 = vrot.lane.b32.xlu0 %v660_v16, %s3233_s22 }
 0x125   :  { %v341_v37 = vpop.permute.xlu1 %340 }
 0x126   :  { %v270_v19 = vpop.permute.xlu0 %269 }
 0x127   :  { %853 = vrot.lane.b32.xlu1 %v3463_v6, %s3235_s24 }
 0x128   :  { %800 = vrot.lane.b32.xlu0 %v3422_v54, %s3234_s23 }
 0x129   :  { %v337_v20 = vpop.permute.xlu1 %336 }
 0x12a   :  { %v3780_v23 = vpop.permute.xlu0 %399 }
 0x12b   :  { %808 = vrot.lane.b32.xlu1 %v3471_v12, %s3234_s23 }
 0x12c   :  { %855 = vrot.lane.b32.xlu0 %v3417_v52, %s3235_s24 }
 0x12d   :  { %v347_v7 = vpop.permute.xlu1 %346 }
 0x12e   :  { %v3786_v25 = vpop.permute.xlu0 %454 }
 0x12f   :  { %863 = vrot.lane.b32.xlu1 %v3457_v3, %s3235_s24 }
 0x130   :  { %798 = vrot.lane.b32.xlu0 %v3428_v57, %s3234_s23 }
 0x131   :  { %v3792_v26 = vpop.permute.xlu1 %401 }
 0x132   :  { %v260_v31 = vpop.permute.xlu0 %259 }
 0x133   :  { %859 = vrot.lane.b32.xlu1 %v3471_v12, %s3235_s24  ;;  %v277_v32 = vsel %vm275_vm1, %v260_v31, %v262_v55  ;;  %v276_v35 = vsel %vm275_vm1, %v258_v9, %v260_v31  ;;  %v910_v31 = vsel %vm907_vm5, %v3463_v6, 0 }
 0x134   :  { %806 = vrot.lane.b32.xlu0 %v3431_v58, %s3234_s23  ;;  %1845 = vmatprep.subr.bf16.mxu0 %v277_v32  ;;  %v461_v32 = vsel %vm137_vm15, %v3756_v0, %v3673_v21  ;;  %v408_v21 = vsel %vm403_vm4, %v3714_v40, %v3780_v23 }
 0x135   :  { %1846 = vmatpush1.bf16.msra.mxu0 %v276_v35  ;;  %v3800_v38 = vpop.permute.xlu1 %452 }
 0x136   :  { %v333_v41 = vpop.permute.xlu0 %332 }
 0x137   :  { %1301 = vrot.lane.b32.xlu1 %v3392_v47, %s3236_s25  ;;  %v350_v42 = vsel %vm348_vm3, %v333_v41, %v335_v63  ;;  %v349_v45 = vsel %vm348_vm3, %v331_v5, %v333_v41 }
 0x138   :  { %861 = vrot.lane.b32.xlu0 %v3443_v62, %s3235_s24  ;;  %2071 = vmatprep.subr.bf16.mxu1 %v350_v42 }
 0x139   :  { %2072 = vmatpush1.bf16.msra.mxu1 %v349_v45  ;;  %v3808_v46 = vpop.permute.xlu1 %530 }
 0x13a   :  { %v266_v51 = vpop.permute.xlu0 %265 }
 0x13b   :  { %1372 = vrot.lane.b32.xlu1 %v3392_v47, %s3237_s26  ;;  %v279_v53 = vsel %vm275_vm1, %v266_v51, %v268_v36  ;;  %v278_v55 = vsel %vm275_vm1, %v264_v15, %v266_v51 }
 0x13c   :  { %804 = vrot.lane.b32.xlu0 %v3451_v1, %s3234_s23  ;;  %1847 = vmatprep.subr.bf16.mxu0 %v279_v53 }
 0x13d   :  { %1848 = vmatpush1.bf16.msra.mxu0 %v278_v55  ;;  %v274_v59 = vpop.permute.xlu1 %273  ;;  %v3011_v55 = vld [vmem:[%s4967_s3 + $0x4] ss:$16 sps:$4 sm:$0xff]  }
 0x13e   :  { %v339_v61 = vpop.permute.xlu0 %338  ;;  %2103 = vmatprep.mubr.bf16.mxu1 %v3011_v55  ;;  %1877 = vmatprep.mubr.bf16.mxu0 %v3011_v55 }
 0x13f   :  { %814 = vrot.lane.b32.xlu1 %v3544_v29, %s3234_s23  ;;  %v352_v63 = vsel %vm348_vm3, %v339_v61, %v341_v37  ;;  %v351_v4 = vsel %vm348_vm3, %v337_v20, %v339_v61 }
 0x140   :  { %1299 = vrot.lane.b32.xlu0 %v3395_v48, %s3236_s25  ;;  %2073 = vmatprep.subr.bf16.mxu1 %v352_v63 }
 0x141   :  { %2074 = vmatpush1.bf16.msra.mxu1 %v351_v4  ;;  %v343_v47 = vpop.permute.xlu1 %342 }
 0x142   :  { %v272_v2 = vpop.permute.xlu0 %271 }
 0x143   :  { %869 = vrot.lane.b32.xlu1 %v3483_v14, %s3235_s24  ;;  %v281_v5 = vsel %vm275_vm1, %v272_v2, %v274_v59  ;;  %v280_v9 = vsel %vm275_vm1, %v270_v19, %v272_v2  ;;  %v459_v19 = vsel %vm137_vm15, %v3737_v50, %v3658_v17  ;;  %v406_v17 = vsel %vm403_vm4, %v3702_v34, %v3746_v56 }
 0x144   :  { %1370 = vrot.lane.b32.xlu0 %v3395_v48, %s3237_s26  ;;  %1849 = vmatprep.subr.bf16.mxu0 %v281_v5  ;;  %v404_v48 = vsel %vm403_vm4, %v3691_v30, %v3726_v44  ;;  %v458_v30 = vsel %vm137_vm15, %v3700_v33, %v3737_v50  ;;  %v409_v44 = vsel %vm403_vm4, %v3780_v23, %v3792_v26  ;;  %v982_v33 = vsel %vm979_vm6, %v3437_v60, 0 }
 0x145   :  { %1850 = vmatpush1.bf16.msra.mxu0 %v280_v9  ;;  %v604_v36 = vpop.permute.xlu1 %603  ;;  %v460_v50 = vsel %vm137_vm15, %v3724_v43, %v3756_v0  ;;  %v3887_v60 = vsel %vm348_vm3, %v3675_v22, %v3647_v11  ;;  %v463_v26 = vsel %vm137_vm15, %v3786_v25, %v3735_v49  ;;  %v980_v43 = vsel %vm977_vm8, %v3463_v6, 0 }
 0x146   :  { %v345_v15 = vpop.permute.xlu0 %344  ;;  %1851 = vmatprep.subr.bf16.mxu0 %v405_v10  ;;  %v909_v0 = vsel %vm906_vm11, %v3422_v54, 0  ;;  %vm978_vm12 = vcmp.ne.s16.totalorder %v3887_v60, 0  ;;  %v462_v49 = vsel %vm137_vm15, %v3800_v38, %v3786_v25  ;;  %v913_v54 = vsel %vm907_vm5, %v3471_v12, 0  ;;  %v4009_v60 = vld [vmem:[#allocation2 + $0x8] sm:$0xff] }
 0x147   :  { %865 = vrot.lane.b32.xlu1 %v3544_v29, %s3235_s24  ;;  %v354_v16 = vsel %vm348_vm3, %v345_v15, %v347_v7  ;;  %v353_v37 = vsel %vm348_vm3, %v343_v47, %v345_v15  ;;  %v981_v51 = vsel %vm978_vm12, %v3417_v52, 0  ;;  %vm905_vm15 = vcmp.ne.s16.totalorder %v3660_v18, 0 }
 0x148   :  { %812 = vrot.lane.b32.xlu0 %v3526_v24, %s3234_s23  ;;  %2075 = vmatprep.subr.bf16.mxu1 %v354_v16  ;;  %v985_v52 = vsel %vm979_vm6, %v3457_v3, 0  ;;  %v908_v61 = vsel %vm905_vm15, %v3428_v57, 0  ;;  %v983_v3 = vsel %vm977_vm8, %v3471_v12, 0  ;;  %v912_v57 = vsel %vm906_vm11, %v3431_v58, 0 }
 0x149   :  { %1852 = vmatpush1.bf16.msra.mxu0 %v404_v48  ;;  %2076 = vmatpush1.bf16.msra.mxu1 %v353_v37  ;;  %v600_v20 = vpop.permute.xlu1 %599  ;;  %v984_v15 = vsel %vm978_vm12, %v3443_v62, 0  ;;  %v988_v37 = vsel %vm979_vm6, %v3483_v14, 0  ;;  %v911_v8 = vsel %vm905_vm15, %v3451_v1, 0  ;;  %v915_v14 = vsel %vm906_vm11, %v3526_v24, 0 }
 0x14a   :  { %v529_v7 = vpop.permute.xlu0 %528  ;;  %1853 = vmatprep.subr.bf16.mxu0 %v407_v28  ;;  %2077 = vmatprep.subr.bf16.mxu1 %v459_v19  ;;  %v986_v28 = vsel %vm977_vm8, %v3544_v29, 0  ;;  %vm1120_vm3 = vcmask 711680   ;;  %vm1161_vm11 = vcmask 334848  }
 0x14b   :  { %930 = vrot.lane.b32.xlu1 %v910_v31, %s3238_s27  ;;  %v546_v56 = vsel %vm544_vm7, %v529_v7, %v3808_v46 }
 0x14c   :  { %867 = vrot.lane.b32.xlu0 %v3537_v27, %s3235_s24 }
 0x14d   :  { %1854 = vmatpush1.bf16.msra.mxu0 %v406_v17  ;;  %2078 = vmatpush1.bf16.msra.mxu1 %v458_v30  ;;  %v537_v35 = vpop.permute.xlu1 %536 }
 0x14e   :  { %v602_v34 = vpop.permute.xlu0 %601  ;;  %1855 = vmatprep.subr.bf16.mxu0 %v409_v44  ;;  %2079 = vmatprep.subr.bf16.mxu1 %v461_v32 }
 0x14f   :  { %1002 = vrot.lane.b32.xlu1 %v982_v33, %s3221_s11  ;;  %v619_v42 = vsel %vm617_vm9, %v602_v34, %v604_v36  ;;  %v618_v25 = vsel %vm617_vm9, %v600_v20, %v602_v34  ;;  %v916_v36 = vsel %vm907_vm5, %v3544_v29, 0  ;;  %v987_v20 = vsel %vm978_vm12, %v3537_v27, 0 }
 0x150   :  { %810 = vrot.lane.b32.xlu0 %v3473_v13, %s3234_s23  ;;  %vm690_vm5 = vcmask 859136  }
 0x151   :  { %1856 = vmatpush1.bf16.msra.mxu0 %v408_v21  ;;  %2080 = vmatpush1.bf16.msra.mxu1 %v460_v50  ;;  %v610_v41 = vpop.permute.xlu1 %609 }
 0x152   :  { %v527_v40 = vpop.permute.xlu0 %526  ;;  %1857 = vmatprep.subr.bf16.mxu0 %v546_v56  ;;  %2081 = vmatprep.subr.bf16.mxu1 %v463_v26 }
 0x153   :  { %998 = vrot.lane.b32.xlu1 %v980_v43, %s3221_s11  ;;  %v545_v23 = vsel %vm544_vm7, %v527_v40, %v529_v7 }
 0x154   :  { %928 = vrot.lane.b32.xlu0 %v909_v0, %s3238_s27 }
 0x155   :  { %1858 = vmatpush1.bf16.msra.mxu0 %v545_v23  ;;  %2082 = vmatpush1.bf16.msra.mxu1 %v462_v49  ;;  %v606_v45 = vpop.permute.xlu1 %605 }
 0x156   :  { %v535_v46 = vpop.permute.xlu0 %534  ;;  %2083 = vmatprep.subr.bf16.mxu1 %v619_v42 }
 0x157   :  { %936 = vrot.lane.b32.xlu1 %v913_v54, %s3238_s27  ;;  %v548_v53 = vsel %vm544_vm7, %v535_v46, %v537_v35  ;;  %v914_v35 = vsel %vm905_vm15, %v3473_v13, 0  ;;  %vm1088_vm15 = vcmask 728064  }
 0x158   :  { %1000 = vrot.lane.b32.xlu0 %v981_v51, %s3221_s11  ;;  %1859 = vmatprep.subr.bf16.mxu0 %v548_v53 }
 0x159   :  { %2084 = vmatpush1.bf16.msra.mxu1 %v618_v25  ;;  %v3919_v38 = vpop.permute.xlu1 %1045  ;;  %v4047_v25 = vld [vmem:[#allocation2 + $0x38] sm:$0xff] }
 0x15a   :  { %v608_v59 = vpop.permute.xlu0 %607  ;;  %vm1051_vm13 = vcmp.ne.s16.totalorder %v3919_v38, 0 }
 0x15b   :  { %1008 = vrot.lane.b32.xlu1 %v985_v52, %s3221_s11  ;;  %v621_v63 = vsel %vm617_vm9, %v608_v59, %v610_v41  ;;  %v620_v4 = vsel %vm617_vm9, %v606_v45, %v608_v59  ;;  %v1054_v22 = vsel %vm1051_vm13, %v3463_v6, 0  ;;  %v1057_v40 = vsel %vm1051_vm13, %v3471_v12, 0  ;;  %v4034_v12 = vld [vmem:[#allocation2 + $0x48] sm:$0xff]  ;;  %v4052_v52 = vld [vmem:[#allocation2 + $0x30] sm:$0xff] }
 0x15c   :  { %926 = vrot.lane.b32.xlu0 %v908_v61, %s3238_s27  ;;  %2085 = vmatprep.subr.bf16.mxu1 %v621_v63 }
 0x15d   :  { %2086 = vmatpush1.bf16.msra.mxu1 %v620_v4  ;;  %v3934_v47 = vpop.permute.xlu1 %1118 }
 0x15e   :  { %v533_v2 = vpop.permute.xlu0 %532  ;;  %vm1124_vm1 = vcmp.ne.s16.totalorder %v3934_v47, 0 }
 0x15f   :  { %1004 = vrot.lane.b32.xlu1 %v983_v3, %s3221_s11  ;;  %v547_v5 = vsel %vm544_vm7, %v533_v2, %v535_v46  ;;  %v1127_v32 = vsel %vm1124_vm1, %v3991_v39, 0  ;;  %v1130_v45 = vsel %vm1124_vm1, %v4034_v12, 0  ;;  %v4039_v46 = vld [vmem:[#allocation2] sm:$0xff]  ;;  %v1060_v3 = vsel %vm1051_vm13, %v3544_v29, 0 }
 0x160   :  { %934 = vrot.lane.b32.xlu0 %v912_v57, %s3238_s27  ;;  %1860 = vmatpush1.bf16.msra.mxu0 %v547_v5  ;;  %v4063_v57 = vld [vmem:[#allocation2 + $0x40] sm:$0xff] }
 0x161   :  { %v543_v9 = vpop.permute.xlu1 %542 }
 0x162   :  { %v3945_v10 = vpop.permute.xlu0 %1043 }
 0x163   :  { %942 = vrot.lane.b32.xlu1 %v916_v36, %s3238_s27  ;;  %v3989_v17 = vsel %vm1047_vm14, %v3945_v10, %v3919_v38  ;;  %vm1049_vm6 = vcmp.ne.s16.totalorder %v3945_v10, 0 }
 0x164   :  { %1006 = vrot.lane.b32.xlu0 %v984_v15, %s3221_s11  ;;  %vm1050_vm4 = vcmp.ne.s16.totalorder %v3989_v17, 0  ;;  %v1052_v54 = vsel %vm1049_vm6, %v4039_v46, 0  ;;  %v4104_v17 = vld [vmem:[#allocation2 + $0x50] sm:$0xff] }
 0x165   :  { %v616_v58 = vpop.permute.xlu1 %615  ;;  %v1053_v18 = vsel %vm1050_vm4, %v4009_v60, 0  ;;  %v1056_v61 = vsel %vm1050_vm4, %v4052_v52, 0 }
 0x166   :  { %v3955_v16 = vpop.permute.xlu0 %1116 }
 0x167   :  { %1014 = vrot.lane.b32.xlu1 %v988_v37, %s3221_s11  ;;  %v4007_v33 = vsel %vm1120_vm3, %v3955_v16, %v3934_v47 }
 0x168   :  { %932 = vrot.lane.b32.xlu0 %v911_v8, %s3238_s27  ;;  %vm1123_vm0 = vcmp.ne.s16.totalorder %v4007_v33, 0  ;;  %v4077_v8 = vld [vmem:[#allocation2 + $0x28] sm:$0xff] }
 0x169   :  { %v612_v62 = vpop.permute.xlu1 %611  ;;  %v1129_v5 = vsel %vm1123_vm0, %v4063_v57, 0 }
 0x16a   :  { %v541_v48 = vpop.permute.xlu0 %540 }
 0x16b   :  { %1010 = vrot.lane.b32.xlu1 %v986_v28, %s3221_s11  ;;  %v550_v1 = vsel %vm544_vm7, %v541_v48, %v543_v9 }
 0x16c   :  { %940 = vrot.lane.b32.xlu0 %v915_v14, %s3238_s27  ;;  %1861 = vmatprep.subr.bf16.mxu0 %v550_v1  ;;  %v1059_v1 = vsel %vm1050_vm4, %v3526_v24, 0 }
 0x16d   :  { %v677_v11 = vpop.permute.xlu1 %676 }
 0x16e   :  { %v614_v19 = vpop.permute.xlu0 %613 }
 0x16f   :  { %1074 = vrot.lane.b32.xlu1 %v1054_v22, %s3237_s26  ;;  %v623_v7 = vsel %vm617_vm9, %v614_v19, %v616_v58  ;;  %v622_v31 = vsel %vm617_vm9, %v612_v62, %v614_v19  ;;  %vm1122_vm9 = vcmp.ne.s16.totalorder %v3955_v16, 0  ;;  %v4072_v58 = vld [vmem:[#allocation2 + $0x70] sm:$0xff]  ;;  %v1055_v62 = vsel %vm1049_vm6, %v4077_v8, 0 }
 0x170   :  { %1012 = vrot.lane.b32.xlu0 %v987_v20, %s3221_s11  ;;  %2087 = vmatprep.subr.bf16.mxu1 %v623_v7  ;;  %v1125_v13 = vsel %vm1122_vm9, %v3463_v6, 0  ;;  %v4024_v6 = vld [vmem:[#allocation2 + $0x18] sm:$0xff]  ;;  %v1128_v59 = vsel %vm1122_vm9, %v4047_v25, 0  ;;  %v1133_v37 = vsel %vm1124_vm1, %v4072_v58, 0  ;;  %v1131_v47 = vsel %vm1122_vm9, %v3544_v29, 0  ;;  %v4094_v20 = vld [vmem:[#allocation2 + $0x10] sm:$0xff] }
 0x171   :  { %2088 = vmatpush1.bf16.msra.mxu1 %v622_v31  ;;  %v749_v30 = vpop.permute.xlu1 %748  ;;  %v1126_v43 = vsel %vm1123_vm0, %v4024_v6, 0  ;;  %v1132_v29 = vsel %vm1123_vm0, %v3537_v27, 0  ;;  %v1058_v27 = vsel %vm1049_vm6, %v4104_v17, 0  ;;  %vm1216_vm0 = vcmask 719872  }
 0x172   :  { %v539_v44 = vpop.permute.xlu0 %538  ;;  %vm1271_vm6 = vcmask 326656  }
 0x173   :  { %1147 = vrot.lane.b32.xlu1 %v1127_v32, %s3236_s25  ;;  %v549_v34 = vsel %vm544_vm7, %v539_v44, %v541_v48  ;;  %vm871_vm7 = vcmask 457728  }
 0x174   :  { %938 = vrot.lane.b32.xlu0 %v914_v35, %s3238_s27  ;;  %1862 = vmatpush1.bf16.msra.mxu0 %v549_v34 }
 0x175   :  { %v745_v21 = vpop.permute.xlu1 %744 }
 0x176   :  { %v675_v50 = vpop.permute.xlu0 %674 }
 0x177   :  { %1143 = vrot.lane.b32.xlu1 %v1125_v13, %s3236_s25  ;;  %v692_v56 = vsel %vm690_vm5, %v675_v50, %v677_v11 }
 0x178   :  { %1072 = vrot.lane.b32.xlu0 %v1053_v18, %s3237_s26  ;;  %1863 = vmatprep.subr.bf16.mxu0 %v692_v56 }
 0x179   :  { %v683_v26 = vpop.permute.xlu1 %682 }
 0x17a   :  { %v747_v41 = vpop.permute.xlu0 %746 }
 0x17b   :  { %1080 = vrot.lane.b32.xlu1 %v1057_v40, %s3237_s26  ;;  %v763_v0 = vsel %vm576_vm2, %v747_v41, %v749_v30  ;;  %v762_v23 = vsel %vm576_vm2, %v745_v21, %v747_v41 }
 0x17c   :  { %1145 = vrot.lane.b32.xlu0 %v1126_v43, %s3236_s25  ;;  %2089 = vmatprep.subr.bf16.mxu1 %v763_v0  ;;  %v4136_v0 = vld [vmem:[#allocation2 + $0x60] sm:$0xff] }
 0x17d   :  { %2090 = vmatpush1.bf16.msra.mxu1 %v762_v23  ;;  %v755_v49 = vpop.permute.xlu1 %754 }
 0x17e   :  { %v673_v42 = vpop.permute.xlu0 %672 }
 0x17f   :  { %1153 = vrot.lane.b32.xlu1 %v1130_v45, %s3236_s25  ;;  %v691_v51 = vsel %vm690_vm5, %v673_v42, %v675_v50 }
 0x180   :  { %1070 = vrot.lane.b32.xlu0 %v1052_v54, %s3237_s26  ;;  %1864 = vmatpush1.bf16.msra.mxu0 %v691_v51 }
 0x181   :  { %v751_v53 = vpop.permute.xlu1 %750 }
 0x182   :  { %v681_v55 = vpop.permute.xlu0 %680 }
 0x183   :  { %1149 = vrot.lane.b32.xlu1 %v1128_v59, %s3236_s25  ;;  %v694_v63 = vsel %vm690_vm5, %v681_v55, %v683_v26 }
 0x184   :  { %1078 = vrot.lane.b32.xlu0 %v1056_v61, %s3237_s26  ;;  %1865 = vmatprep.subr.bf16.mxu0 %v694_v63 }
 0x185   :  { %v689_v4 = vpop.permute.xlu1 %688 }
 0x186   :  { %v753_v2 = vpop.permute.xlu0 %752 }
 0x187   :  { %1086 = vrot.lane.b32.xlu1 %v1060_v3, %s3237_s26  ;;  %v765_v9 = vsel %vm576_vm2, %v753_v2, %v755_v49  ;;  %v764_v36 = vsel %vm576_vm2, %v751_v53, %v753_v2 }
 0x188   :  { %1151 = vrot.lane.b32.xlu0 %v1129_v5, %s3236_s25  ;;  %2091 = vmatprep.subr.bf16.mxu1 %v765_v9 }
 0x189   :  { %2092 = vmatpush1.bf16.msra.mxu1 %v764_v36  ;;  %v761_v15 = vpop.permute.xlu1 %760 }
 0x18a   :  { %v679_v38 = vpop.permute.xlu0 %678 }
 0x18b   :  { %1159 = vrot.lane.b32.xlu1 %v1133_v37, %s3236_s25  ;;  %v693_v48 = vsel %vm690_vm5, %v679_v38, %v681_v55  ;;  %v4154_v55 = vld [vmem:[#allocation2 + $0x58] sm:$0xff] }
 0x18c   :  { %1076 = vrot.lane.b32.xlu0 %v1055_v62, %s3237_s26  ;;  %1866 = vmatpush1.bf16.msra.mxu0 %v693_v48 }
 0x18d   :  { %v757_v28 = vpop.permute.xlu1 %756 }
 0x18e   :  { %v687_v14 = vpop.permute.xlu0 %686 }
 0x18f   :  { %1155 = vrot.lane.b32.xlu1 %v1131_v47, %s3236_s25  ;;  %v696_v11 = vsel %vm690_vm5, %v687_v14, %v689_v4  ;;  %v4166_v4 = vld [vmem:[#allocation2 + $0x68] sm:$0xff] }
 0x190   :  { %1084 = vrot.lane.b32.xlu0 %v1059_v1, %s3237_s26  ;;  %1867 = vmatprep.subr.bf16.mxu0 %v696_v11 }
 0x191   :  { %v803_v19 = vpop.permute.xlu1 %802 }
 0x192   :  { %v759_v22 = vpop.permute.xlu0 %758 }
 0x193   :  { %1202 = vrot.lane.b32.xlu1 %v4094_v20, %s3239_s30  ;;  %v767_v16 = vsel %vm576_vm2, %v759_v22, %v761_v15  ;;  %v766_v24 = vsel %vm576_vm2, %v757_v28, %v759_v22  ;;  %vm816_vm2 = vcmask 850944  }
 0x194   :  { %1157 = vrot.lane.b32.xlu0 %v1132_v29, %s3236_s25  ;;  %2093 = vmatprep.subr.bf16.mxu1 %v767_v16 }
 0x195   :  { %2094 = vmatpush1.bf16.msra.mxu1 %v766_v24  ;;  %v858_v7 = vpop.permute.xlu1 %857 }
 0x196   :  { %v685_v31 = vpop.permute.xlu0 %684 }
 0x197   :  { %1257 = vrot.lane.b32.xlu1 %v3991_v39, %s3240_s1  ;;  %v695_v30 = vsel %vm690_vm5, %v685_v31, %v687_v14  ;;  %vm944_vm5 = vcmask 842752  }
 0x198   :  { %1082 = vrot.lane.b32.xlu0 %v1058_v27, %s3237_s26  ;;  %1868 = vmatpush1.bf16.msra.mxu0 %v695_v30  ;;  %v3009_v30 = vld [vmem:[%s4967_s3] ss:$16 sps:$4 sm:$0xff]  }
 0x199   :  { %v854_v44 = vpop.permute.xlu1 %853 }
 0x19a   :  { %v801_v32 = vpop.permute.xlu0 %800 }
 0x19b   :  { %1253 = vrot.lane.b32.xlu1 %v4094_v20, %s3240_s1  ;;  %v818_v35 = vsel %vm816_vm2, %v801_v32, %v803_v19 }
 0x19c   :  { %1200 = vrot.lane.b32.xlu0 %v4009_v60, %s3239_s30  ;;  %1869 = vmatprep.subr.bf16.mxu0 %v818_v35 }
 0x19d   :  { %v809_v10 = vpop.permute.xlu1 %808 }
 0x19e   :  { %v856_v34 = vpop.permute.xlu0 %855 }
 0x19f   :  { %1208 = vrot.lane.b32.xlu1 %v4047_v25, %s3239_s30  ;;  %v873_v33 = vsel %vm871_vm7, %v856_v34, %v858_v7  ;;  %v872_v21 = vsel %vm871_vm7, %v854_v44, %v856_v34 }
 0x1a0   :  { %1255 = vrot.lane.b32.xlu0 %v4024_v6, %s3240_s1  ;;  %2095 = vmatprep.subr.bf16.mxu1 %v873_v33 }
 0x1a1   :  { %2096 = vmatpush1.bf16.msra.mxu1 %v872_v21  ;;  %v864_v50 = vpop.permute.xlu1 %863 }
 0x1a2   :  { %v799_v13 = vpop.permute.xlu0 %798 }
 0x1a3   :  { %1263 = vrot.lane.b32.xlu1 %v4034_v12, %s3240_s1  ;;  %v817_v18 = vsel %vm816_vm2, %v799_v13, %v801_v32 }
 0x1a4   :  { %1198 = vrot.lane.b32.xlu0 %v4039_v46, %s3239_s30  ;;  %1870 = vmatpush1.bf16.msra.mxu0 %v817_v18  ;;  %v3014_v18 = vld [vmem:[%s4967_s3 + $0x20] ss:$16 sps:$4 sm:$0xff]  }
 0x1a5   :  { %v860_v56 = vpop.permute.xlu1 %859 }
 0x1a6   :  { %v807_v26 = vpop.permute.xlu0 %806 }
 0x1a7   :  { %1259 = vrot.lane.b32.xlu1 %v4047_v25, %s3240_s1  ;;  %v820_v41 = vsel %vm816_vm2, %v807_v26, %v809_v10 }
 0x1a8   :  { %1206 = vrot.lane.b32.xlu0 %v4052_v52, %s3239_s30  ;;  %1871 = vmatprep.subr.bf16.mxu0 %v820_v41  ;;  %v3015_v41 = vld [vmem:[%s4967_s3 + $0x44] ss:$16 sps:$4 sm:$0xff]  }
 0x1a9   :  { %v4134_v40 = vpop.permute.xlu1 %1301 }
 0x1aa   :  { %v862_v43 = vpop.permute.xlu0 %861  ;;  %vm1306_vm8 = vcmp.ne.s16.totalorder %v4134_v40, 0 }
 0x1ab   :  { %1214 = vrot.lane.b32.xlu1 %v4136_v0, %s3239_s30  ;;  %v875_v23 = vsel %vm871_vm7, %v862_v43, %v864_v50  ;;  %v874_v49 = vsel %vm871_vm7, %v860_v56, %v862_v43  ;;  %v1309_v63 = vsel %vm1306_vm8, %v4094_v20, 0  ;;  %v1312_v1 = vsel %vm1306_vm8, %v4047_v25, 0 }
 0x1ac   :  { %1261 = vrot.lane.b32.xlu0 %v4063_v57, %s3240_s1  ;;  %2097 = vmatprep.subr.bf16.mxu1 %v875_v23  ;;  %v1315_v44 = vsel %vm1306_vm8, %v4136_v0, 0 }
 0x1ad   :  { %2098 = vmatpush1.bf16.msra.mxu1 %v874_v49  ;;  %v4144_v42 = vpop.permute.xlu1 %1372 }
 0x1ae   :  { %v805_v45 = vpop.permute.xlu0 %804  ;;  %vm1377_vm12 = vcmp.ne.s16.totalorder %v4144_v42, 0 }
 0x1af   :  { %1269 = vrot.lane.b32.xlu1 %v4072_v58, %s3240_s1  ;;  %v819_v54 = vsel %vm816_vm2, %v805_v45, %v807_v26  ;;  %v1380_v9 = vsel %vm1377_vm12, %v3991_v39, 0  ;;  %v1386_v33 = vsel %vm1377_vm12, %v4072_v58, 0  ;;  %v3017_v45 = vld [vmem:[%s4967_s3 + $0x40] ss:$16 sps:$4 sm:$0xff]  }
 0x1b0   :  { %1204 = vrot.lane.b32.xlu0 %v4077_v8, %s3239_s30  ;;  %1872 = vmatpush1.bf16.msra.mxu0 %v819_v54 }
 0x1b1   :  { %v815_v51 = vpop.permute.xlu1 %814 }
 0x1b2   :  { %v4151_v53 = vpop.permute.xlu0 %1299 }
 0x1b3   :  { %1265 = vrot.lane.b32.xlu1 %v4136_v0, %s3240_s1  ;;  %v4174_v2 = vsel %vm1161_vm11, %v4151_v53, %v4134_v40  ;;  %vm1304_vm4 = vcmp.ne.s16.totalorder %v4151_v53, 0 }
 0x1b4   :  { %1212 = vrot.lane.b32.xlu0 %v4154_v55, %s3239_s30  ;;  %vm1305_vm1 = vcmp.ne.s16.totalorder %v4174_v2, 0  ;;  %v1310_v21 = vsel %vm1304_vm4, %v4077_v8, 0  ;;  %v1313_v54 = vsel %vm1304_vm4, %v4104_v17, 0  ;;  %v3020_v2 = vld [vmem:[%s4967_s3 + $0x60] ss:$16 sps:$4 sm:$0xff]  }
 0x1b5   :  { %v870_v59 = vpop.permute.xlu1 %869  ;;  %v1308_v62 = vsel %vm1305_vm1, %v4009_v60, 0  ;;  %v1314_v8 = vsel %vm1305_vm1, %v4154_v55, 0  ;;  %v3018_v55 = vld [vmem:[%s4967_s3 + $0x64] ss:$16 sps:$4 sm:$0xff]  }
 0x1b6   :  { %v4160_v61 = vpop.permute.xlu0 %1370 }
 0x1b7   :  { %1329 = vrot.lane.b32.xlu1 %v1309_v63, %s3232_s21  ;;  %vm1375_vm13 = vcmp.ne.s16.totalorder %v4160_v61, 0  ;;  %v4188_v15 = vsel %vm1088_vm15, %v4160_v61, %v4144_v42 }
 0x1b8   :  { %1267 = vrot.lane.b32.xlu0 %v4166_v4, %s3240_s1  ;;  %v1378_v39 = vsel %vm1375_vm13, %v4094_v20, 0  ;;  %vm1376_vm9 = vcmp.ne.s16.totalorder %v4188_v15, 0  ;;  %v1383_v20 = vsel %vm1377_vm12, %v4034_v12, 0  ;;  %v1381_v7 = vsel %vm1375_vm13, %v4047_v25, 0 }
 0x1b9   :  { %v866_v3 = vpop.permute.xlu1 %865  ;;  %v1379_v60 = vsel %vm1376_vm9, %v4024_v6, 0  ;;  %v1307_v6 = vsel %vm1304_vm4, %v4039_v46, 0  ;;  %v1311_v12 = vsel %vm1305_vm1, %v4052_v52, 0  ;;  %v3012_v52 = vld [vmem:[%s4967_s3 + $0x24] ss:$16 sps:$4 sm:$0xff]   ;;  %v1382_v32 = vsel %vm1376_vm9, %v4063_v57, 0 }
 0x1ba   :  { %v813_v5 = vpop.permute.xlu0 %812  ;;  %v1384_v58 = vsel %vm1375_vm13, %v4136_v0, 0  ;;  %v1385_v23 = vsel %vm1376_vm9, %v4166_v4, 0 }
 0x1bb   :  { %1400 = vrot.lane.b32.xlu1 %v1380_v9, %s3231_s13  ;;  %v822_v36 = vsel %vm816_vm2, %v813_v5, %v815_v51 }
 0x1bc   :  { %1210 = vrot.lane.b32.xlu0 %v4104_v17, %s3239_s30  ;;  %1873 = vmatprep.subr.bf16.mxu0 %v822_v36 }
 0x1bd   :  { %v931_v38 = vpop.permute.xlu1 %930 }
 0x1be   :  { %v868_v37 = vpop.permute.xlu0 %867 }
 0x1bf   :  { %1396 = vrot.lane.b32.xlu1 %v1378_v39, %s3231_s13  ;;  %v877_v48 = vsel %vm871_vm7, %v868_v37, %v870_v59  ;;  %v876_v28 = vsel %vm871_vm7, %v866_v3, %v868_v37  ;;  %v3023_v39 = vld [vmem:[%s4967_s3 + $0x80] ss:$16 sps:$4 sm:$0xff]  }
 0x1c0   :  { %1327 = vrot.lane.b32.xlu0 %v1308_v62, %s3232_s21  ;;  %2099 = vmatprep.subr.bf16.mxu1 %v877_v48 }
 0x1c1   :  { %2100 = vmatpush1.bf16.msra.mxu1 %v876_v28  ;;  %v1003_v14 = vpop.permute.xlu1 %1002  ;;  %v3024_v28 = vld [vmem:[%s4967_s3 + $0xa4] ss:$16 sps:$4 sm:$0xff]  }
 0x1c2   :  { %v811_v47 = vpop.permute.xlu0 %810 }
 0x1c3   :  { %1335 = vrot.lane.b32.xlu1 %v1312_v1, %s3232_s21  ;;  %v821_v11 = vsel %vm816_vm2, %v811_v47, %v813_v5  ;;  %v3021_v5 = vld [vmem:[%s4967_s3 + $0x84] ss:$16 sps:$4 sm:$0xff]  }
 0x1c4   :  { %1398 = vrot.lane.b32.xlu0 %v1379_v60, %s3231_s13  ;;  %1874 = vmatpush1.bf16.msra.mxu0 %v821_v11 }
 0x1c5   :  { %v999_v19 = vpop.permute.xlu1 %998 }
 0x1c6   :  { %v929_v22 = vpop.permute.xlu0 %928 }
 0x1c7   :  { %1406 = vrot.lane.b32.xlu1 %v1383_v20, %s3231_s13  ;;  %v946_v29 = vsel %vm944_vm5, %v929_v22, %v931_v38  ;;  %v3027_v20 = vld [vmem:[%s4967_s3 + $0xc4] ss:$16 sps:$4 sm:$0xff]  }
 0x1c8   :  { %1325 = vrot.lane.b32.xlu0 %v1307_v6, %s3232_s21  ;;  %1875 = vmatprep.subr.bf16.mxu0 %v946_v29 }
 0x1c9   :  { %v937_v16 = vpop.permute.xlu1 %936 }
 0x1ca   :  { %v1001_v24 = vpop.permute.xlu0 %1000 }
 0x1cb   :  { %1402 = vrot.lane.b32.xlu1 %v1381_v7, %s3231_s13  ;;  %v1017_v31 = vsel %vm307_vm10, %v1001_v24, %v1003_v14  ;;  %v1016_v46 = vsel %vm307_vm10, %v999_v19, %v1001_v24  ;;  %v3026_v19 = vld [vmem:[%s4967_s3 + $0xa0] ss:$16 sps:$4 sm:$0xff]  }
 0x1cc   :  { %1333 = vrot.lane.b32.xlu0 %v1311_v12, %s3232_s21  ;;  %2101 = vmatprep.subr.bf16.mxu1 %v1017_v31  ;;  %v3029_v31 = vld [vmem:[%s4967_s3 + $0xc0] ss:$16 sps:$4 sm:$0xff]  }
 0x1cd   :  { %2102 = vmatpush1.bf16.msra.mxu1 %v1016_v46  ;;  %v1009_v27 = vpop.permute.xlu1 %1008 }
 0x1ce   :  { %v927_v25 = vpop.permute.xlu0 %926 }
 0x1cf   :  { %1341 = vrot.lane.b32.xlu1 %v1315_v44, %s3232_s21  ;;  %v945_v35 = vsel %vm944_vm5, %v927_v25, %v929_v22 }
 0x1d0   :  { %1404 = vrot.lane.b32.xlu0 %v1382_v32, %s3231_s13  ;;  %1876 = vmatpush1.bf16.msra.mxu0 %v945_v35  ;;  %v3032_v35 = vld [vmem:[%s4967_s3 + $0xe0] ss:$16 sps:$4 sm:$0xff]  }
 0x1d1   :  { %v1005_v10 = vpop.permute.xlu1 %1004  ;;  %2104 = vmatmul.mubr.bf16.vlgmr.msra.gmra.mrb[0].mxu1 %v3009_v30 }
 0x1d2   :  { %v935_v34 = vpop.permute.xlu0 %934  ;;  %2113 = vmatprep.mubr.bf16.mxu1 %v3012_v52 }
 0x1d3   :  { %1412 = vrot.lane.b32.xlu1 %v1386_v33, %s3231_s13  ;;  %v948_v57 = vsel %vm944_vm5, %v935_v34, %v937_v16  ;;  %1878 = vmatmul.mubr.bf16.vlgmr.msra.gmra.mrb[0].mxu0 %v3009_v30  ;;  %v3035_v33 = vld [vmem:[%s4967_s3 + $0xc] ss:$16 sps:$4 sm:$0xff]  }
 0x1d4   :  { %1331 = vrot.lane.b32.xlu0 %v1310_v21, %s3232_s21  ;;  %1958 = vmatprep.subr.bf16.mxu0 %v948_v57 }
 0x1d5   :  { %v943_v50 = vpop.permute.xlu1 %942  ;;  %1887 = vmatprep.mubr.bf16.mxu0 %v3012_v52 }
 0x1d6   :  { %v1007_v13 = vpop.permute.xlu0 %1006 }
 0x1d7   :  { %v1018_v56 = vsel %vm307_vm10, %v1005_v10, %v1007_v13  ;;  %1408 = vrot.lane.b32.xlu1 %v1384_v58, %s3231_s13  ;;  %v1019_v26 = vsel %vm307_vm10, %v1007_v13, %v1009_v27  ;;  %v3030_v27 = vld [vmem:[%s4967_s3 + $0xe4] ss:$16 sps:$4 sm:$0xff]  }
 0x1d8   :  { %1339 = vrot.lane.b32.xlu0 %v1314_v8, %s3232_s21  ;;  %2184 = vmatprep.subr.bf16.mxu1 %v1019_v26  ;;  %v1573_v8 = vld [vmem:[%s4968_s4 + $0x8] sm:$0xff] }
 0x1d9   :  { %2185 = vmatpush1.bf16.msra.mxu1 %v1018_v56  ;;  %v1015_v40 = vpop.permute.xlu1 %1014  ;;  %v1572_v56 = vld [vmem:[%s4968_s4] sm:$0xff] }
 0x1da   :  { %v933_v43 = vpop.permute.xlu0 %932  ;;  %2114 = vmatmul.mubr.bf16.gmra.mrb[4].mxu1 %v3014_v18 }
 0x1db   :  { %v947_v0 = vsel %vm944_vm5, %v933_v43, %v935_v34  ;;  %1888 = vmatmul.mubr.bf16.gmra.mrb[4].mxu0 %v3014_v18  ;;  %2123 = vmatprep.mubr.bf16.mxu1 %v3015_v41 }
 0x1dc   :  { %1410 = vrot.lane.b32.xlu0 %v1385_v23, %s3231_s13  ;;  %1959 = vmatpush1.bf16.msra.mxu0 %v947_v0  ;;  %v1575_v23 = vld [vmem:[%s4968_s4 + $0x18] sm:$0xff] }
 0x1dd   :  { %v1011_v49 = vpop.permute.xlu1 %1010  ;;  %1897 = vmatprep.mubr.bf16.mxu0 %v3015_v41  ;;  %1595 = vperm.xlu1 %3006, %v1573_v8  }
 0x1de   :  { %v941_v42 = vpop.permute.xlu0 %940 }
 0x1df   :  { %v950_v51 = vsel %vm944_vm5, %v941_v42, %v943_v50 }
 0x1e0   :  { %1337 = vrot.lane.b32.xlu0 %v1313_v54, %s3232_s21  ;;  %1960 = vmatprep.subr.bf16.mxu0 %v950_v51  ;;  %v1577_v51 = vld [vmem:[%s4968_s4 + $0x28] sm:$0xff] }
 0x1e1   :  { %v1075_v59 = vpop.permute.xlu1 %1074 }
 0x1e2   :  { %v1013_v61 = vpop.permute.xlu0 %1012  ;;  %2124 = vmatmul.mubr.bf16.gmra.mrb[8].mxu1 %v3017_v45 }
 0x1e3   :  { %v1020_v63 = vsel %vm307_vm10, %v1011_v49, %v1013_v61  ;;  %v1021_v4 = vsel %vm307_vm10, %v1013_v61, %v1015_v40  ;;  %1898 = vmatmul.mubr.bf16.gmra.mrb[8].mxu0 %v3017_v45  ;;  %2133 = vmatprep.mubr.bf16.mxu1 %v3018_v55  ;;  %vm1820_vm10 = vcmask 392192   ;;  %v1574_v40 = vld [vmem:[%s4968_s4 + $0x10] sm:$0xff]  ;;  %v1576_v45 = vld [vmem:[%s4968_s4 + $0x20] sm:$0xff] }
 0x1e4   :  { %2186 = vmatprep.subr.bf16.mxu1 %v1021_v4  ;;  %1907 = vmatprep.mubr.bf16.mxu0 %v3018_v55  ;;  %v1578_v61 = vld [vmem:[%s4968_s4 + $0x30] sm:$0xff]  ;;  %v1579_v4 = vld [vmem:[%s4968_s4 + $0x38] sm:$0xff] }
 0x1e5   :  { %2187 = vmatpush1.bf16.msra.mxu1 %v1020_v63  ;;  %v1148_v17 = vpop.permute.xlu1 %1147  ;;  %1590 = vperm.xlu0 %3005, %v1572_v56  }
 0x1e6   :  { %v939_v53 = vpop.permute.xlu0 %938  ;;  %1600 = vperm.xlu1 %3006, %v1574_v40  }
 0x1e7   :  { %v949_v3 = vsel %vm944_vm5, %v939_v53, %v941_v42 }
 0x1e8   :  { %1961 = vmatpush1.bf16.msra.mxu0 %v949_v3 }
 0x1e9   :  { %v1144_v9 = vpop.permute.xlu1 %1143  ;;  %1605 = vperm.xlu0 %3005, %v1575_v23  }
 0x1ea   :  { %v1073_v36 = vpop.permute.xlu0 %1072  ;;  %2134 = vmatmul.mubr.bf16.gmra.mrb[12].mxu1 %v3020_v2  ;;  %1610 = vperm.xlu1 %3006, %v1576_v45   ;;  %v3039_v45 = vld [vmem:[%s4967_s3 + $0x4c] ss:$16 sps:$4 sm:$0xff]  }
 0x1eb   :  { %v1090_v15 = vsel %vm1088_vm15, %v1073_v36, %v1075_v59  ;;  %1908 = vmatmul.mubr.bf16.gmra.mrb[12].mxu0 %v3020_v2  ;;  %2143 = vmatprep.mubr.bf16.mxu1 %v3021_v5  ;;  %v1584_v2 = vld [vmem:[%s4968_s4 + $0x60] sm:$0xff] }
 0x1ec   :  { %1962 = vmatprep.subr.bf16.mxu0 %v1090_v15  ;;  %1917 = vmatprep.mubr.bf16.mxu0 %v3021_v5 }
 0x1ed   :  { %v1081_v38 = vpop.permute.xlu1 %1080  ;;  %1615 = vperm.xlu0 %3005, %v1577_v51   ;;  %v3042_v51 = vld [vmem:[%s4967_s3 + $0x6c] ss:$16 sps:$4 sm:$0xff]  }
 0x1ee   :  { %v1146_v37 = vpop.permute.xlu0 %1145  ;;  %1620 = vperm.xlu1 %3006, %v1578_v61   ;;  %v3047_v61 = vld [vmem:[%s4967_s3 + $0x88] ss:$16 sps:$4 sm:$0xff]  }
 0x1ef   :  { %v1162_v62 = vsel %vm1161_vm11, %v1144_v9, %v1146_v37  ;;  %v1163_v48 = vsel %vm1161_vm11, %v1146_v37, %v1148_v17  ;;  %v1585_v9 = vld [vmem:[%s4968_s4 + $0x68] sm:$0xff] }
 0x1f0   :  { %2188 = vmatprep.subr.bf16.mxu1 %v1163_v48 }
 0x1f1   :  { %2189 = vmatpush1.bf16.msra.mxu1 %v1162_v62  ;;  %v1154_v14 = vpop.permute.xlu1 %1153  ;;  %1625 = vperm.xlu0 %3005, %v1579_v4   ;;  %v3050_v4 = vld [vmem:[%s4967_s3 + $0xa8] ss:$16 sps:$4 sm:$0xff]  }
 0x1f2   :  { %v1071_v47 = vpop.permute.xlu0 %1070  ;;  %2144 = vmatmul.mubr.bf16.gmra.mrb[16].mxu1 %v3023_v39  ;;  %1650 = vperm.xlu1 %3006, %v1584_v2   ;;  %v3054_v2 = vld [vmem:[%s4967_s3 + $0xec] ss:$16 sps:$4 sm:$0xff]  }
 0x1f3   :  { %v1089_v1 = vsel %vm1088_vm15, %v1071_v47, %v1073_v36  ;;  %1918 = vmatmul.mubr.bf16.gmra.mrb[16].mxu0 %v3023_v39  ;;  %2153 = vmatprep.mubr.bf16.mxu1 %v3024_v28  ;;  %v1587_v39 = vld [vmem:[%s4968_s4 + $0x78] sm:$0xff]  ;;  %v1581_v47 = vld [vmem:[%s4968_s4 + $0x48] sm:$0xff] }
 0x1f4   :  { %1963 = vmatpush1.bf16.msra.mxu0 %v1089_v1  ;;  %1927 = vmatprep.mubr.bf16.mxu0 %v3024_v28  ;;  %v1580_v28 = vld [vmem:[%s4968_s4 + $0x40] sm:$0xff] }
 0x1f5   :  { %v1150_v60 = vpop.permute.xlu1 %1149  ;;  %1655 = vperm.xlu0 %3005, %v1585_v9  }
 0x1f6   :  { %v1079_v11 = vpop.permute.xlu0 %1078 }
 0x1f7   :  { %v1092_v22 = vsel %vm1088_vm15, %v1079_v11, %v1081_v38  ;;  %v1586_v38 = vld [vmem:[%s4968_s4 + $0x70] sm:$0xff] }
 0x1f8   :  { %1964 = vmatprep.subr.bf16.mxu0 %v1092_v22  ;;  %1660 = vperm.xlu1 %3006, %v1586_v38  }
 0x1f9   :  { %v1087_v6 = vpop.permute.xlu1 %1086  ;;  %1665 = vperm.xlu0 %3005, %v1587_v39  }
 0x1fa   :  { %v1152_v29 = vpop.permute.xlu0 %1151  ;;  %2154 = vmatmul.mubr.bf16.gmra.mrb[20].mxu1 %v3026_v19 }
 0x1fb   :  { %v1164_v16 = vsel %vm1161_vm11, %v1150_v60, %v1152_v29  ;;  %v1165_v24 = vsel %vm1161_vm11, %v1152_v29, %v1154_v14  ;;  %1928 = vmatmul.mubr.bf16.gmra.mrb[20].mxu0 %v3026_v19  ;;  %2163 = vmatprep.mubr.bf16.mxu1 %v3027_v20 }
 0x1fc   :  { %2190 = vmatprep.subr.bf16.mxu1 %v1165_v24  ;;  %1937 = vmatprep.mubr.bf16.mxu0 %v3027_v20  ;;  %v1583_v20 = vld [vmem:[%s4968_s4 + $0x58] sm:$0xff] }
 0x1fd   :  { %2191 = vmatpush1.bf16.msra.mxu1 %v1164_v16  ;;  %v1160_v7 = vpop.permute.xlu1 %1159  ;;  %1630 = vperm.xlu1 %3006, %v1580_v28  }
 0x1fe   :  { %v1077_v12 = vpop.permute.xlu0 %1076  ;;  %1635 = vperm.xlu0 %3005, %v1581_v47  }
 0x1ff   :  { %v1091_v46 = vsel %vm1088_vm15, %v1077_v12, %v1079_v11  ;;  %v1582_v11 = vld [vmem:[%s4968_s4 + $0x50] sm:$0xff] }
 0x200   :  { %1965 = vmatpush1.bf16.msra.mxu0 %v1091_v46 }
 0x201   :  { %v1156_v30 = vpop.permute.xlu1 %1155  ;;  %1640 = vperm.xlu1 %3006, %v1582_v11  }
 0x202   :  { %v1085_v25 = vpop.permute.xlu0 %1084  ;;  %2164 = vmatmul.mubr.bf16.gmra.mrb[24].mxu1 %v3029_v31  ;;  %1645 = vperm.xlu0 %3005, %v1583_v20  }
 0x203   :  { %v1094_v44 = vsel %vm1088_vm15, %v1085_v25, %v1087_v6  ;;  %1938 = vmatmul.mubr.bf16.gmra.mrb[24].mxu0 %v3029_v31  ;;  %2173 = vmatprep.mubr.bf16.mxu1 %v3030_v27 }
 0x204   :  { %1966 = vmatprep.subr.bf16.mxu0 %v1094_v44  ;;  %1947 = vmatprep.mubr.bf16.mxu0 %v3030_v27 }
 0x205   :  { %v1203_v52 = vpop.permute.xlu1 %1202 }
 0x206   :  { %v1158_v32 = vpop.permute.xlu0 %1157 }
 0x207   :  { %v1166_v10 = vsel %vm1161_vm11, %v1156_v30, %v1158_v32  ;;  %v1167_v34 = vsel %vm1161_vm11, %v1158_v32, %v1160_v7 }
 0x208   :  { %2192 = vmatprep.subr.bf16.mxu1 %v1167_v34 }
 0x209   :  { %2193 = vmatpush1.bf16.msra.mxu1 %v1166_v10  ;;  %v1258_v21 = vpop.permute.xlu1 %1257 }
 0x20a   :  { %v1083_v57 = vpop.permute.xlu0 %1082  ;;  %2174 = vmatmul.mubr.bf16.gmra.mrb[28].mxu1 %v3032_v35 }
 0x20b   :  { %v1093_v50 = vsel %vm1088_vm15, %v1083_v57, %v1085_v25  ;;  %1948 = vmatmul.mubr.bf16.gmra.mrb[28].mxu0 %v3032_v35  ;;  %2821 = vmatprep.mubr.msk.bf16.mxu1 %vm1820_vm10, %v3035_v33 }
 0x20c   :  { %1967 = vmatpush1.bf16.msra.mxu0 %v1093_v50  ;;  %2813 = vmatprep.mubr.msk.bf16.mxu0 %vm1820_vm10, %v3035_v33 }
 0x20d   :  { %v1254_v13 = vpop.permute.xlu1 %1253 }
 0x20e   :  { %v1201_v58 = vpop.permute.xlu0 %1200 }
 0x20f   :  { %v1218_v18 = vsel %vm1216_vm0, %v1201_v58, %v1203_v52 }
 0x210   :  { %1968 = vmatprep.subr.bf16.mxu0 %v1218_v18 }
 0x211   :  { %v1209_v26 = vpop.permute.xlu1 %1208 }
 0x212   :  { %v1256_v41 = vpop.permute.xlu0 %1255 }
 0x213   :  { %v1272_v43 = vsel %vm1271_vm6, %v1254_v13, %v1256_v41  ;;  %v1273_v0 = vsel %vm1271_vm6, %v1256_v41, %v1258_v21 }
 0x214   :  { %2194 = vmatprep.subr.bf16.mxu1 %v1273_v0  ;;  %v3036_v0 = vld [vmem:[%s4967_s3 + $0x2c] ss:$16 sps:$4 sm:$0xff]  }
 0x215   :  { %2195 = vmatpush1.bf16.msra.mxu1 %v1272_v43  ;;  %v1264_v49 = vpop.permute.xlu1 %1263  ;;  %v3033_v43 = vld [vmem:[%s4967_s3 + $0x8] ss:$16 sps:$4 sm:$0xff]  }
 0x216   :  { %v1199_v42 = vpop.permute.xlu0 %1198 }
 0x217   :  { %v1217_v54 = vsel %vm1216_vm0, %v1199_v42, %v1201_v58  ;;  %v3038_v42 = vld [vmem:[%s4967_s3 + $0x28] ss:$16 sps:$4 sm:$0xff]  }
 0x218   :  { %1969 = vmatpush1.bf16.msra.mxu0 %v1217_v54  ;;  %v3041_v54 = vld [vmem:[%s4967_s3 + $0x48] ss:$16 sps:$4 sm:$0xff]  }
 0x219   :  { %v1260_v55 = vpop.permute.xlu1 %1259 }
 0x21a   :  { %v1207_v59 = vpop.permute.xlu0 %1206 }
 0x21b   :  { %v1220_v63 = vsel %vm1216_vm0, %v1207_v59, %v1209_v26 }
 0x21c   :  { %1970 = vmatprep.subr.bf16.mxu0 %v1220_v63  ;;  %v3048_v63 = vld [vmem:[%s4967_s3 + $0xac] ss:$16 sps:$4 sm:$0xff]  }
 0x21d   :  { %v1215_v17 = vpop.permute.xlu1 %1214 }
 0x21e   :  { %v1262_v53 = vpop.permute.xlu0 %1261 }
 0x21f   :  { %v1274_v3 = vsel %vm1271_vm6, %v1260_v55, %v1262_v53  ;;  %v1275_v5 = vsel %vm1271_vm6, %v1262_v53, %v1264_v49  ;;  %v3044_v55 = vld [vmem:[%s4967_s3 + $0x68] ss:$16 sps:$4 sm:$0xff]  }
 0x220   :  { %2196 = vmatprep.subr.bf16.mxu1 %v1275_v5  ;;  %v3053_v53 = vld [vmem:[%s4967_s3 + $0xc8] ss:$16 sps:$4 sm:$0xff]  }
 0x221   :  { %2197 = vmatpush1.bf16.msra.mxu1 %v1274_v3  ;;  %v1270_v36 = vpop.permute.xlu1 %1269  ;;  %v3056_v3 = vld [vmem:[%s4967_s3 + $0xe8] ss:$16 sps:$4 sm:$0xff]  }
 0x222   :  { %v1205_v15 = vpop.permute.xlu0 %1204 }
 0x223   :  { %v1219_v37 = vsel %vm1216_vm0, %v1205_v15, %v1207_v59  ;;  %v3045_v59 = vld [vmem:[%s4967_s3 + $0x8c] ss:$16 sps:$4 sm:$0xff]  }
 0x224   :  { %1971 = vmatpush1.bf16.msra.mxu0 %v1219_v37 }
 0x225   :  { %v1266_v62 = vpop.permute.xlu1 %1265 }
 0x226   :  { %v1213_v48 = vpop.permute.xlu0 %1212 }
 0x227   :  { %v1222_v14 = vsel %vm1216_vm0, %v1213_v48, %v1215_v17  ;;  %v3051_v17 = vld [vmem:[%s4967_s3 + $0xcc] ss:$16 sps:$4 sm:$0xff]  }
 0x228   :  { %1972 = vmatprep.subr.bf16.mxu0 %v1222_v14 }
 0x229   :  { %v1330_v1 = vpop.permute.xlu1 %1329 }
 0x22a   :  { %v1268_v60 = vpop.permute.xlu0 %1267 }
 0x22b   :  { %v1276_v19 = vsel %vm1271_vm6, %v1266_v62, %v1268_v60  ;;  %v1277_v22 = vsel %vm1271_vm6, %v1268_v60, %v1270_v36 }
 0x22c   :  { %2198 = vmatprep.subr.bf16.mxu1 %v1277_v22 }
 0x22d   :  { %2199 = vmatpush1.bf16.msra.mxu1 %v1276_v19  ;;  %v1401_v6 = vpop.permute.xlu1 %1400 }
 0x22e   :  { %v1211_v29 = vpop.permute.xlu0 %1210 }
 0x22f   :  { %v1221_v16 = vsel %vm1216_vm0, %v1211_v29, %v1213_v48 }
 0x230   :  { %1973 = vmatpush1.bf16.msra.mxu0 %v1221_v16 }
 0x231   :  { %v1397_v24 = vpop.permute.xlu1 %1396 }
 0x232   :  { %v1328_v7 = vpop.permute.xlu0 %1327 }
 0x233   :  { %v1344_v12 = vsel %vm1120_vm3, %v1328_v7, %v1330_v1 }
 0x234   :  { %1974 = vmatprep.subr.bf16.mxu0 %v1344_v12 }
 0x235   :  { %v1336_v31 = vpop.permute.xlu1 %1335 }
 0x236   :  { %v1399_v46 = vpop.permute.xlu0 %1398 }
 0x237   :  { %v1414_v27 = vsel %vm1047_vm14, %v1397_v24, %v1399_v46  ;;  %v1415_v30 = vsel %vm1047_vm14, %v1399_v46, %v1401_v6 }
 0x238   :  { %2200 = vmatprep.subr.bf16.mxu1 %v1415_v30 }
 0x239   :  { %2201 = vmatpush1.bf16.msra.mxu1 %v1414_v27  ;;  %v1407_v25 = vpop.permute.xlu1 %1406 }
 0x23a   :  { %v1326_v44 = vpop.permute.xlu0 %1325 }
 0x23b   :  { %v1343_v52 = vsel %vm1120_vm3, %v1326_v44, %v1328_v7 }
 0x23c   :  { %1975 = vmatpush1.bf16.msra.mxu0 %v1343_v52 }
 0x23d   :  { %v1403_v32 = vpop.permute.xlu1 %1402 }
 0x23e   :  { %v1334_v35 = vpop.permute.xlu0 %1333 }
 0x23f   :  { %v1346_v10 = vsel %vm1120_vm3, %v1334_v35, %v1336_v31 }
 0x240   :  { %1976 = vmatprep.subr.bf16.mxu0 %v1346_v10 }
 0x241   :  { %v1342_v33 = vpop.permute.xlu1 %1341 }
 0x242   :  { %v1405_v34 = vpop.permute.xlu0 %1404 }
 0x243   :  { %v1416_v21 = vsel %vm1047_vm14, %v1403_v32, %v1405_v34  ;;  %v1417_v57 = vsel %vm1047_vm14, %v1405_v34, %v1407_v25 }
 0x244   :  { %2202 = vmatprep.subr.bf16.mxu1 %v1417_v57 }
 0x245   :  { %2203 = vmatpush1.bf16.msra.mxu1 %v1416_v21  ;;  %v1413_v58 = vpop.permute.xlu1 %1412 }
 0x246   :  { %v1332_v50 = vpop.permute.xlu0 %1331 }
 0x247   :  { %v1345_v13 = vsel %vm1120_vm3, %v1332_v50, %v1334_v35 }
 0x248   :  { %1977 = vmatpush1.bf16.msra.mxu0 %v1345_v13 }
 0x249   :  { %v1409_v8 = vpop.permute.xlu1 %1408 }
 0x24a   :  { %v1340_v18 = vpop.permute.xlu0 %1339 }
 0x24b   :  { %v1348_v56 = vsel %vm1120_vm3, %v1340_v18, %v1342_v33 }
 0x24c   :  { %1978 = vmatprep.subr.bf16.mxu0 %v1348_v56 }
 0x24e   :  { %v1411_v26 = vpop.permute.xlu0 %1410 }
 0x24f   :  { %v1418_v41 = vsel %vm1047_vm14, %v1409_v8, %v1411_v26  ;;  %v1419_v40 = vsel %vm1047_vm14, %v1411_v26, %v1413_v58 }
 0x250   :  { %2204 = vmatprep.subr.bf16.mxu1 %v1419_v40 }
 0x251   :  { %2205 = vmatpush1.bf16.msra.mxu1 %v1418_v41 }
 0x252   :  { %v1338_v23 = vpop.permute.xlu0 %1337 }
 0x253   :  { %v1347_v49 = vsel %vm1120_vm3, %v1338_v23, %v1340_v18 }
 0x254   :  { %1979 = vmatpush1.bf16.msra.mxu0 %v1347_v49  ;;  %2217 = vmatmul.mubr.bf16.vlgmr.msra.gmra.mrb[0].mxu1 %v3033_v43 }
 0x255   :  { %2822 = vmatprep.mubr.msk.bf16.mxu1 %vm1820_vm10, %v3036_v0 }
 0x257   :  { %1991 = vmatmul.mubr.bf16.vlgmr.msra.gmra.mrb[0].mxu0 %v3033_v43 }
 0x258   :  { %2814 = vmatprep.mubr.msk.bf16.mxu0 %vm1820_vm10, %v3036_v0 }
 0x25c   :  { %2227 = vmatmul.mubr.bf16.gmra.mrb[4].mxu1 %v3038_v42  ;;  %v1596_v48 = vpop.permute.xlu1 %1595 }
 0x25d   :  { %2823 = vmatprep.mubr.msk.bf16.mxu1 %vm1820_vm10, %v3039_v45 }
 0x25f   :  { %2001 = vmatmul.mubr.bf16.gmra.mrb[4].mxu0 %v3038_v42 }
 0x260   :  { %2815 = vmatprep.mubr.msk.bf16.mxu0 %vm1820_vm10, %v3039_v45 }
 0x264   :  { %2237 = vmatmul.mubr.bf16.gmra.mrb[8].mxu1 %v3041_v54  ;;  %v1591_v37 = vpop.permute.xlu0 %1590 }
 0x265   :  { %2824 = vmatprep.mubr.msk.bf16.mxu1 %vm1820_vm10, %v3042_v51  ;;  %v1601_v7 = vpop.permute.xlu1 %1600 }
 0x267   :  { %2011 = vmatmul.mubr.bf16.gmra.mrb[8].mxu0 %v3041_v54 }
 0x268   :  { %2816 = vmatprep.mubr.msk.bf16.mxu0 %vm1820_vm10, %v3042_v51  ;;  %v1606_v30 = vpop.permute.xlu0 %1605 }
 0x269   :  { %v4464_v35 = vpop.permute.xlu1 %1610 }
 0x26c   :  { %2247 = vmatmul.mubr.bf16.gmra.mrb[12].mxu1 %v3044_v55  ;;  %v4466_v21 = vpop.permute.xlu0 %1615 }
 0x26d   :  { %2825 = vmatprep.mubr.msk.bf16.mxu1 %vm1820_vm10, %v3045_v59  ;;  %v4470_v23 = vpop.permute.xlu1 %1620 }
 0x26f   :  { %2021 = vmatmul.mubr.bf16.gmra.mrb[12].mxu0 %v3044_v55 }
 0x270   :  { %2817 = vmatprep.mubr.msk.bf16.mxu0 %vm1820_vm10, %v3045_v59  ;;  %v4474_v55 = vpop.permute.xlu0 %1625 }
 0x274   :  { %2257 = vmatmul.mubr.bf16.gmra.mrb[16].mxu1 %v3047_v61 }
 0x275   :  { %2826 = vmatprep.mubr.msk.bf16.mxu1 %vm1820_vm10, %v3048_v63 }
 0x277   :  { %2031 = vmatmul.mubr.bf16.gmra.mrb[16].mxu0 %v3047_v61 }
 0x278   :  { %2818 = vmatprep.mubr.msk.bf16.mxu0 %vm1820_vm10, %v3048_v63 }
 0x27c   :  { %2267 = vmatmul.mubr.bf16.gmra.mrb[20].mxu1 %v3050_v4 }
 0x27d   :  { %2827 = vmatprep.mubr.msk.bf16.mxu1 %vm1820_vm10, %v3051_v17 }
 0x27f   :  { %2041 = vmatmul.mubr.bf16.gmra.mrb[20].mxu0 %v3050_v4 }
 0x280   :  { %2819 = vmatprep.mubr.msk.bf16.mxu0 %vm1820_vm10, %v3051_v17 }
 0x284   :  { %2277 = vmatmul.mubr.bf16.gmra.mrb[24].mxu1 %v3053_v53 }
 0x285   :  { %2828 = vmatprep.mubr.msk.bf16.mxu1 %vm1820_vm10, %v3054_v2 }
 0x287   :  { %2051 = vmatmul.mubr.bf16.gmra.mrb[24].mxu0 %v3053_v53 }
 0x288   :  { %2820 = vmatprep.mubr.msk.bf16.mxu0 %vm1820_vm10, %v3054_v2 }
 0x28c   :  { %2287 = vmatmul.mubr.bf16.gmra.mrb[28].mxu1 %v3056_v3 }
 0x28f   :  { %2061 = vmatmul.mubr.bf16.gmra.mrb[28].mxu0 %v3056_v3 }
 0x327   :  { %v2218_v5 = vpop.f32.mrb[0].mxu1 }
 0x328   :  { %v2220_v9 = vpop.f32.mrb[1].mxu1  ;;  %v2885_v14 = vadd.f32 %v2218_v5, %v1591_v37 }
 0x329   :  { %v2222_v36 = vpop.f32.mrb[2].mxu1  ;;  %v2886_v47 = vadd.f32 %v2220_v9, %v1591_v37 }
 0x32a   :  { %v1992_v15 = vpop.f32.mrb[0].mxu0  ;;  %v2224_v38 = vpop.f32.mrb[3].mxu1  ;;  %v2887_v60 = vadd.f32 %v2222_v36, %v1596_v48  ;;  %v2565_v20 = vmul.f32 0.5, %v2885_v14 }
 0x32b   :  { %v1994_v39 = vpop.f32.mrb[1].mxu0  ;;  %v2853_v19 = vadd.f32 %v1992_v15, %v1591_v37  ;;  %v2668_v16 = vmul.f32 0.5, %v2886_v47  ;;  %v2888_v24 = vadd.f32 %v2224_v38, %v1596_v48 }
 0x32c   :  { %v1996_v62 = vpop.f32.mrb[2].mxu0  ;;  %v2566_v31 = vmul.f32 0.5, %v2887_v60  ;;  %3057 = vtanh.f32 %v2565_v20  ;;  %v2854_v44 = vadd.f32 %v1994_v39, %v1591_v37 }
 0x32d   :  { %v1998_v28 = vpop.f32.mrb[3].mxu0  ;;  %v2365_v27 = vmul.f32 0.5, %v2853_v19  ;;  %3059 = vtanh.f32 %v2668_v16  ;;  %v2669_v52 = vmul.f32 0.5, %v2888_v24  ;;  %v2855_v10 = vadd.f32 %v1996_v62, %v1596_v48 }
 0x32e   :  { %3061 = vtanh.f32 %v2566_v31  ;;  %v2856_v33 = vadd.f32 %v1998_v28, %v1596_v48  ;;  %v2465_v50 = vmul.f32 0.5, %v2854_v44  ;;  %v4487_v28 = vpop.permute.xlu1 %1650 }
 0x32f   :  { %v2228_v1 = vpop.f32.mrb[4].mxu1  ;;  %3063 = vtanh.f32 %v2365_v27  ;;  %v2366_v26 = vmul.f32 0.5, %v2855_v10 }
 0x330   :  { %v2230_v11 = vpop.f32.mrb[5].mxu1  ;;  %v2889_v13 = vadd.f32 %v2228_v1, %v1601_v7  ;;  %3065 = vtanh.f32 %v2669_v52  ;;  %v2466_v43 = vmul.f32 0.5, %v2856_v33 }
 0x331   :  { %v2232_v22 = vpop.f32.mrb[6].mxu1  ;;  %v2890_v56 = vadd.f32 %v2230_v11, %v1601_v7  ;;  %3067 = vtanh.f32 %v2465_v50 }
 0x332   :  { %v2002_v6 = vpop.f32.mrb[4].mxu0  ;;  %v2234_v29 = vpop.f32.mrb[7].mxu1  ;;  %v2891_v41 = vadd.f32 %v2232_v22, %v1606_v30  ;;  %v2567_v42 = vmul.f32 0.5, %v2889_v13  ;;  %3069 = vtanh.f32 %v2366_v26 }
 0x333   :  { %v2004_v12 = vpop.f32.mrb[5].mxu0  ;;  %v2857_v0 = vadd.f32 %v2002_v6, %v1601_v7  ;;  %v2892_v45 = vadd.f32 %v2234_v29, %v1606_v30  ;;  %v2670_v54 = vmul.f32 0.5, %v2890_v56  ;;  %3071 = vtanh.f32 %v2466_v43  ;;  %v4495_v6 = vpop.permute.xlu0 %1655 }
 0x334   :  { %v2006_v46 = vpop.f32.mrb[6].mxu0  ;;  %v2858_v51 = vadd.f32 %v2004_v12, %v1601_v7  ;;  %v2568_v63 = vmul.f32 0.5, %v2891_v41  ;;  %3073 = vtanh.f32 %v2567_v42  ;;  %v4514_v50 = vpop.permute.xlu1 %1660 }
 0x335   :  { %v2008_v25 = vpop.f32.mrb[7].mxu0  ;;  %v2367_v53 = vmul.f32 0.5, %v2857_v0  ;;  %v2859_v2 = vadd.f32 %v2006_v46, %v1606_v30  ;;  %v2671_v9 = vmul.f32 0.5, %v2892_v45  ;;  %3075 = vtanh.f32 %v2670_v54 }
 0x336   :  { %v3058_v61 = vpop.eup %3057  ;;  %v2860_v36 = vadd.f32 %v2008_v25, %v1606_v30  ;;  %v2467_v62 = vmul.f32 0.5, %v2858_v51  ;;  %3077 = vtanh.f32 %v2568_v63 }
 0x337   :  { %v2238_v32 = vpop.f32.mrb[8].mxu1  ;;  %v3060_v17 = vpop.eup %3059  ;;  %v2573_v39 = vmul.f32 0.5, %v3058_v61  ;;  %3079 = vtanh.f32 %v2367_v53  ;;  %v2368_v22 = vmul.f32 0.5, %v2859_v2 }
 0x338   :  { %v2240_v34 = vpop.f32.mrb[9].mxu1  ;;  %v3062_v5 = vpop.eup %3061  ;;  %v2893_v48 = vadd.f32 %v2238_v32, %v4464_v35  ;;  %v2676_v47 = vmul.f32 0.5, %v3060_v17  ;;  %3081 = vtanh.f32 %v2671_v9  ;;  %v2468_v24 = vmul.f32 0.5, %v2860_v36 }
 0x339   :  { %v2242_v57 = vpop.f32.mrb[10].mxu1  ;;  %v3064_v37 = vpop.eup %3063  ;;  %v2894_v1 = vadd.f32 %v2240_v34, %v4464_v35  ;;  %v2574_v19 = vmul.f32 0.5, %v3062_v5  ;;  %v4500_v12 = vadd.f32 0.5, %v2573_v39  ;;  %3083 = vtanh.f32 %v2467_v62 }
 0x33a   :  { %v2012_v58 = vpop.f32.mrb[8].mxu0  ;;  %v2244_v18 = vpop.f32.mrb[11].mxu1  ;;  %v2895_v20 = vadd.f32 %v2242_v57, %v4466_v21  ;;  %v2373_v16 = vmul.f32 0.5, %v3064_v37  ;;  %v2585_v31 = vmul.f32 0.5, %v2893_v48  ;;  %v4505_v25 = vadd.f32 0.5, %v2676_v47 }
 0x33b   :  { %v2014_v8 = vpop.f32.mrb[9].mxu0  ;;  %v3066_v11 = vpop.eup %3065  ;;  %v2861_v7 = vadd.f32 %v2012_v58, %v4464_v35  ;;  %v2896_v46 = vadd.f32 %v2244_v18, %v4466_v21  ;;  %v2688_v52 = vmul.f32 0.5, %v2894_v1  ;;  %v4510_v34 = vadd.f32 0.5, %v2574_v19 }
 0x33c   :  { %v4468_v40 = vpop.f32.mrb[10].mxu0  ;;  %v3068_v30 = vpop.eup %3067  ;;  %v2677_v44 = vmul.f32 0.5, %v3066_v11  ;;  %v2862_v32 = vadd.f32 %v2014_v8, %v4464_v35  ;;  %3085 = vtanh.f32 %v2368_v22  ;;  %v2586_v33 = vmul.f32 0.5, %v2895_v20 }
 0x33d   :  { %v4472_v49 = vpop.f32.mrb[11].mxu0  ;;  %v2863_v57 = vadd.f32 %v4468_v40, %v4466_v21  ;;  %v3070_v58 = vpop.eup %3069  ;;  %v4518_v18 = vadd.f32 0.5, %v2373_v16  ;;  %3087 = vtanh.f32 %v2468_v24  ;;  %v2385_v56 = vmul.f32 0.5, %v2861_v7 }
 0x33e   :  { %v2864_v35 = vadd.f32 %v4472_v49, %v4466_v21  ;;  %v3072_v41 = vpop.eup %3071  ;;  %v2473_v43 = vmul.f32 0.5, %v3068_v30  ;;  %3089 = vtanh.f32 %v2585_v31  ;;  %v2689_v40 = vmul.f32 0.5, %v2896_v46  ;;  %v4528_v42 = vpop.permute.xlu0 %1665 }
 0x33f   :  { %v4476_v59 = vpop.f32.mrb[12].mxu1  ;;  %v3074_v54 = vpop.eup %3073  ;;  %v4532_v51 = vadd.f32 0.5, %v2677_v44  ;;  %3091 = vtanh.f32 %v2688_v52  ;;  %v2485_v21 = vmul.f32 0.5, %v2862_v32  ;;  %v2374_v17 = vmul.f32 0.5, %v3070_v58 }
 0x340   :  { %v4478_v4 = vpop.f32.mrb[13].mxu1  ;;  %v2897_v0 = vadd.f32 %v4476_v59, %v4470_v23  ;;  %v3076_v63 = vpop.eup %3075  ;;  %3093 = vtanh.f32 %v2586_v33  ;;  %v2386_v53 = vmul.f32 0.5, %v2863_v57  ;;  %v2474_v9 = vmul.f32 0.5, %v3072_v41 }
 0x341   :  { %v4480_v3 = vpop.f32.mrb[14].mxu1  ;;  %v2898_v49 = vadd.f32 %v4478_v4, %v4470_v23  ;;  %v3078_v5 = vpop.eup %3077  ;;  %3095 = vtanh.f32 %v2385_v56  ;;  %v2486_v36 = vmul.f32 0.5, %v2864_v35  ;;  %v4544_v4 = vadd.f32 0.5, %v2473_v43 }
 0x342   :  { %v4482_v15 = vpop.f32.mrb[12].mxu0  ;;  %v4484_v38 = vpop.f32.mrb[15].mxu1  ;;  %v2899_v59 = vadd.f32 %v4480_v3, %v4474_v55  ;;  %3097 = vtanh.f32 %v2689_v40  ;;  %v2587_v62 = vmul.f32 0.5, %v2897_v0  ;;  %v2575_v1 = vmul.f32 0.5, %v3074_v54 }
 0x343   :  { %v4489_v14 = vpop.f32.mrb[13].mxu0  ;;  %v2865_v37 = vadd.f32 %v4482_v15, %v4470_v23  ;;  %v3080_v39 = vpop.eup %3079  ;;  %v2900_v48 = vadd.f32 %v4484_v38, %v4474_v55  ;;  %3099 = vtanh.f32 %v2485_v21  ;;  %v2690_v11 = vmul.f32 0.5, %v2898_v49 }
 0x344   :  { %v4492_v60 = vpop.f32.mrb[14].mxu0  ;;  %v3082_v3 = vpop.eup %3081  ;;  %v2866_v19 = vadd.f32 %v4489_v14, %v4470_v23  ;;  %v4554_v16 = vadd.f32 0.5, %v2374_v17  ;;  %3101 = vtanh.f32 %v2386_v53  ;;  %v2588_v24 = vmul.f32 0.5, %v2899_v59 }
 0x345   :  { %v4497_v29 = vpop.f32.mrb[15].mxu0  ;;  %v1631_v22 = vpop.permute.xlu1 %1630  ;;  %v2867_v38 = vadd.f32 %v4492_v60, %v4474_v55  ;;  %v4560_v46 = vadd.f32 0.5, %v2474_v9  ;;  %3103 = vtanh.f32 %v2486_v36  ;;  %v2387_v30 = vmul.f32 0.5, %v2865_v37 }
 0x346   :  { %v3084_v15 = vpop.eup %3083  ;;  %v1636_v7 = vpop.permute.xlu0 %1635  ;;  %v2868_v23 = vadd.f32 %v4497_v29, %v4474_v55  ;;  %v2678_v32 = vmul.f32 0.5, %v3076_v63  ;;  %3105 = vtanh.f32 %v2587_v62  ;;  %v2691_v33 = vmul.f32 0.5, %v2900_v48 }
 0x347   :  { %v4503_v27 = vpop.f32.mrb[16].mxu1  ;;  %v3086_v52 = vpop.eup %3085  ;;  %v4573_v56 = vadd.f32 0.5, %v2575_v1  ;;  %3107 = vtanh.f32 %v2690_v11  ;;  %v2487_v35 = vmul.f32 0.5, %v2866_v19  ;;  %v2576_v43 = vmul.f32 0.5, %v3078_v5 }
 0x348   :  { %v4508_v10 = vpop.f32.mrb[17].mxu1  ;;  %v2901_v60 = vadd.f32 %v4503_v27, %v1631_v22  ;;  %v4571_v58 = vpop.eup %3087  ;;  %3109 = vtanh.f32 %v2588_v24  ;;  %v2388_v40 = vmul.f32 0.5, %v2867_v38  ;;  %v2375_v21 = vmul.f32 0.5, %v3080_v39 }
 0x349   :  { %v4516_v13 = vpop.f32.mrb[18].mxu1  ;;  %4977 = vst [vmem:[#allocation5_spill] sm:$0xff] %v4571_v58  ;;  %v2902_v55 = vadd.f32 %v4508_v10, %v1631_v22  ;;  %v3090_v41 = vpop.eup %3089  ;;  %3111 = vtanh.f32 %v2387_v30  ;;  %v2488_v49 = vmul.f32 0.5, %v2868_v23  ;;  %v2679_v53 = vmul.f32 0.5, %v3082_v3 }
 0x34a   :  { %v4522_v8 = vpop.f32.mrb[16].mxu0  ;;  %v4524_v26 = vpop.f32.mrb[19].mxu1  ;;  %v2903_v0 = vadd.f32 %v4516_v13, %v1636_v7  ;;  %3113 = vtanh.f32 %v2691_v33  ;;  %v2605_v10 = vmul.f32 0.5, %v2901_v60  ;;  %v2475_v36 = vmul.f32 0.5, %v3084_v15 }
 0x34b   :  { %v4530_v45 = vpop.f32.mrb[17].mxu0  ;;  %v3092_v27 = vpop.eup %3091  ;;  %v2869_v63 = vadd.f32 %v4522_v8, %v1631_v22  ;;  %v2904_v59 = vadd.f32 %v4524_v26, %v1636_v7  ;;  %3115 = vtanh.f32 %v2487_v35  ;;  %v2708_v13 = vmul.f32 0.5, %v2902_v55 }
 0x34c   :  { %v4536_v61 = vpop.f32.mrb[18].mxu0  ;;  %v3094_v17 = vpop.eup %3093  ;;  %v2870_v37 = vadd.f32 %v4530_v45, %v1631_v22  ;;  %v2376_v48 = vmul.f32 0.5, %v3086_v52  ;;  %3117 = vtanh.f32 %v2388_v40  ;;  %v2606_v8 = vmul.f32 0.5, %v2903_v0 }
 0x34d   :  { %v4540_v2 = vpop.f32.mrb[19].mxu0  ;;  %v3096_v5 = vpop.eup %3095  ;;  %v2871_v3 = vadd.f32 %v4536_v61, %v1636_v7  ;;  %v4593_v19 = vadd.f32 0.5, %v2678_v32  ;;  %3119 = vtanh.f32 %v2488_v49  ;;  %v2405_v15 = vmul.f32 0.5, %v2869_v63 }
 0x34e   :  { %v3098_v39 = vpop.eup %3097  ;;  %v4589_v1 = vpop.permute.xlu1 %1640  ;;  %v2872_v24 = vadd.f32 %v4540_v2, %v1636_v7  ;;  %v4602_v30 = vadd.f32 0.5, %v2576_v43  ;;  %v4604_v61 = vadd.f32 0.5, %v2375_v21  ;;  %3121 = vtanh.f32 %v2605_v10 }
 0x34f   :  { %v4548_v47 = vpop.f32.mrb[20].mxu1  ;;  %v3100_v26 = vpop.eup %3099  ;;  %v2709_v23 = vmul.f32 0.5, %v2904_v59  ;;  %v4610_v33 = vadd.f32 0.5, %v2679_v53  ;;  %v4612_v60 = vadd.f32 0.5, %v2475_v36  ;;  %3123 = vtanh.f32 %v2708_v13 }
 0x350   :  { %v4552_v20 = vpop.f32.mrb[21].mxu1  ;;  %v4600_v38 = vpop.eup %3101  ;;  %4979 = vst [vmem:[#allocation7_spill] sm:$0xff] %v4602_v30  ;;  %4980 = vst [vmem:[#allocation8_spill] sm:$0xff] %v4604_v61  ;;  %v2505_v2 = vmul.f32 0.5, %v2870_v37  ;;  %v4620_v43 = vadd.f32 0.5, %v2376_v48  ;;  %3125 = vtanh.f32 %v2606_v8  ;;  %v2406_v40 = vmul.f32 0.5, %v2871_v3 }
 0x351   :  { %v4558_v31 = vpop.f32.mrb[22].mxu1  ;;  %v4608_v32 = vpop.eup %3103  ;;  %4981 = vst [vmem:[#allocation9_spill] sm:$0xff] %v4610_v33  ;;  %4982 = vst [vmem:[#allocation10_spill] sm:$0xff] %v4612_v60  ;;  %v2905_v0 = vadd.f32 %v4548_v47, %v4589_v1  ;;  %v2593_v63 = vmul.f32 0.5, %v3090_v41  ;;  %3127 = vtanh.f32 %v2405_v15  ;;  %v2506_v53 = vmul.f32 0.5, %v2872_v24 }
 0x352   :  { %v4564_v14 = vpop.f32.mrb[20].mxu0  ;;  %v4566_v44 = vpop.f32.mrb[23].mxu1  ;;  %4984 = vst [vmem:[#allocation12_spill] sm:$0xff] %v4620_v43  ;;  %v2906_v10 = vadd.f32 %v4552_v20, %v4589_v1  ;;  %v2696_v36 = vmul.f32 0.5, %v3092_v27  ;;  %3129 = vtanh.f32 %v2709_v23  ;;  %v2594_v8 = vmul.f32 0.5, %v3094_v17 }
 0x353   :  { %v4569_v57 = vpop.f32.mrb[21].mxu0  ;;  %v4614_v7 = vpop.permute.xlu0 %1645  ;;  %v2607_v13 = vmul.f32 0.5, %v2905_v0  ;;  %3131 = vtanh.f32 %v2505_v2  ;;  %v2873_v3 = vadd.f32 %v4564_v14, %v4589_v1  ;;  %v2393_v27 = vmul.f32 0.5, %v3096_v5 }
 0x354   :  { %v4576_v29 = vpop.f32.mrb[22].mxu0  ;;  %4983 = vst [vmem:[#allocation11_spill] sm:$0xff] %v4614_v7  ;;  %v4618_v55 = vpop.eup %3105  ;;  %v2907_v37 = vadd.f32 %v4558_v31, %v4614_v7  ;;  %v2710_v41 = vmul.f32 0.5, %v2906_v10  ;;  %v2697_v24 = vmul.f32 0.5, %v3098_v39  ;;  %3133 = vtanh.f32 %v2406_v40 }
 0x355   :  { %v4579_v54 = vpop.f32.mrb[23].mxu0  ;;  %v4626_v49 = vpop.eup %3107  ;;  %v2493_v58 = vmul.f32 0.5, %v3100_v26  ;;  %3135 = vtanh.f32 %v2506_v53  ;;  %v2407_v17 = vmul.f32 0.5, %v2873_v3  ;;  %v2908_v2 = vadd.f32 %v4566_v44, %v4614_v7  ;;  %v2829_v44 = vld [vmem:[%s4969_s2 + $0x40] sm:$0xff] }
 0x356   :  { %4978 = vst [vmem:[#allocation6_spill] sm:$0xff] %v4579_v54  ;;  %v4630_v59 = vpop.eup %3109  ;;  %v2608_v23 = vmul.f32 0.5, %v2907_v37  ;;  %v2597_v5 = vadd.f32 0.5, %v2593_v63  ;;  %v2700_v39 = vadd.f32 0.5, %v2696_v36  ;;  %3137 = vtanh.f32 %v2607_v13 }
 0x357   :  { %v4583_v9 = vpop.f32.mrb[24].mxu1  ;;  %v4636_v47 = vpop.eup %3111  ;;  %v2874_v40 = vadd.f32 %v4569_v57, %v4589_v1  ;;  %v2598_v53 = vadd.f32 0.5, %v2594_v8  ;;  %3139 = vtanh.f32 %v2710_v41  ;;  %v2711_v3 = vmul.f32 0.5, %v2908_v2  ;;  %v2841_v57 = vld [vmem:[%s4969_s2 + $0x48] sm:$0xff]  ;;  %v2429_v41 = vld [vmem:[%s4969_s2] sm:$0xff] }
 0x358   :  { %v4586_v62 = vpop.f32.mrb[25].mxu1  ;;  %v4642_v20 = vpop.eup %3113  ;;  %v2875_v60 = vadd.f32 %v4576_v29, %v4614_v7  ;;  %v2397_v1 = vadd.f32 0.5, %v2393_v27  ;;  %v2701_v13 = vadd.f32 0.5, %v2697_v24  ;;  %3141 = vtanh.f32 %v2608_v23  ;;  %v2830_v29 = vld [vmem:[%s4969_s2 + $0x50] sm:$0xff] }
 0x359   :  { %v4591_v11 = vpop.f32.mrb[26].mxu1  ;;  %v4646_v31 = vpop.eup %3115  ;;  %v2497_v2 = vadd.f32 0.5, %v2493_v58  ;;  %3143 = vtanh.f32 %v2407_v17  ;;  %v2909_v27 = vadd.f32 %v4583_v9, %v4487_v28  ;;  %v4688_v23 = vmul.f32 %v2829_v44, %v2597_v5 }
 0x35a   :  { %v4596_v45 = vpop.f32.mrb[24].mxu0  ;;  %v4598_v22 = vpop.f32.mrb[27].mxu1  ;;  %v2408_v54 = vmul.f32 0.5, %v2875_v60  ;;  %v2394_v7 = vmul.f32 0.5, %v4600_v38  ;;  %3145 = vtanh.f32 %v2711_v3  ;;  %v2910_v58 = vadd.f32 %v4586_v62, %v4487_v28 }
 0x35b   :  { %v4606_v52 = vpop.f32.mrb[25].mxu0  ;;  %v4654_v43 = vpop.eup %3117  ;;  %v4701_v9 = vmul.f32 %v2841_v57, %v2700_v39  ;;  %v2494_v17 = vmul.f32 0.5, %v4608_v32  ;;  %v2911_v5 = vadd.f32 %v4591_v11, %v4495_v6  ;;  %v4708_v61 = vmul.f32 %v2830_v29, %v2598_v53 }
 0x35c   :  { %v4616_v35 = vpop.f32.mrb[26].mxu0  ;;  %v4660_v26 = vpop.eup %3119  ;;  %v4710_v30 = vmul.f32 %v2429_v41, %v2397_v1  ;;  %v2877_v62 = vadd.f32 %v4596_v45, %v4487_v28  ;;  %v2912_v11 = vadd.f32 %v4598_v22, %v4495_v6  ;;  %v2595_v53 = vmul.f32 0.5, %v4618_v55 }
 0x35d   :  { %v4624_v21 = vpop.f32.mrb[27].mxu0  ;;  %4985 = vst [vmem:[#allocation13_spill] sm:$0xff] %v4660_v26  ;;  %v4669_v36 = vpop.eup %3121  ;;  %v2507_v26 = vmul.f32 0.5, %v2874_v40  ;;  %v2842_v40 = vld [vmem:[%s4969_s2 + $0x58] sm:$0xff]  ;;  %v2498_v57 = vadd.f32 0.5, %v2494_v17  ;;  %v2698_v1 = vmul.f32 0.5, %v4626_v49  ;;  %v2879_v22 = vadd.f32 %v4616_v35, %v4495_v6 }
 0x35e   :  { %v4676_v8 = vpop.eup %3123  ;;  %v4716_v39 = vmul.f32 %v2842_v40, %v2701_v13  ;;  %v2596_v55 = vmul.f32 0.5, %v4630_v59  ;;  %v2395_v13 = vmul.f32 0.5, %v4636_v47  ;;  %v2699_v29 = vmul.f32 0.5, %v4642_v20  ;;  %v2831_v20 = vld [vmem:[%s4969_s2 + $0x60] sm:$0xff] }
 0x35f   :  { %v4634_v48 = vpop.f32.mrb[28].mxu1  ;;  %v4686_v24 = vpop.eup %3125  ;;  %3147 = vtanh.f32 %v2507_v26  ;;  %v2398_v26 = vadd.f32 0.5, %v2394_v7  ;;  %v2495_v49 = vmul.f32 0.5, %v4646_v31  ;;  %v2599_v59 = vadd.f32 0.5, %v2595_v53 }
 0x360   :  { %v4640_v15 = vpop.f32.mrb[29].mxu1  ;;  %v4699_v60 = vpop.eup %3127  ;;  %3149 = vtanh.f32 %v2408_v54  ;;  %v2878_v54 = vadd.f32 %v4606_v52, %v4487_v28  ;;  %v2880_v28 = vadd.f32 %v4624_v21, %v4495_v6  ;;  %v2913_v35 = vadd.f32 %v4634_v48, %v4514_v50  ;;  %v2530_v21 = vld [vmem:[%s4969_s2 + $0x18] sm:$0xff] }
 0x361   :  { %v4644_v0 = vpop.f32.mrb[30].mxu1  ;;  %v4706_v44 = vpop.eup %3129  ;;  %3151 = vtanh.f32 %v2909_v27  ;;  %v2914_v47 = vadd.f32 %v4640_v15, %v4514_v50  ;;  %v2702_v48 = vadd.f32 0.5, %v2698_v1  ;;  %v2396_v31 = vmul.f32 0.5, %v4654_v43  ;;  %v2843_v15 = vld [vmem:[%s4969_s2 + $0x68] sm:$0xff]  ;;  %v2832_v43 = vld [vmem:[%s4969_s2 + $0x70] sm:$0xff]  ;;  %v2844_v1 = vld [vmem:[%s4969_s2 + $0x78] sm:$0xff] }
 0x362   :  { %v4650_v10 = vpop.f32.mrb[28].mxu0  ;;  %v4652_v14 = vpop.f32.mrb[31].mxu1  ;;  %3153 = vtanh.f32 %v2910_v58  ;;  %v2915_v27 = vadd.f32 %v4644_v0, %v4528_v42  ;;  %v2600_v58 = vadd.f32 0.5, %v2596_v55  ;;  %v2399_v17 = vadd.f32 0.5, %v2395_v13  ;;  %v2431_v0 = vld [vmem:[%s4969_s2 + $0x20] sm:$0xff] }
 0x363   :  { %v4658_v37 = vpop.f32.mrb[29].mxu0  ;;  %v4714_v38 = vpop.eup %3131  ;;  %3155 = vtanh.f32 %v2911_v5  ;;  %v2881_v5 = vadd.f32 %v4650_v10, %v4514_v50  ;;  %v2916_v53 = vadd.f32 %v4652_v14, %v4528_v42  ;;  %v4785_v10 = vmul.f32 %v2831_v20, %v2599_v59  ;;  %v2432_v59 = vld [vmem:[%s4969_s2 + $0x30] sm:$0xff] }
 0x364   :  { %v4667_v63 = vpop.f32.mrb[30].mxu0  ;;  %v4722_v32 = vpop.eup %3133  ;;  %3157 = vtanh.f32 %v2877_v62  ;;  %v2882_v55 = vadd.f32 %v4658_v37, %v4514_v50  ;;  %v4795_v14 = vmul.f32 %v2843_v15, %v2702_v48  ;;  %v2613_v48 = vmul.f32 0.5, %v4669_v36 }
 0x365   :  { %v4674_v33 = vpop.f32.mrb[31].mxu0  ;;  %v4727_v45 = vpop.eup %3135  ;;  %3159 = vtanh.f32 %v2912_v11  ;;  %v2703_v11 = vadd.f32 0.5, %v2699_v29 }
 0x366   :  { %4986 = vst [vmem:[#allocation14_spill] sm:$0xff] %v4674_v33  ;;  %v2529_v33 = vld [vmem:[%s4969_s2 + $0x8] sm:$0xff]  ;;  %v4735_v7 = vpop.eup %3137  ;;  %3161 = vtanh.f32 %v2878_v54 }
 0x367   :  { %v4718_v3 = vmul.f32 %v2529_v33, %v2497_v2  ;;  %v2430_v33 = vld [vmem:[%s4969_s2 + $0x10] sm:$0xff]  ;;  %v4741_v52 = vpop.eup %3139  ;;  %3163 = vtanh.f32 %v2879_v22  ;;  %v2531_v22 = vld [vmem:[%s4969_s2 + $0x28] sm:$0xff]  ;;  %v4807_v37 = vmul.f32 %v2844_v1, %v2703_v11  ;;  %v2413_v11 = vmul.f32 0.5, %v4699_v60 }
 0x368   :  { %v4747_v41 = vpop.eup %3141  ;;  %v4749_v2 = vmul.f32 %v2430_v33, %v2398_v26  ;;  %3165 = vtanh.f32 %v2880_v28  ;;  %v2499_v26 = vadd.f32 0.5, %v2495_v49  ;;  %v4783_v33 = vmul.f32 %v2530_v21, %v2498_v57 }
 0x369   :  { %v4753_v6 = vpop.eup %3143  ;;  %3167 = vtanh.f32 %v2913_v35  ;;  %v2400_v28 = vadd.f32 0.5, %v2396_v31  ;;  %v2883_v57 = vadd.f32 %v4667_v63, %v4528_v42  ;;  %v4799_v49 = vmul.f32 %v2832_v43, %v2600_v58 }
 0x36a   :  { %v4764_v40 = vpop.eup %3145  ;;  %3169 = vtanh.f32 %v2914_v47  ;;  %v4801_v35 = vmul.f32 %v2431_v0, %v2399_v17  ;;  %v4809_v21 = vmul.f32 %v2531_v22, %v2499_v26  ;;  %v2614_v43 = vmul.f32 0.5, %v4686_v24 }
 0x36b   :  { %v4771_v62 = vpop.eup %3147  ;;  %3171 = vtanh.f32 %v2915_v27  ;;  %v4815_v58 = vmul.f32 %v2432_v59, %v2400_v28  ;;  %v2617_v0 = vadd.f32 0.5, %v2613_v48  ;;  %v4989_v59 = vld [vmem:[#allocation11_spill] sm:$0xff] }
 0x36c   :  { %v4781_v54 = vpop.eup %3149  ;;  %3173 = vtanh.f32 %v2881_v5  ;;  %v2618_v1 = vadd.f32 0.5, %v2614_v43  ;;  %v2514_v43 = vmul.f32 0.5, %v4727_v45 }
 0x36d   :  { %v3152_v13 = vpop.eup %3151  ;;  %3175 = vtanh.f32 %v2916_v53 }
 0x36e   :  { %v3154_v29 = vpop.eup %3153  ;;  %v2638_v47 = vmul.f32 %v3152_v13, %v4500_v12  ;;  %3177 = vtanh.f32 %v2882_v55  ;;  %v2717_v55 = vmul.f32 0.5, %v4706_v44 }
 0x36f   :  { %v3156_v50 = vpop.eup %3155  ;;  %v2740_v20 = vmul.f32 %v3154_v29, %v4505_v25  ;;  %3179 = vtanh.f32 %v2883_v57  ;;  %v2716_v25 = vmul.f32 0.5, %v4676_v8  ;;  %v2417_v57 = vadd.f32 0.5, %v2413_v11 }
 0x370   :  { %v3158_v63 = vpop.eup %3157  ;;  %v2642_v31 = vadd.f32 %v2638_v47, %v4688_v23  ;;  %v2639_v27 = vmul.f32 %v3156_v50, %v4510_v34  ;;  %v4990_v47 = vld [vmem:[#allocation6_spill] sm:$0xff] }
 0x371   :  { %v3160_v15 = vpop.eup %3159  ;;  %v2744_v12 = vadd.f32 %v2740_v20, %v4701_v9  ;;  %v2437_v17 = vmul.f32 %v3158_v63, %v4518_v18  ;;  %v2720_v53 = vadd.f32 0.5, %v2716_v25  ;;  %v4865_v50 = vadd.f32 %v4990_v47, %v4989_v59  ;;  %v4991_v20 = vld [vmem:[#allocation9_spill] sm:$0xff] }
 0x372   :  { %v3162_v5 = vpop.eup %3161  ;;  %3181 = vtanh.f32 %v2642_v31  ;;  %2833 = vst [vmem:[%s4970_s6 + $0x40] sm:$0xff] %v2642_v31  ;;  %v2643_v36 = vadd.f32 %v2639_v27, %v4708_v61  ;;  %v2741_v34 = vmul.f32 %v3160_v15, %v4532_v51  ;;  %v2513_v31 = vmul.f32 0.5, %v4714_v38  ;;  %v4992_v27 = vld [vmem:[#allocation10_spill] sm:$0xff]  ;;  %v4993_v38 = vld [vmem:[#allocation12_spill] sm:$0xff] }
 0x373   :  { %v3164_v23 = vpop.eup %3163  ;;  %3183 = vtanh.f32 %v2744_v12  ;;  %2845 = vst [vmem:[%s4970_s6 + $0x48] sm:$0xff] %v2744_v12  ;;  %v2441_v18 = vadd.f32 %v2437_v17, %v4710_v30  ;;  %v2537_v8 = vmul.f32 %v3162_v5, %v4544_v4  ;;  %v2414_v17 = vmul.f32 0.5, %v4722_v32  ;;  %v4994_v32 = vld [vmem:[#allocation14_spill] sm:$0xff] }
 0x374   :  { %v3166_v9 = vpop.eup %3165  ;;  %3185 = vtanh.f32 %v2643_v36  ;;  %2834 = vst [vmem:[%s4970_s6 + $0x50] sm:$0xff] %v2643_v36  ;;  %v2745_v51 = vadd.f32 %v2741_v34, %v4716_v39  ;;  %v2438_v61 = vmul.f32 %v3164_v23, %v4554_v16  ;;  %v2884_v34 = vadd.f32 %v4994_v32, %v4528_v42 }
 0x375   :  { %v3168_v24 = vpop.eup %3167  ;;  %3187 = vtanh.f32 %v2441_v18  ;;  %2453 = vst [vmem:[%s4970_s6] sm:$0xff] %v2441_v18  ;;  %v2541_v4 = vadd.f32 %v2537_v8, %v4718_v3  ;;  %v2538_v30 = vmul.f32 %v3166_v9, %v4560_v46  ;;  %v2721_v9 = vadd.f32 0.5, %v2717_v55 }
 0x376   :  { %v3170_v26 = vpop.eup %3169  ;;  %3189 = vtanh.f32 %v2745_v51  ;;  %2846 = vst [vmem:[%s4970_s6 + $0x58] sm:$0xff] %v2745_v51  ;;  %v2442_v16 = vadd.f32 %v2438_v61, %v4749_v2  ;;  %v2640_v60 = vmul.f32 %v3168_v24, %v4573_v56  ;;  %v4987_v2 = vld [vmem:[#allocation7_spill] sm:$0xff]  ;;  %v2718_v51 = vmul.f32 0.5, %v4741_v52 }
 0x377   :  { %v3172_v39 = vpop.eup %3171  ;;  %3191 = vtanh.f32 %v2541_v4  ;;  %2553 = vst [vmem:[%s4970_s6 + $0x8] sm:$0xff] %v2541_v4  ;;  %v2542_v46 = vadd.f32 %v2538_v30, %v4783_v33  ;;  %v2742_v3 = vmul.f32 %v3170_v26, %v4593_v19  ;;  %v4988_v33 = vld [vmem:[#allocation8_spill] sm:$0xff]  ;;  %v2418_v61 = vadd.f32 0.5, %v2414_v17 }
 0x378   :  { %v3174_v22 = vpop.eup %3173  ;;  %3193 = vtanh.f32 %v2442_v16  ;;  %2454 = vst [vmem:[%s4970_s6 + $0x10] sm:$0xff] %v2442_v16  ;;  %v2644_v56 = vadd.f32 %v2640_v60, %v4785_v10  ;;  %v2641_v13 = vmul.f32 %v3172_v39, %v4987_v2  ;;  %v2616_v24 = vmul.f32 0.5, %v4747_v41  ;;  %v4995_v16 = vld [vmem:[#allocation13_spill] sm:$0xff] }
 0x379   :  { %v3176_v28 = vpop.eup %3175  ;;  %3195 = vtanh.f32 %v2542_v46  ;;  %2554 = vst [vmem:[%s4970_s6 + $0x18] sm:$0xff] %v2542_v46  ;;  %v2746_v19 = vadd.f32 %v2742_v3, %v4795_v14  ;;  %v2439_v44 = vmul.f32 %v3174_v22, %v4988_v33  ;;  %v2518_v4 = vadd.f32 0.5, %v2514_v43 }
 0x37a   :  { %v3178_v29 = vpop.eup %3177  ;;  %3197 = vtanh.f32 %v2644_v56  ;;  %2835 = vst [vmem:[%s4970_s6 + $0x60] sm:$0xff] %v2644_v56  ;;  %v2645_v10 = vadd.f32 %v2641_v13, %v4799_v49  ;;  %v2743_v63 = vmul.f32 %v3176_v28, %v4991_v20  ;;  %v2415_v30 = vmul.f32 0.5, %v4753_v6 }
 0x37b   :  { %v3180_v48 = vpop.eup %3179  ;;  %3199 = vtanh.f32 %v2746_v19  ;;  %2847 = vst [vmem:[%s4970_s6 + $0x68] sm:$0xff] %v2746_v19  ;;  %v2443_v14 = vadd.f32 %v2439_v44, %v4801_v35  ;;  %v2539_v15 = vmul.f32 %v3178_v29, %v4992_v27  ;;  %v2496_v60 = vmul.f32 0.5, %v4995_v16 }
 0x37c   :  { %v3182_v12 = vpop.eup %3181  ;;  %3201 = vtanh.f32 %v2645_v10  ;;  %2836 = vst [vmem:[%s4970_s6 + $0x70] sm:$0xff] %v2645_v10  ;;  %v2747_v49 = vadd.f32 %v2743_v63, %v4807_v37  ;;  %v2440_v5 = vmul.f32 %v3180_v48, %v4993_v38  ;;  %v2719_v41 = vmul.f32 0.5, %v4764_v40  ;;  %v2532_v63 = vld [vmem:[%s4969_s2 + $0x38] sm:$0xff] }
 0x37d   :  { %v3184_v25 = vpop.eup %3183  ;;  %v2650_v36 = vmul.f32 %v3182_v12, %v2617_v0  ;;  %3203 = vtanh.f32 %v2443_v14  ;;  %2455 = vst [vmem:[%s4970_s6 + $0x20] sm:$0xff] %v2443_v14  ;;  %v2543_v35 = vadd.f32 %v2539_v15, %v4809_v21  ;;  %v2615_v0 = vmul.f32 0.5, %v4735_v7 }
 0x37e   :  { %v3186_v23 = vpop.eup %3185  ;;  %v2752_v18 = vmul.f32 %v3184_v25, %v2720_v53  ;;  %3205 = vtanh.f32 %v2747_v49  ;;  %2848 = vst [vmem:[%s4970_s6 + $0x78] sm:$0xff] %v2747_v49  ;;  %v2444_v37 = vadd.f32 %v2440_v5, %v4815_v58  ;;  %v2517_v21 = vadd.f32 0.5, %v2513_v31 }
 0x37f   :  { %v3188_v8 = vpop.eup %3187  ;;  %2837 = vst [vmem:[%s4971_s5 + $0x40] sm:$0xff] %v2650_v36  ;;  %v2651_v42 = vmul.f32 %v3186_v23, %v2618_v1  ;;  %3207 = vtanh.f32 %v2543_v35  ;;  %2555 = vst [vmem:[%s4970_s6 + $0x28] sm:$0xff] %v2543_v35  ;;  %v2619_v39 = vadd.f32 0.5, %v2615_v0  ;;  %v2722_v3 = vadd.f32 0.5, %v2718_v51 }
 0x380   :  { %v3190_v45 = vpop.eup %3189  ;;  %2849 = vst [vmem:[%s4971_s5 + $0x48] sm:$0xff] %v2752_v18  ;;  %v2449_v58 = vmul.f32 %v3188_v8, %v2417_v57  ;;  %3209 = vtanh.f32 %v2444_v37  ;;  %2456 = vst [vmem:[%s4970_s6 + $0x30] sm:$0xff] %v2444_v37  ;;  %v2515_v6 = vmul.f32 0.5, %v4771_v62  ;;  %v2508_v22 = vmul.f32 0.5, %v4865_v50  ;;  %v4996_v57 = vld [vmem:[#allocation5_spill] sm:$0xff] }
 0x381   :  { %v3192_v7 = vpop.eup %3191  ;;  %2838 = vst [vmem:[%s4971_s5 + $0x50] sm:$0xff] %v2651_v42  ;;  %v2753_v11 = vmul.f32 %v3190_v45, %v2721_v9  ;;  %3211 = vtanh.f32 %v2884_v34  ;;  %v2620_v2 = vadd.f32 0.5, %v2616_v24  ;;  %v2416_v40 = vmul.f32 0.5, %v4781_v54 }
 0x382   :  { %v3194_v52 = vpop.eup %3193  ;;  %2457 = vst [vmem:[%s4971_s5] sm:$0xff] %v2449_v58  ;;  %v2549_v26 = vmul.f32 %v3192_v7, %v2517_v21  ;;  %v2476_v19 = vmul.f32 0.5, %v4996_v57  ;;  %v2419_v62 = vadd.f32 0.5, %v2415_v30  ;;  %v2723_v29 = vadd.f32 0.5, %v2719_v41 }
 0x383   :  { %v3196_v53 = vpop.eup %3195  ;;  %2850 = vst [vmem:[%s4971_s5 + $0x58] sm:$0xff] %v2753_v11  ;;  %v2450_v1 = vmul.f32 %v3194_v52, %v2418_v61  ;;  %v2500_v47 = vadd.f32 0.5, %v2496_v60  ;;  %v2519_v50 = vadd.f32 0.5, %v2515_v6  ;;  %3213 = vtanh.f32 %v2508_v22 }
 0x384   :  { %v3198_v46 = vpop.eup %3197  ;;  %2557 = vst [vmem:[%s4971_s5 + $0x8] sm:$0xff] %v2549_v26  ;;  %v2550_v55 = vmul.f32 %v3196_v53, %v2518_v4  ;;  %v2420_v48 = vadd.f32 0.5, %v2416_v40  ;;  %v2480_v27 = vadd.f32 0.5, %v2476_v19 }
 0x385   :  { %v3200_v56 = vpop.eup %3199  ;;  %2458 = vst [vmem:[%s4971_s5 + $0x10] sm:$0xff] %v2450_v1  ;;  %v2652_v13 = vmul.f32 %v3198_v46, %v2619_v39  ;;  %v2536_v49 = vmul.f32 %v2532_v63, %v2500_v47 }
 0x386   :  { %v3202_v28 = vpop.eup %3201  ;;  %2558 = vst [vmem:[%s4971_s5 + $0x18] sm:$0xff] %v2550_v55  ;;  %v2754_v33 = vmul.f32 %v3200_v56, %v2722_v3 }
 0x387   :  { %v3204_v44 = vpop.eup %3203  ;;  %2839 = vst [vmem:[%s4971_s5 + $0x60] sm:$0xff] %v2652_v13  ;;  %v2653_v54 = vmul.f32 %v3202_v28, %v2620_v2 }
 0x388   :  { %v3206_v59 = vpop.eup %3205  ;;  %2851 = vst [vmem:[%s4971_s5 + $0x68] sm:$0xff] %v2754_v33  ;;  %v2451_v10 = vmul.f32 %v3204_v44, %v2419_v62 }
 0x389   :  { %v3208_v20 = vpop.eup %3207  ;;  %2840 = vst [vmem:[%s4971_s5 + $0x70] sm:$0xff] %v2653_v54  ;;  %v2755_v31 = vmul.f32 %v3206_v59, %v2723_v29 }
 0x38a   :  { %v3210_v14 = vpop.eup %3209  ;;  %2459 = vst [vmem:[%s4971_s5 + $0x20] sm:$0xff] %v2451_v10  ;;  %v2551_v15 = vmul.f32 %v3208_v20, %v2519_v50 }
 0x38b   :  { %v3212_v12 = vpop.eup %3211  ;;  %2852 = vst [vmem:[%s4971_s5 + $0x78] sm:$0xff] %v2755_v31  ;;  %v2452_v17 = vmul.f32 %v3210_v14, %v2420_v48 }
 0x38c   :  { %2559 = vst [vmem:[%s4971_s5 + $0x28] sm:$0xff] %v2551_v15  ;;  %v2540_v38 = vmul.f32 %v3212_v12, %v2480_v27 }
 0x38d   :  { %2460 = vst [vmem:[%s4971_s5 + $0x30] sm:$0xff] %v2452_v17  ;;  %v3214_v25 = vpop.eup %3213 }
 0x38e   :  { %v2544_v5 = vadd.f32 %v2540_v38, %v2536_v49  ;;  %v2516_v36 = vmul.f32 0.5, %v3214_v25 }
 0x390   :  { %3215 = vtanh.f32 %v2544_v5  ;;  %2556 = vst [vmem:[%s4970_s6 + $0x38] sm:$0xff] %v2544_v5  ;;  %v2520_v35 = vadd.f32 0.5, %v2516_v36 }
 0x39a   :  { %v3216_v32 = vpop.eup %3215 }
 0x39b   :  { %v2552_v34 = vmul.f32 %v3216_v32, %v2520_v35 }
 0x39d   :  { %2560 = vst [vmem:[%s4971_s5 + $0x38] sm:$0xff] %v2552_v34 }

</bundles_post_ra>
